<compile_context>
chip_gen: v6e
topology: v6e:2x2x1
jax: 0.10.0
libtpu: 0.0.40
codegen_flags: <defaults>
</compile_context>

<pallas_src>
import functools

import jax
import jax.numpy as jnp
from jax.experimental import pallas as pl
from jax.experimental.pallas import tpu as pltpu

LANE = 128


def _round_up(c, m=LANE):
    return ((c + m - 1) // m) * m


# ----------------------------- Pallas kernel --------------------------------
def imrdb_kernel(x_ref, w1_ref, b1_ref, dww_ref, dwb_ref, w2_ref, b2_ref,
                 o_ref, *, has_skip):
    H = x_ref.shape[1]
    W = x_ref.shape[2]
    Cin = x_ref.shape[3]          # lane-padded (multiple of 128)
    Ch = w1_ref.shape[1]          # lane-padded hidden dims
    Cout = o_ref.shape[3]         # lane-padded output dims

    x2d = x_ref[0].reshape(H * W, Cin).astype(jnp.float32)

    # conv_1x1 (1x1 conv + folded BN) + ReLU  -> expand to hidden dims (MXU)
    h1 = jnp.dot(x2d, w1_ref[...],
                 preferred_element_type=jnp.float32) + b1_ref[...]
    h1 = jnp.maximum(h1, 0.0)                      # (H*W, Ch)
    h1_3d = h1.reshape(H, W, Ch)

    # RepDWBlock: fused 3x3 depthwise conv + bias.
    # Build the zero-padded activation as a register-resident value (no VMEM
    # scratch, no whole-buffer zero-fill) and accumulate 9 shifted taps.
    dw = dww_ref[...]                              # (3, 3, Ch)
    zrow = jnp.zeros((1, W, Ch), jnp.float32)
    zcol = jnp.zeros((H + 2, 1, Ch), jnp.float32)
    hp = jnp.concatenate([zrow, h1_3d, zrow], axis=0)    # (H+2, W,   Ch)
    hp = jnp.concatenate([zcol, hp, zcol], axis=1)       # (H+2, W+2, Ch)

    acc = h1_3d * dw[1, 1]                         # center tap (unshifted)
    for dy in range(3):
        for dx in range(3):
            if dy == 1 and dx == 1:
                continue
            acc = acc + hp[dy:dy + H, dx:dx + W, :] * dw[dy, dx]
    acc = acc + dwb_ref[...]

    # RepDWBlock relu followed by IMRDB act relu is idempotent -> single ReLU,
    # then the inner residual.
    y = jnp.maximum(acc, 0.0) + h1_3d              # (H, W, Ch)

    # pw_linear: 1x1 conv + folded BN (no activation)  (MXU)
    out = jnp.dot(y.reshape(H * W, Ch), w2_ref[...],
                  preferred_element_type=jnp.float32) + b2_ref[...]

    if has_skip:                                   # dim_in == dim_out
        out = out + x2d

    o_ref[0] = out.reshape(H, W, Cout).astype(o_ref.dtype)


def imrdb_pallas_nhwc(x_p, w1, b1, dww, dwb, w2, b2, *, has_skip):
    """x_p: (N, H, W, Cin_pad) NHWC with channels already padded to 128 lanes."""
    N, H, W, Cin = x_p.shape
    Ch = w1.shape[1]
    Cout = w2.shape[1]
    kernel = functools.partial(imrdb_kernel, has_skip=has_skip)
    return pl.pallas_call(
        kernel,
        out_shape=jax.ShapeDtypeStruct((N, H, W, Cout), x_p.dtype),
        grid_spec=pltpu.PrefetchScalarGridSpec(
            num_scalar_prefetch=0,
            grid=(N,),
            in_specs=[
                pl.BlockSpec((1, H, W, Cin), lambda n: (n, 0, 0, 0)),
                pl.BlockSpec((Cin, Ch), lambda n: (0, 0)),
                pl.BlockSpec((1, Ch), lambda n: (0, 0)),
                pl.BlockSpec((3, 3, Ch), lambda n: (0, 0, 0)),
                pl.BlockSpec((1, Ch), lambda n: (0, 0)),
                pl.BlockSpec((Ch, Cout), lambda n: (0, 0)),
                pl.BlockSpec((1, Cout), lambda n: (0, 0)),
            ],
            out_specs=pl.BlockSpec((1, H, W, Cout), lambda n: (n, 0, 0, 0)),
        ),
        compiler_params=pltpu.CompilerParams(
            dimension_semantics=("parallel",)),
    )(x_p, w1, b1, dww, dwb, w2, b2)


# ----------------------- parameter setup (plain JAX glue) -------------------
def fold_bn(gamma, beta, mean, var, eps):
    scale = gamma / jnp.sqrt(var + eps)
    return scale, beta - mean * scale


def make_params(key, dim_in, dim_out, exp_ratio):
    hidden = int(dim_in * exp_ratio)
    ks = jax.random.split(key, 9)

    def bn_params(k, c):
        k1, k2, k3, k4 = jax.random.split(k, 4)
        gamma = jax.random.uniform(k1, (c,), jnp.float32, 0.8, 1.2)
        beta = 0.1 * jax.random.normal(k2, (c,), jnp.float32)
        mean = 0.1 * jax.random.normal(k3, (c,), jnp.float32)
        var = jax.random.uniform(k4, (c,), jnp.float32, 0.5, 1.5)
        return gamma, beta, mean, var

    # conv_1x1 : Conv2d(dim_in, hidden, 1, bias=False) + BN(eps=1e-6) + ReLU
    wc1 = 0.2 * jax.random.normal(ks[0], (hidden, dim_in), jnp.float32)
    s1, bias1 = fold_bn(*bn_params(ks[1], hidden), eps=1e-6)
    w1 = (wc1 * s1[:, None]).T                      # (Cin, hidden)
    b1 = bias1.reshape(1, hidden)

    # RepDWBlock on `hidden` channels (depthwise, groups=hidden), BN eps=1e-3
    w3 = 0.2 * jax.random.normal(ks[2], (hidden, 3, 3), jnp.float32)  # dw 3x3
    s3, b3 = fold_bn(*bn_params(ks[3], hidden), eps=1e-3)
    wp = 0.2 * jax.random.normal(ks[4], (hidden,), jnp.float32)       # dw 1x1
    sp, bp = fold_bn(*bn_params(ks[5], hidden), eps=1e-3)
    si, bi = fold_bn(*bn_params(ks[6], hidden), eps=1e-3)             # identity BN

    dw_k = w3 * s3[:, None, None]                   # (hidden, 3, 3)
    dw_k = dw_k.at[:, 1, 1].add(wp * sp + si)       # fuse 1x1 + identity branches
    dw_b = b3 + bp + bi

    # pw_linear : Conv2d(hidden, dim_out, 1, bias=False) + BN(eps=1e-6), no act
    wc2 = 0.2 * jax.random.normal(ks[7], (dim_out, hidden), jnp.float32)
    s2, bias2 = fold_bn(*bn_params(ks[8], dim_out), eps=1e-6)
    w2 = (wc2 * s2[:, None]).T                      # (hidden, dim_out)
    b2 = bias2.reshape(1, dim_out)

    # --- lane-pad every channel dim to a multiple of 128 (exact; zeros) ------
    cin_p = _round_up(dim_in)
    ch_p = _round_up(hidden)
    cout_p = _round_up(dim_out)
    w1p = jnp.zeros((cin_p, ch_p), jnp.float32).at[:dim_in, :hidden].set(w1)
    b1p = jnp.zeros((1, ch_p), jnp.float32).at[:, :hidden].set(b1)
    dwwp = jnp.zeros((3, 3, ch_p), jnp.float32).at[:, :, :hidden].set(
        jnp.transpose(dw_k, (1, 2, 0)))             # (3, 3, Ch_pad)
    dwbp = jnp.zeros((1, ch_p), jnp.float32).at[:, :hidden].set(dw_b[None, :])
    w2p = jnp.zeros((ch_p, cout_p), jnp.float32).at[:hidden, :dim_out].set(w2)
    b2p = jnp.zeros((1, cout_p), jnp.float32).at[:, :dim_out].set(b2)

    return dict(
        # padded kernel parameters
        w1p=w1p, b1p=b1p, dwwp=dwwp, dwbp=dwbp, w2p=w2p, b2p=b2p,
        # unpadded parameters (reference)
        w1=w1, b1=b1, dw_k=dw_k, dw_b=dw_b, w2=w2, b2=b2,
        dim_in=dim_in, dim_out=dim_out, hidden=hidden)


def imrdb_pallas_nchw(x_nchw, p):
    # Demo-only layout glue (PyTorch is NCHW). In a real NHWC end-to-end
    # pipeline the transposes and the channel pad/slice disappear entirely.
    N, C, H, W = x_nchw.shape
    x_nhwc = jnp.transpose(x_nchw, (0, 2, 3, 1))
    cin_p = p["w1p"].shape[0]
    x_p = jnp.pad(x_nhwc, ((0, 0), (0, 0), (0, 0), (0, cin_p - C)))
    y_p = imrdb_pallas_nhwc(x_p, p["w1p"], p["b1p"], p["dwwp"], p["dwbp"],
                            p["w2p"], p["b2p"],
                            has_skip=(p["dim_in"] == p["dim_out"]))
    y = y_p[..., :p["dim_out"]]
    return jnp.transpose(y, (0, 3, 1, 2))


# ------------------------- pure-JAX reference (NCHW) ------------------------
def reference_nchw(x, p):
    Ch = p["hidden"]

    def conv(x, w_oihw, groups=1):
        return jax.lax.conv_general_dilated(
            x, w_oihw, (1, 1), "SAME",
            dimension_numbers=("NCHW", "OIHW", "NCHW"),
            feature_group_count=groups)

    w1_oihw = jnp.transpose(p["w1"], (1, 0))[..., None, None]   # (Ch, Cin, 1, 1)
    w2_oihw = jnp.transpose(p["w2"], (1, 0))[..., None, None]   # (Cout, Ch, 1, 1)
    dw_oihw = p["dw_k"][:, None, :, :]                          # (Ch, 1, 3, 3)

    h = jax.nn.relu(conv(x, w1_oihw) + p["b1"][0][None, :, None, None])
    d = conv(h, dw_oihw, groups=Ch) + p["dw_b"][None, :, None, None]
    y = jax.nn.relu(d)                 # RepDWBlock nonlinearity
    y = jax.nn.relu(y) + h             # IMRDB act + residual
    out = conv(y, w2_oihw) + p["b2"][0][None, :, None, None]
    return out + x                     # has_skip (dim_in == dim_out)


# ---------------------------------- main -------------------------------------
if __name__ == "__main__":
    # IMRDB(dim_in=8, dim_out=8, exp_ratio=2, kernel_size=3, act_layer='relu')
    N, C, H, W = 2, 8, 16, 16
    exp_ratio = 2

    key = jax.random.PRNGKey(0)
    kx, kp = jax.random.split(key)
    x = jax.random.normal(kx, (N, C, H, W), jnp.float32)     # NCHW, like PyTorch
    params = make_params(kp, C, C, exp_ratio)

    out = imrdb_pallas_nchw(x, params)
    out = jax.block_until_ready(out)

    ref = reference_nchw(x, params)
    assert out.shape == (N, C, H, W)
    max_err = float(jnp.max(jnp.abs(out - ref)))
    if not jnp.allclose(out, ref, atol=2e-2, rtol=2e-2):
        raise AssertionError(f"mismatch vs reference, max abs err = {max_err}")

    print("KERNEL_OK")
</pallas_src>

<mosaic_0001>
module attributes {stable_mosaic.version = 11 : i64} {
  func.func @imrdb_kernel(%arg0: i32, %arg1: memref<1x16x16x128xf32, #tpu.memory_space<vmem>>, %arg2: memref<128x128xf32, #tpu.memory_space<vmem>>, %arg3: memref<1x128xf32, #tpu.memory_space<vmem>>, %arg4: memref<3x3x128xf32, #tpu.memory_space<vmem>>, %arg5: memref<1x128xf32, #tpu.memory_space<vmem>>, %arg6: memref<128x128xf32, #tpu.memory_space<vmem>>, %arg7: memref<1x128xf32, #tpu.memory_space<vmem>>, %arg8: memref<1x16x16x128xf32, #tpu.memory_space<vmem>>) attributes {dimension_semantics = [#tpu.dimension_semantics<parallel>], iteration_bounds = array<i64: 2>, scalar_prefetch = 0 : i64, scratch_operands = 0 : i64, tpu.core_type = #tpu.core_type<tc>, window_params = [{transform_indices = @transform_0, window_bounds = array<i64: 1, 16, 16, 128>}, {pipeline_mode = #tpu.pipeline_mode<synchronous>, transform_indices = @transform_1, window_bounds = array<i64: 128, 128>}, {pipeline_mode = #tpu.pipeline_mode<synchronous>, transform_indices = @transform_2, window_bounds = array<i64: 1, 128>}, {pipeline_mode = #tpu.pipeline_mode<synchronous>, transform_indices = @transform_3, window_bounds = array<i64: 3, 3, 128>}, {pipeline_mode = #tpu.pipeline_mode<synchronous>, transform_indices = @transform_4, window_bounds = array<i64: 1, 128>}, {pipeline_mode = #tpu.pipeline_mode<synchronous>, transform_indices = @transform_5, window_bounds = array<i64: 128, 128>}, {pipeline_mode = #tpu.pipeline_mode<synchronous>, transform_indices = @transform_6, window_bounds = array<i64: 1, 128>}, {transform_indices = @transform_7, window_bounds = array<i64: 1, 16, 16, 128>}]} {
    %c0 = arith.constant 0 : index
    %c0_0 = arith.constant 0 : index
    %c0_1 = arith.constant 0 : index
    %c0_2 = arith.constant 0 : index
    %0 = vector.load %arg1[%c0, %c0_0, %c0_1, %c0_2] : memref<1x16x16x128xf32, #tpu.memory_space<vmem>>, vector<1x16x16x128xf32>
    %1 = vector.shape_cast %0 : vector<1x16x16x128xf32> to vector<16x16x128xf32>
    %2 = vector.shape_cast %1 : vector<16x16x128xf32> to vector<256x128xf32>
    %c0_3 = arith.constant 0 : index
    %c0_4 = arith.constant 0 : index
    %3 = vector.load %arg2[%c0_3, %c0_4] : memref<128x128xf32, #tpu.memory_space<vmem>>, vector<128x128xf32>
    %cst = arith.constant dense<0.000000e+00> : vector<256x128xf32>
    %4 = tpu.matmul %2, %3, %cst {dimension_numbers = #tpu.dot_dimension_numbers<[1], [0], [0], [1], [0, 0, 1, 1], [], []>} : vector<256x128xf32>, vector<128x128xf32>, vector<256x128xf32> -> vector<256x128xf32>
    %c0_5 = arith.constant 0 : index
    %c0_6 = arith.constant 0 : index
    %5 = vector.load %arg3[%c0_5, %c0_6] : memref<1x128xf32, #tpu.memory_space<vmem>>, vector<1x128xf32>
    %6 = vector.broadcast %5 : vector<1x128xf32> to vector<256x128xf32>
    %7 = arith.addf %4, %6 : vector<256x128xf32>
    %cst_7 = arith.constant 0.000000e+00 : f32
    %8 = vector.broadcast %cst_7 : f32 to vector<256x128xf32>
    %9 = arith.maximumf %7, %8 : vector<256x128xf32>
    %10 = vector.shape_cast %9 : vector<256x128xf32> to vector<16x16x128xf32>
    %c0_8 = arith.constant 0 : index
    %c0_9 = arith.constant 0 : index
    %c0_10 = arith.constant 0 : index
    %11 = vector.load %arg4[%c0_8, %c0_9, %c0_10] : memref<3x3x128xf32, #tpu.memory_space<vmem>>, vector<3x3x128xf32>
    %cst_11 = arith.constant 0.000000e+00 : f32
    %12 = vector.broadcast %cst_11 : f32 to vector<1x16x128xf32>
    %cst_12 = arith.constant 0.000000e+00 : f32
    %13 = vector.broadcast %cst_12 : f32 to vector<18x1x128xf32>
    %14 = tpu.concatenate %12, %10, %12 in 0 : vector<1x16x128xf32>, vector<16x16x128xf32>, vector<1x16x128xf32> -> vector<18x16x128xf32>
    %15 = tpu.concatenate %13, %14, %13 in 1 : vector<18x1x128xf32>, vector<18x16x128xf32>, vector<18x1x128xf32> -> vector<18x18x128xf32>
    %16 = vector.extract_strided_slice %11 {offsets = [1, 1, 0], sizes = [1, 1, 128], strides = [1, 1, 1]} : vector<3x3x128xf32> to vector<1x1x128xf32>
    %17 = vector.shape_cast %16 : vector<1x1x128xf32> to vector<128xf32>
    %18 = vector.shape_cast %17 : vector<128xf32> to vector<1x1x128xf32>
    %19 = vector.broadcast %18 : vector<1x1x128xf32> to vector<16x16x128xf32>
    %20 = arith.mulf %10, %19 : vector<16x16x128xf32>
    %21 = vector.extract_strided_slice %15 {offsets = [0, 0, 0], sizes = [16, 16, 128], strides = [1, 1, 1]} : vector<18x18x128xf32> to vector<16x16x128xf32>
    %22 = vector.extract_strided_slice %11 {offsets = [0, 0, 0], sizes = [1, 1, 128], strides = [1, 1, 1]} : vector<3x3x128xf32> to vector<1x1x128xf32>
    %23 = vector.shape_cast %22 : vector<1x1x128xf32> to vector<128xf32>
    %24 = vector.shape_cast %23 : vector<128xf32> to vector<1x1x128xf32>
    %25 = vector.broadcast %24 : vector<1x1x128xf32> to vector<16x16x128xf32>
    %26 = arith.mulf %21, %25 : vector<16x16x128xf32>
    %27 = arith.addf %20, %26 : vector<16x16x128xf32>
    %28 = vector.extract_strided_slice %15 {offsets = [0, 1, 0], sizes = [16, 16, 128], strides = [1, 1, 1]} : vector<18x18x128xf32> to vector<16x16x128xf32>
    %29 = vector.extract_strided_slice %11 {offsets = [0, 1, 0], sizes = [1, 1, 128], strides = [1, 1, 1]} : vector<3x3x128xf32> to vector<1x1x128xf32>
    %30 = vector.shape_cast %29 : vector<1x1x128xf32> to vector<128xf32>
    %31 = vector.shape_cast %30 : vector<128xf32> to vector<1x1x128xf32>
    %32 = vector.broadcast %31 : vector<1x1x128xf32> to vector<16x16x128xf32>
    %33 = arith.mulf %28, %32 : vector<16x16x128xf32>
    %34 = arith.addf %27, %33 : vector<16x16x128xf32>
    %35 = vector.extract_strided_slice %15 {offsets = [0, 2, 0], sizes = [16, 16, 128], strides = [1, 1, 1]} : vector<18x18x128xf32> to vector<16x16x128xf32>
    %36 = vector.extract_strided_slice %11 {offsets = [0, 2, 0], sizes = [1, 1, 128], strides = [1, 1, 1]} : vector<3x3x128xf32> to vector<1x1x128xf32>
    %37 = vector.shape_cast %36 : vector<1x1x128xf32> to vector<128xf32>
    %38 = vector.shape_cast %37 : vector<128xf32> to vector<1x1x128xf32>
    %39 = vector.broadcast %38 : vector<1x1x128xf32> to vector<16x16x128xf32>
    %40 = arith.mulf %35, %39 : vector<16x16x128xf32>
    %41 = arith.addf %34, %40 : vector<16x16x128xf32>
    %42 = vector.extract_strided_slice %15 {offsets = [1, 0, 0], sizes = [16, 16, 128], strides = [1, 1, 1]} : vector<18x18x128xf32> to vector<16x16x128xf32>
    %43 = vector.extract_strided_slice %11 {offsets = [1, 0, 0], sizes = [1, 1, 128], strides = [1, 1, 1]} : vector<3x3x128xf32> to vector<1x1x128xf32>
    %44 = vector.shape_cast %43 : vector<1x1x128xf32> to vector<128xf32>
    %45 = vector.shape_cast %44 : vector<128xf32> to vector<1x1x128xf32>
    %46 = vector.broadcast %45 : vector<1x1x128xf32> to vector<16x16x128xf32>
    %47 = arith.mulf %42, %46 : vector<16x16x128xf32>
    %48 = arith.addf %41, %47 : vector<16x16x128xf32>
    %49 = vector.extract_strided_slice %15 {offsets = [1, 2, 0], sizes = [16, 16, 128], strides = [1, 1, 1]} : vector<18x18x128xf32> to vector<16x16x128xf32>
    %50 = vector.extract_strided_slice %11 {offsets = [1, 2, 0], sizes = [1, 1, 128], strides = [1, 1, 1]} : vector<3x3x128xf32> to vector<1x1x128xf32>
    %51 = vector.shape_cast %50 : vector<1x1x128xf32> to vector<128xf32>
    %52 = vector.shape_cast %51 : vector<128xf32> to vector<1x1x128xf32>
    %53 = vector.broadcast %52 : vector<1x1x128xf32> to vector<16x16x128xf32>
    %54 = arith.mulf %49, %53 : vector<16x16x128xf32>
    %55 = arith.addf %48, %54 : vector<16x16x128xf32>
    %56 = vector.extract_strided_slice %15 {offsets = [2, 0, 0], sizes = [16, 16, 128], strides = [1, 1, 1]} : vector<18x18x128xf32> to vector<16x16x128xf32>
    %57 = vector.extract_strided_slice %11 {offsets = [2, 0, 0], sizes = [1, 1, 128], strides = [1, 1, 1]} : vector<3x3x128xf32> to vector<1x1x128xf32>
    %58 = vector.shape_cast %57 : vector<1x1x128xf32> to vector<128xf32>
    %59 = vector.shape_cast %58 : vector<128xf32> to vector<1x1x128xf32>
    %60 = vector.broadcast %59 : vector<1x1x128xf32> to vector<16x16x128xf32>
    %61 = arith.mulf %56, %60 : vector<16x16x128xf32>
    %62 = arith.addf %55, %61 : vector<16x16x128xf32>
    %63 = vector.extract_strided_slice %15 {offsets = [2, 1, 0], sizes = [16, 16, 128], strides = [1, 1, 1]} : vector<18x18x128xf32> to vector<16x16x128xf32>
    %64 = vector.extract_strided_slice %11 {offsets = [2, 1, 0], sizes = [1, 1, 128], strides = [1, 1, 1]} : vector<3x3x128xf32> to vector<1x1x128xf32>
    %65 = vector.shape_cast %64 : vector<1x1x128xf32> to vector<128xf32>
    %66 = vector.shape_cast %65 : vector<128xf32> to vector<1x1x128xf32>
    %67 = vector.broadcast %66 : vector<1x1x128xf32> to vector<16x16x128xf32>
    %68 = arith.mulf %63, %67 : vector<16x16x128xf32>
    %69 = arith.addf %62, %68 : vector<16x16x128xf32>
    %70 = vector.extract_strided_slice %15 {offsets = [2, 2, 0], sizes = [16, 16, 128], strides = [1, 1, 1]} : vector<18x18x128xf32> to vector<16x16x128xf32>
    %71 = vector.extract_strided_slice %11 {offsets = [2, 2, 0], sizes = [1, 1, 128], strides = [1, 1, 1]} : vector<3x3x128xf32> to vector<1x1x128xf32>
    %72 = vector.shape_cast %71 : vector<1x1x128xf32> to vector<128xf32>
    %73 = vector.shape_cast %72 : vector<128xf32> to vector<1x1x128xf32>
    %74 = vector.broadcast %73 : vector<1x1x128xf32> to vector<16x16x128xf32>
    %75 = arith.mulf %70, %74 : vector<16x16x128xf32>
    %76 = arith.addf %69, %75 : vector<16x16x128xf32>
    %c0_13 = arith.constant 0 : index
    %c0_14 = arith.constant 0 : index
    %77 = vector.load %arg5[%c0_13, %c0_14] : memref<1x128xf32, #tpu.memory_space<vmem>>, vector<1x128xf32>
    %78 = vector.shape_cast %77 : vector<1x128xf32> to vector<1x1x128xf32>
    %79 = vector.broadcast %78 : vector<1x1x128xf32> to vector<16x16x128xf32>
    %80 = arith.addf %76, %79 : vector<16x16x128xf32>
    %cst_15 = arith.constant 0.000000e+00 : f32
    %81 = vector.broadcast %cst_15 : f32 to vector<16x16x128xf32>
    %82 = arith.maximumf %80, %81 : vector<16x16x128xf32>
    %83 = arith.addf %82, %10 : vector<16x16x128xf32>
    %84 = vector.shape_cast %83 : vector<16x16x128xf32> to vector<256x128xf32>
    %c0_16 = arith.constant 0 : index
    %c0_17 = arith.constant 0 : index
    %85 = vector.load %arg6[%c0_16, %c0_17] : memref<128x128xf32, #tpu.memory_space<vmem>>, vector<128x128xf32>
    %cst_18 = arith.constant dense<0.000000e+00> : vector<256x128xf32>
    %86 = tpu.matmul %84, %85, %cst_18 {dimension_numbers = #tpu.dot_dimension_numbers<[1], [0], [0], [1], [0, 0, 1, 1], [], []>} : vector<256x128xf32>, vector<128x128xf32>, vector<256x128xf32> -> vector<256x128xf32>
    %c0_19 = arith.constant 0 : index
    %c0_20 = arith.constant 0 : index
    %87 = vector.load %arg7[%c0_19, %c0_20] : memref<1x128xf32, #tpu.memory_space<vmem>>, vector<1x128xf32>
    %88 = vector.broadcast %87 : vector<1x128xf32> to vector<256x128xf32>
    %89 = arith.addf %86, %88 : vector<256x128xf32>
    %90 = arith.addf %89, %2 : vector<256x128xf32>
    %91 = vector.shape_cast %90 : vector<256x128xf32> to vector<16x16x128xf32>
    %c0_21 = arith.constant 0 : index
    %c0_22 = arith.constant 0 : index
    %c0_23 = arith.constant 0 : index
    %c0_24 = arith.constant 0 : index
    %92 = vector.load %arg8[%c0_21, %c0_22, %c0_23, %c0_24] : memref<1x16x16x128xf32, #tpu.memory_space<vmem>>, vector<1x16x16x128xf32>
    %93 = vector.shape_cast %92 : vector<1x16x16x128xf32> to vector<16x16x128xf32>
    %94 = vector.shape_cast %91 : vector<16x16x128xf32> to vector<1x16x16x128xf32>
    tpu.vector_store %arg8[%c0_21, %c0_22, %c0_23, %c0_24], %94 {strides = array<i32>} : memref<1x16x16x128xf32, #tpu.memory_space<vmem>>, vector<1x16x16x128xf32>,
    return
  }
  func.func @transform_0(%arg0: i32) -> (i32, i32, i32, i32) {
    %c0_i32 = arith.constant 0 : i32
    %c0_i32_0 = arith.constant 0 : i32
    %c0_i32_1 = arith.constant 0 : i32
    %c0_i32_2 = arith.constant 0 : i32
    return %arg0, %c0_i32, %c0_i32_0, %c0_i32_1 : i32, i32, i32, i32
  }
  func.func @transform_1(%arg0: i32) -> (i32, i32) {
    %c0_i32 = arith.constant 0 : i32
    %c0_i32_0 = arith.constant 0 : i32
    %c0_i32_1 = arith.constant 0 : i32
    return %c0_i32, %c0_i32_0 : i32, i32
  }
  func.func @transform_2(%arg0: i32) -> (i32, i32) {
    %c0_i32 = arith.constant 0 : i32
    %c0_i32_0 = arith.constant 0 : i32
    %c0_i32_1 = arith.constant 0 : i32
    return %c0_i32, %c0_i32_0 : i32, i32
  }
  func.func @transform_3(%arg0: i32) -> (i32, i32, i32) {
    %c0_i32 = arith.constant 0 : i32
    %c0_i32_0 = arith.constant 0 : i32
    %c0_i32_1 = arith.constant 0 : i32
    %c0_i32_2 = arith.constant 0 : i32
    return %c0_i32, %c0_i32_0, %c0_i32_1 : i32, i32, i32
  }
  func.func @transform_4(%arg0: i32) -> (i32, i32) {
    %c0_i32 = arith.constant 0 : i32
    %c0_i32_0 = arith.constant 0 : i32
    %c0_i32_1 = arith.constant 0 : i32
    return %c0_i32, %c0_i32_0 : i32, i32
  }
  func.func @transform_5(%arg0: i32) -> (i32, i32) {
    %c0_i32 = arith.constant 0 : i32
    %c0_i32_0 = arith.constant 0 : i32
    %c0_i32_1 = arith.constant 0 : i32
    return %c0_i32, %c0_i32_0 : i32, i32
  }
  func.func @transform_6(%arg0: i32) -> (i32, i32) {
    %c0_i32 = arith.constant 0 : i32
    %c0_i32_0 = arith.constant 0 : i32
    %c0_i32_1 = arith.constant 0 : i32
    return %c0_i32, %c0_i32_0 : i32, i32
  }
  func.func @transform_7(%arg0: i32) -> (i32, i32, i32, i32) {
    %c0_i32 = arith.constant 0 : i32
    %c0_i32_0 = arith.constant 0 : i32
    %c0_i32_1 = arith.constant 0 : i32
    %c0_i32_2 = arith.constant 0 : i32
    return %arg0, %c0_i32, %c0_i32_0, %c0_i32_1 : i32, i32, i32, i32
  }
}

</mosaic_0001>

<bundles_post_ra>
// kernel: tpu_custom_call.1
= control target key start
LH: loop header
LB: loop body
LE: loop exit
PB: predicated region body
PF: predicated region fallthrough
CT: control target
= control target key end

     0   :  { %s5361_s0 = inlined_call_operand.hbm [shape: f32[2,16,16,128], index: 0, kind: input, shape index: {}]   ;;  %s5362_s1 = inlined_call_operand.hbm [shape: f32[128,128], index: 1, kind: input, shape index: {}]   ;;  %s5363_s2 = inlined_call_operand.vmem [shape: f32[1,128], index: 2, kind: input, shape index: {}]   ;;  %s5364_s3 = inlined_call_operand.hbm [shape: f32[3,3,128], index: 3, kind: input, shape index: {}]   ;;  %s5365_s4 = inlined_call_operand.vmem [shape: f32[1,128], index: 4, kind: input, shape index: {}]   ;;  %s5366_s5 = inlined_call_operand.hbm [shape: f32[128,128], index: 5, kind: input, shape index: {}]   ;;  %s5367_s6 = inlined_call_operand.vmem [shape: f32[1,128], index: 6, kind: input, shape index: {}]   ;;  %s5368_s7 = inlined_call_operand.hbm [shape: f32[2,16,16,128], index: 7, kind: output, shape index: {}]  }
   0x1   :  { %5434 = sst [smem:[#allocation65_spill]] %s5362_s1 }
   0x2   :  { %12 = vsyncpa [#allocation3], 0 }
   0x3   :  { %14 = vsyncpa [#allocation3 + $0x1], 0 }
   0x4   :  { %15 = vsyncpa [#allocation6], 0 }
   0x5   :  { %16 = vsyncpa [#allocation9], 0 }
   0x6   :  { %17 = vsyncpa [#allocation4], 0 }
   0x7   :  { %19 = vsyncpa [#allocation4 + $0x1], 0  ;;  %s3448_s24 = smov 0   ;;  %s3450_s25 = smov 0  }
   0x8   :  { %s3452_s26 = smov 0   ;;  %s3454_s27 = smov 0  }
   0x9 LB: > { %s3469_s28 = sadd.s32 4294967295, %s3394_s27   ;;  %s2817_s29 = sadd.s32 4294967294, %s3394_s27   ;;  %s3394_s27 = sphi %s3454_s27, %s5668_s27   ;;  %s3390_s26 = sphi %s3452_s26, %s5667_s26   ;;  %s3386_s25 = sphi %s3450_s25, %s5666_s25   ;;  %s3382_s24 = sphi %s3448_s24, %s5665_s24  }
   0xa   : > { %p45_p0 = scmp.ne.s32.totalorder %s3386_s25, %s3382_s24  ;;  %p5370_p1 = scmp.eq.s32.totalorder %s3469_s28, 0 }
   0xb   : > { %p195_p2 = scmp.eq.s32.totalorder %s3469_s28, 1  ;;  %p201_p3 = scmp.eq.s32.totalorder %s2817_s29, 1 }
   0xc   : > { %p3478_p4 = por %p5370_p1, %p45_p0  ;;  %p2818_p5 = scmp.ge.s32.totalorder %s3394_s27, 1 }
   0xd   : > { %p3483_p6 = por %p201_p3, %p45_p0  ;;  %p208_p7 = scmp.lt.s32.totalorder %s3394_s27, 3 }
   0xe   : > { %s5435_s30 = scalar_select %p3478_p4, 1, 0 }
   0xf   : > { %s5436_s8 = scalar_select %p3483_p6, 1, 0 }
  0x10   : > { %p3488_p8 = pnand %p2818_p5, %p208_p7  ;;  %s3396_s10 = smov [#allocation5]  }
  0x11   : > { %s220_s11 = sshll.u32 %s3396_s10, 4  ;;  %s3397_s13 = smov [#allocation7]   ;;  %s221_s11 = int_to_ptr.vmem [resolvable:$true] %s220_s11 }
  0x12   : > { %s5437_s9 = scalar_select %p3488_p8, 1, 0 }
  0x13   : > { %p3114_p9 = pneg %p3488_p8  ;;  %s236_s14 = sshll.u32 %s3397_s13, 4  ;;  %s237_s14 = int_to_ptr.vmem [resolvable:$true] %s236_s14 }
  0x14   : > { %s3227_s15 = scalar_lea.vmem %s221_s11, 2048  ;;  %p3235_p5 = scmp.lt.s32.totalorder %s221_s11, %s221_s11 }
  0x15   : > { %p3497_p11 = pnand %p3114_p9, %p5370_p1  ;;  %p3228_p13 = scmp.ne.s32.totalorder %s221_s11, %s3227_s15 }
  0x16   : > { %p3236_p7 = scmp.lt.s32.totalorder %s3227_s15, %s3227_s15 }
  0x17   : > { %p3218_p12 = pneg %p3497_p11 }
  0x18   : > { %p3237_p10 = por %p3236_p7, %p3235_p5 }
  0x19   : > { %p3230_p0 = pnand %p3228_p13, %p3218_p12 }
  0x1b   : > { %p3231_p3 = pneg %p3230_p0 }
  0x1d   : > { %p3238_p9 = pnand %p3237_p10, %p3231_p3 }
  0x1f   : > { %3241 = shalt.err (!%p3238_p9)
}
  0x20   : > { %s5369_s16 = smov 128   ;;  %s5371_s17 = smov 8  }
  0x21   : > { %s5439_s1 = sld [smem:[#allocation65_spill]]  ;;  %s3253_s20 = scalar_lea.vmem %s237_s14, 192 }
  0x22   : > { %p3254_p13 = scmp.ne.s32.totalorder %s237_s14, %s3253_s20  ;;  %p3261_p10 = scmp.lt.s32.totalorder %s237_s14, %s237_s14 }
  0x23   : > { %p3262_p3 = scmp.lt.s32.totalorder %s3253_s20, %s3253_s20 }
  0x24   : > { %p3256_p0 = pnand %p3254_p13, %p3218_p12 }
  0x25   : > { %p3263_p7 = por %p3262_p3, %p3261_p10 }
  0x26   : > { %p3257_p5 = pneg %p3256_p0 }
  0x27   : > { %3117 = dma.hbm_to_vmem [thread:$0]  (!%p3497_p11), %s5439_s1, 2048, %s221_s11, [#allocation6], %s5369_s16, %s5369_s16, %s5371_s17  }
  0x28   : > { %p3264_p9 = pnand %p3263_p7, %p3257_p5 }
  0x2a   : > { %3267 = shalt.err (!%p3264_p9)
}
  0x2b   : > { %s3400_s21 = smov 64   ;;  %s3401_s22 = smov 4  }
  0x2c   : > { %3120 = dma.hbm_to_vmem [thread:$0]  (!%p3497_p11), %s5364_s3, 192, %s237_s14, [#allocation6], %s3400_s21, %s3400_s21, %s3401_s22  }
  0x2d   : > { %s3402_s10 = smov [#allocation8]   ;;  %s3523_s13 = sadd.s32 1, %s3394_s27  }
  0x2e   : > { %s252_s11 = sshll.u32 %s3402_s10, 4  ;;  %s253_s11 = int_to_ptr.vmem [resolvable:$true] %s252_s11 }
  0x2f   : > { %s3279_s15 = scalar_lea.vmem %s253_s11, 2048  ;;  %p3287_p10 = scmp.lt.s32.totalorder %s253_s11, %s253_s11 }
  0x30   : > { %p3280_p13 = scmp.ne.s32.totalorder %s253_s11, %s3279_s15  ;;  %p3288_p3 = scmp.lt.s32.totalorder %s3279_s15, %s3279_s15 }
  0x32   : > { %p3282_p0 = pnand %p3280_p13, %p3218_p12  ;;  %p3289_p7 = por %p3288_p3, %p3287_p10 }
  0x34   : > { %p3283_p5 = pneg %p3282_p0 }
  0x36   : > { %p3290_p9 = pnand %p3289_p7, %p3283_p5 }
  0x38   : > { %3293 = shalt.err (!%p3290_p9)
}
  0x39   : > { %3123 = dma.hbm_to_vmem [thread:$0]  (!%p3497_p11), %s5366_s5, 2048, %s253_s11, [#allocation9], %s5369_s16, %s5369_s16, %s5371_s17  }
  0x3a   : > { %s29_s19 = ssub.s32 %s3394_s27, %s3523_s13  ;;  %s32_s12 = sadd.s32 1, %s3390_s26 }
  0x3b   : > { %p30_p12 = scmp.eq.s32.totalorder %s29_s19, 0  ;;  %p39_p13 = scmp.ne.s32.totalorder %s3390_s26, %s3386_s25 }
  0x3c   : > { %p40_p0 = scmp.eq.s32.totalorder %s3394_s27, 0  ;;  %p3135_p5 = scmp.lt.s32.totalorder %s3394_s27, 2 }
  0x3d   : > { %s3544_s20 = scalar_select %p30_p12, %s3390_s26, %s32_s12  }
  0x3e   : > { %p41_p10 = por %p40_p0, %p39_p13  ;;  %p3548_p3 = por %p195_p2, %p39_p13 }
  0x3f   : > { %s269_s22 = sand.u32 1, %s3390_s26   ;;  %s2840_s23 = sshll.u32 %s3394_s27, 12 }
  0x40   : > { %s5440_s21 = scalar_select %p3548_p3, 1, 0 }
  0x41   : > { %s2823_s29 = sshll.u32 %s269_s22, 8  ;;  %s3557_s11 = scalar_lea.hbm %s5361_s0, %s2840_s23 }
  0x42   : > { %s273_s14 = scalar_lea.vmem [#allocation2], %s2823_s29  ;;  %p3559_p11 = pnand %p3135_p5, %p41_p10 }
  0x43   : > { %s280_s18 = sshll.u32 %s273_s14, 4  ;;  %s3565_s12 = scalar_lea.sflag [#allocation3], %s269_s22  ;;  %s3563_s18 = int_to_ptr.vmem [resolvable:$true] %s280_s18 }
  0x44   : > { %s3294_s16 = scalar_lea.hbm %s3557_s11, 4096  ;;  %p3296_p7 = pneg %p3559_p11 }
  0x45   : > { %p3295_p2 = scmp.ne.s32.totalorder %s3557_s11, %s3294_s16  ;;  %s3299_s29 = scalar_lea.hbm %s5361_s0, 8192 }
  0x46   : > { %p3300_p13 = scmp.lt.s32.totalorder %s3557_s11, %s5361_s0  ;;  %p3301_p0 = scmp.lt.s32.totalorder %s3299_s29, %s3294_s16 }
  0x47   : > { %p3297_p9 = pnand %p3296_p7, %p3295_p2 }
  0x48   : > { %p3302_p5 = por %p3301_p0, %p3300_p13 }
  0x49   : > { %p3298_p12 = pneg %p3297_p9 }
  0x4b   : > { %p3303_p10 = pnand %p3302_p5, %p3298_p12 }
  0x4d   : > { %3306 = shalt.err (!%p3303_p10)
}
  0x4e   : > { %s3307_s22 = scalar_lea.vmem %s3563_s18, 4096  ;;  %s3403_s17 = smov [#allocation2]  }
  0x4f   : > { %p3308_p1 = scmp.ne.s32.totalorder %s3563_s18, %s3307_s22  ;;  %s3312_s1 = sshll.u32 %s3403_s17, 4  ;;  %s3313_s1 = int_to_ptr.vmem [resolvable:$false] %s3312_s1 }
  0x50   : > { %s3314_s23 = scalar_lea.vmem %s3313_s1, 8192  ;;  %p3315_p9 = scmp.lt.s32.totalorder %s3563_s18, %s3313_s1 }
  0x51   : > { %p3310_p6 = pnand %p3308_p1, %p3296_p7  ;;  %p3316_p3 = scmp.lt.s32.totalorder %s3314_s23, %s3307_s22 }
  0x53   : > { %p3311_p2 = pneg %p3310_p6  ;;  %p3317_p4 = por %p3316_p3, %p3315_p9 }
  0x55   : > { %p3318_p8 = pnand %p3317_p4, %p3311_p2 }
  0x57   : > { %3321 = shalt.err (!%p3318_p8)
}
  0x58   : > { %s5442_s16 = smov 8   ;;  %s5443_s10 = smov 128  }
  0x59   : > { %3127 = dma.hbm_to_vmem [thread:$0]  (!%p3559_p11), %s3557_s11, 4096, %s3563_s18, %s3565_s12, %s5443_s10, %s5443_s10, %s5442_s16  }
  0x5a   : > { %p5444_p1 = scmp.ne.s32.totalorder %s5437_s9, 0 }
  0x5c   : > { %292 = sbr.rel (%p5444_p1) target bundleno = 873 (0x369), region = 48 }
  0x61   : > { %s3592_s17 = sand.u32 1, %s3386_s25   ;;  %p5445_p4 = scmp.ne.s32.totalorder %s5435_s30, 0 }
  0x62   : > { %s2827_s1 = sshll.u32 %s3592_s17, 8  ;;  %s295_s29 = scalar_lea.sflag [#allocation3], %s3592_s17 }
  0x63   : > { %s3598_s19 = scalar_lea.vmem [#allocation2], %s2827_s1 }
  0x64   : > { %3365 = dma.done.wait (%p5445_p4), %s295_s29, 4096  }
  0x65   : > { %3367 = vsyncadd (%p5445_p4), %s295_s29, 4294963200  ;;  %p5446_p6 = scmp.eq.s32.totalorder %s3469_s28, 0 }
  0x67   : > { %3369 = dma.done.wait (%p5446_p6), [#allocation6], 2240   ;;  %p5447_p8 = pmov %p5446_p6 }
  0x68   : > { %p5448_p3 = pmov %p5446_p6 }
  0x69   : > { %3371 = vsyncadd (%p5447_p8), [#allocation6], 4294965056 }
  0x6a   : > { %3373 = dma.done.wait (%p5448_p3), [#allocation9], 2048   ;;  %p5449_p11 = pmov %p5448_p3 }
  0x6b   : > { %v388_v0 = vld [vmem:[#allocation5 + $0x78] sm:$0xff]  ;;  %v387_v1 = vld [vmem:[#allocation5 + $0x70] sm:$0xff]  ;;  %v386_v2 = vld [vmem:[#allocation5 + $0x68] sm:$0xff]  ;;  %vm689_vm0 = vcmask 1040384   ;;  %vm1028_vm1 = vcmask 1046528   ;;  %vm1273_vm2 = vcmask 1045504  }
  0x6c   : > { %3375 = vsyncadd (%p5449_p11), [#allocation9], 4294965248  ;;  %2938 = vmatprep.subr.mxu0 %v388_v0  ;;  %v385_v3 = vld [vmem:[#allocation5 + $0x60] sm:$0xff]  ;;  %v384_v5 = vld [vmem:[#allocation5 + $0x58] sm:$0xff]  ;;  %s5214_s10 = scalar_lea.vmem [#allocation10], %s2827_s1  ;;  %s2841_s1 = sshll.u32 %s3469_s28, 12 }
  0x6d   : > { %2939 = vmatpush3.msra.mxu0 %v388_v0  ;;  %v341_v4 = vld [vmem:[%s3598_s19] sm:$0xff]  ;;  %v383_v6 = vld [vmem:[#allocation5 + $0x50] sm:$0xff]  ;;  %v382_v7 = vld [vmem:[#allocation5 + $0x48] sm:$0xff]  ;;  %v824_v0 = vlaneseq  ;;  %s2715_s29 = sshll.u32 %s5214_s10, 4  ;;  %s5313_s11 = scalar_lea.hbm %s5368_s7, %s2841_s1  ;;  %s5315_s29 = int_to_ptr.vmem [resolvable:$true] %s2715_s29 }
  0x6e   : > { %2940 = vmatprep.subr.mxu0 %v387_v1  ;;  %2970 = vmatprep.mubr.f32.mxu0 %v341_v4  ;;  %v381_v8 = vld [vmem:[#allocation5 + $0x40] sm:$0xff]  ;;  %v380_v9 = vld [vmem:[#allocation5 + $0x38] sm:$0xff]  ;;  %v379_v10 = vld [vmem:[#allocation5 + $0x30] sm:$0xff]  ;;  %s2702_s28 = scalar_lea.sflag [#allocation4], %s3592_s17  ;;  %s3322_s18 = scalar_lea.vmem %s5315_s29, 4096 }
  0x6f   : > { %2941 = vmatpush3.msra.mxu0 %v387_v1  ;;  %v378_v11 = vld [vmem:[#allocation5 + $0x28] sm:$0xff]  ;;  %v377_v12 = vld [vmem:[#allocation5 + $0x20] sm:$0xff]  ;;  %v376_v13 = vld [vmem:[#allocation5 + $0x18] sm:$0xff]  ;;  %v825_v1 = vshrl.u32 %v824_v0, 7  ;;  %p3323_p7 = scmp.ne.s32.totalorder %s5315_s29, %s3322_s18  ;;  %p5662_p12 = scmp.ne.s32.totalorder %s5440_s21, 0 }
  0x70   : > { %2942 = vmatprep.subr.mxu0 %v386_v2  ;;  %v375_v14 = vld [vmem:[#allocation5 + $0x10] sm:$0xff]  ;;  %v374_v15 = vld [vmem:[#allocation5 + $0x8] sm:$0xff]  ;;  %v373_v16 = vld [vmem:[#allocation5] sm:$0xff]  ;;  %s3405_s12 = smov [#allocation10]  }
  0x71   : > { %2943 = vmatpush3.msra.mxu0 %v386_v2  ;;  %v342_v17 = vld [vmem:[%s3598_s19 + $0x8] sm:$0xff]  ;;  %v343_v18 = vld [vmem:[%s3598_s19 + $0x10] sm:$0xff]  ;;  %v344_v19 = vld [vmem:[%s3598_s19 + $0x18] sm:$0xff]  ;;  %v826_v2 = vsub.s32 1, %v825_v1  ;;  %v1175_v4 = vsub.s32 2, %v825_v1  ;;  %p3324_p13 = pnand %p3323_p7, %p5662_p12  ;;  %s3326_s15 = sshll.u32 %s3405_s12, 4  ;;  %s3327_s15 = int_to_ptr.vmem [resolvable:$false] %s3326_s15 }
  0x72   : > { %2944 = vmatprep.subr.mxu0 %v385_v3  ;;  %v345_v20 = vld [vmem:[%s3598_s19 + $0x20] sm:$0xff]  ;;  %v346_v21 = vld [vmem:[%s3598_s19 + $0x28] sm:$0xff]  ;;  %v347_v22 = vld [vmem:[%s3598_s19 + $0x30] sm:$0xff]  ;;  %s3328_s14 = scalar_lea.vmem %s3327_s15, 8192  ;;  %p3329_p5 = scmp.lt.s32.totalorder %s5315_s29, %s3327_s15 }
  0x73   : > { %2945 = vmatpush3.msra.mxu0 %v385_v3  ;;  %v348_v23 = vld [vmem:[%s3598_s19 + $0x38] sm:$0xff]  ;;  %v349_v24 = vld [vmem:[%s3598_s19 + $0x40] sm:$0xff]  ;;  %v350_v25 = vld [vmem:[%s3598_s19 + $0x48] sm:$0xff]  ;;  %p3325_p0 = pneg %p3324_p13  ;;  %p3330_p10 = scmp.lt.s32.totalorder %s3328_s14, %s3322_s18 }
  0x74   : > { %2946 = vmatprep.subr.mxu0 %v384_v5  ;;  %v351_v26 = vld [vmem:[%s3598_s19 + $0x50] sm:$0xff]  ;;  %v352_v27 = vld [vmem:[%s3598_s19 + $0x58] sm:$0xff]  ;;  %v353_v28 = vld [vmem:[%s3598_s19 + $0x60] sm:$0xff] }
  0x75   : > { %2947 = vmatpush3.msra.mxu0 %v384_v5  ;;  %v354_v29 = vld [vmem:[%s3598_s19 + $0x68] sm:$0xff]  ;;  %v355_v30 = vld [vmem:[%s3598_s19 + $0x70] sm:$0xff]  ;;  %v356_v31 = vld [vmem:[%s3598_s19 + $0x78] sm:$0xff]  ;;  %v3404_v5 = vmov 0.0   ;;  %p3331_p2 = por %p3330_p10, %p3329_p5 }
  0x76   : > { %2948 = vmatprep.subr.mxu0 %v383_v6  ;;  %v357_v32 = vld [vmem:[%s3598_s19 + $0x80] sm:$0xff]  ;;  %v358_v33 = vld [vmem:[%s3598_s19 + $0x88] sm:$0xff]  ;;  %v359_v34 = vld [vmem:[%s3598_s19 + $0x90] sm:$0xff] }
  0x77   : > { %2949 = vmatpush3.msra.mxu0 %v383_v6  ;;  %v360_v35 = vld [vmem:[%s3598_s19 + $0x98] sm:$0xff]  ;;  %v361_v36 = vld [vmem:[%s3598_s19 + $0xa0] sm:$0xff]  ;;  %v362_v37 = vld [vmem:[%s3598_s19 + $0xa8] sm:$0xff]  ;;  %v3644_v6 = vrot.slane %v3404_v5, 7  ;;  %p3332_p9 = pnand %p3331_p2, %p3325_p0 }
  0x78   : > { %2950 = vmatprep.subr.mxu0 %v382_v7  ;;  %v363_v38 = vld [vmem:[%s3598_s19 + $0xb0] sm:$0xff]  ;;  %v364_v39 = vld [vmem:[%s3598_s19 + $0xb8] sm:$0xff]  ;;  %v365_v40 = vld [vmem:[%s3598_s19 + $0xc0] sm:$0xff] }
  0x79   : > { %2951 = vmatpush3.msra.mxu0 %v382_v7  ;;  %v366_v41 = vld [vmem:[%s3598_s19 + $0xc8] sm:$0xff]  ;;  %v367_v42 = vld [vmem:[%s3598_s19 + $0xd0] sm:$0xff]  ;;  %v368_v43 = vld [vmem:[%s3598_s19 + $0xd8] sm:$0xff]  ;;  %5450 = vst [vmem:[#allocation15_spill] sm:$0xff] %v3644_v6 }
  0x7a   : > { %2952 = vmatprep.subr.mxu0 %v381_v8  ;;  %v369_v44 = vld [vmem:[%s3598_s19 + $0xe0] sm:$0xff]  ;;  %v370_v45 = vld [vmem:[%s3598_s19 + $0xe8] sm:$0xff]  ;;  %v371_v46 = vld [vmem:[%s3598_s19 + $0xf0] sm:$0xff] }
  0x7b   : > { %2953 = vmatpush3.msra.mxu0 %v381_v8  ;;  %v372_v47 = vld [vmem:[%s3598_s19 + $0xf8] sm:$0xff]  ;;  %v2404_v48 = vld [vmem:[#allocation8 + $0x78] sm:$0xff]  ;;  %v2401_v51 = vld [vmem:[#allocation8 + $0x60] sm:$0xff] }
  0x7c   : > { %2954 = vmatprep.subr.mxu0 %v380_v9  ;;  %3018 = vmatprep.subr.mxu1 %v2404_v48  ;;  %v2403_v49 = vld [vmem:[#allocation8 + $0x70] sm:$0xff]  ;;  %v2402_v50 = vld [vmem:[#allocation8 + $0x68] sm:$0xff]  ;;  %v2400_v52 = vld [vmem:[#allocation8 + $0x58] sm:$0xff] }
  0x7d   : > { %2955 = vmatpush3.msra.mxu0 %v380_v9  ;;  %3019 = vmatpush3.msra.mxu1 %v2404_v48  ;;  %v2399_v53 = vld [vmem:[#allocation8 + $0x50] sm:$0xff]  ;;  %v2398_v54 = vld [vmem:[#allocation8 + $0x48] sm:$0xff]  ;;  %v2397_v55 = vld [vmem:[#allocation8 + $0x40] sm:$0xff]  ;;  %v3652_v9 = vsel %vm689_vm0, %v3644_v6, 0.0 }
  0x7e   : > { %2956 = vmatprep.subr.mxu0 %v379_v10  ;;  %3020 = vmatprep.subr.mxu1 %v2403_v49  ;;  %v2396_v56 = vld [vmem:[#allocation8 + $0x38] sm:$0xff]  ;;  %v2395_v57 = vld [vmem:[#allocation8 + $0x30] sm:$0xff]  ;;  %v2394_v58 = vld [vmem:[#allocation8 + $0x28] sm:$0xff]  ;;  %5451 = vst [vmem:[#allocation16_spill] sm:$0xff] %v3652_v9 }
  0x7f   : > { %2957 = vmatpush3.msra.mxu0 %v379_v10  ;;  %3021 = vmatpush3.msra.mxu1 %v2403_v49  ;;  %v2393_v59 = vld [vmem:[#allocation8 + $0x20] sm:$0xff]  ;;  %v2392_v60 = vld [vmem:[#allocation8 + $0x18] sm:$0xff]  ;;  %v2391_v61 = vld [vmem:[#allocation8 + $0x10] sm:$0xff]  ;;  %v3656_v10 = vsel %vm689_vm0, 0.0, %v3644_v6 }
  0x80   : > { %2958 = vmatprep.subr.mxu0 %v378_v11  ;;  %3022 = vmatprep.subr.mxu1 %v2402_v50  ;;  %v2390_v62 = vld [vmem:[#allocation8 + $0x8] sm:$0xff]  ;;  %v2389_v63 = vld [vmem:[#allocation8] sm:$0xff]  ;;  %v653_v3 = vld [vmem:[#allocation7] sm:$0x7]  ;;  %5452 = vst [vmem:[#allocation17_spill] sm:$0xff] %v3656_v10 }
  0x81   : > { %2959 = vmatpush3.msra.mxu0 %v378_v11  ;;  %3023 = vmatpush3.msra.mxu1 %v2402_v50  ;;  %v3646_v7 = vrot.slane %v653_v3, %v826_v2  ;;  %v3648_v8 = vrot.slane %v653_v3, %v1175_v4  ;;  %v862_v11 = vsub.s32 0, %v825_v1 }
  0x82   : > { %2960 = vmatprep.subr.mxu0 %v377_v12  ;;  %3024 = vmatprep.subr.mxu1 %v2401_v51 }
  0x83   : > { %2961 = vmatpush3.msra.mxu0 %v377_v12  ;;  %3025 = vmatpush3.msra.mxu1 %v2401_v51  ;;  %v933_v12 = vmul.f32 %v3646_v7, %v3644_v6 }
  0x84   : > { %2962 = vmatprep.subr.mxu0 %v376_v13  ;;  %3026 = vmatprep.subr.mxu1 %v2400_v52 }
  0x85   : > { %2963 = vmatpush3.msra.mxu0 %v376_v13  ;;  %3027 = vmatpush3.msra.mxu1 %v2400_v52  ;;  %v934_v13 = vmul.f32 %v3646_v7, %v3652_v9 }
  0x86   : > { %2964 = vmatprep.subr.mxu0 %v375_v14  ;;  %3028 = vmatprep.subr.mxu1 %v2399_v53 }
  0x87   : > { %2965 = vmatpush3.msra.mxu0 %v375_v14  ;;  %3029 = vmatpush3.msra.mxu1 %v2399_v53  ;;  %v1178_v14 = vmul.f32 %v3648_v8, %v3644_v6 }
  0x88   : > { %2966 = vmatprep.subr.mxu0 %v374_v15  ;;  %3030 = vmatprep.subr.mxu1 %v2398_v54 }
  0x89   : > { %2967 = vmatpush3.msra.mxu0 %v374_v15  ;;  %3031 = vmatpush3.msra.mxu1 %v2398_v54  ;;  %v1179_v15 = vmul.f32 %v3648_v8, %v3652_v9 }
  0x8a   : > { %2968 = vmatprep.subr.mxu0 %v373_v16  ;;  %3032 = vmatprep.subr.mxu1 %v2397_v55 }
  0x8b   : > { %2969 = vmatpush3.msra.mxu0 %v373_v16  ;;  %3033 = vmatpush3.msra.mxu1 %v2397_v55  ;;  %v932_v16 = vmul.f32 %v3646_v7, %v3656_v10 }
  0x8c   : > { %2971 = vmatmul.mubr.f32.vlgmr.msra.gmra.mxu0 %v342_v17  ;;  %3034 = vmatprep.subr.mxu1 %v2396_v56  ;;  %v3671_v17 = vld [vmem:[%s5363_s2] ss:$0 sm:$0xff] }
  0x8d   : > { %2973 = vmatprep.mubr.f32.mxu0 %v343_v18  ;;  %3035 = vmatpush3.msra.mxu1 %v2396_v56  ;;  %v654_v18 = vld [vmem:[#allocation7 + $0x4] sm:$0x7] }
  0x8e   : > { %3036 = vmatprep.subr.mxu1 %v2395_v57 }
  0x8f   : > { %3037 = vmatpush3.msra.mxu1 %v2395_v57 }
  0x90   : > { %2974 = vmatmul.mubr.f32.gmra.mxu0 %v344_v19  ;;  %3038 = vmatprep.subr.mxu1 %v2394_v58  ;;  %v3673_v19 = vrot.slane %v653_v3, %v862_v11 }
  0x91   : > { %2976 = vmatprep.mubr.f32.mxu0 %v345_v20  ;;  %3039 = vmatpush3.msra.mxu1 %v2394_v58  ;;  %v1177_v20 = vmul.f32 %v3648_v8, %v3656_v10 }
  0x92   : > { %3040 = vmatprep.subr.mxu1 %v2393_v59 }
  0x93   : > { %3041 = vmatpush3.msra.mxu1 %v2393_v59 }
  0x94   : > { %2977 = vmatmul.mubr.f32.gmra.mxu0 %v346_v21  ;;  %3042 = vmatprep.subr.mxu1 %v2392_v60  ;;  %v1030_v21 = vrot.slane %v933_v12, 1 }
  0x95   : > { %2979 = vmatprep.mubr.f32.mxu0 %v347_v22  ;;  %3043 = vmatpush3.msra.mxu1 %v2392_v60 }
  0x96   : > { %3044 = vmatprep.subr.mxu1 %v2391_v61 }
  0x97   : > { %3045 = vmatpush3.msra.mxu1 %v2391_v61 }
  0x98   : > { %2980 = vmatmul.mubr.f32.gmra.mxu0 %v348_v23  ;;  %3046 = vmatprep.subr.mxu1 %v2390_v62  ;;  %v1032_v23 = vrot.slane %v934_v13, 1 }
  0x99   : > { %2982 = vmatprep.mubr.f32.mxu0 %v349_v24  ;;  %3047 = vmatpush3.msra.mxu1 %v2390_v62  ;;  %v1275_v24 = vrot.slane %v1178_v14, 2 }
  0x9a   : > { %3048 = vmatprep.subr.mxu1 %v2389_v63 }
  0x9b   : > { %3049 = vmatpush3.msra.mxu1 %v2389_v63 }
  0x9c   : > { %2983 = vmatmul.mubr.f32.gmra.mxu0 %v350_v25  ;;  %v1277_v25 = vrot.slane %v1179_v15, 2 }
  0x9d   : > { %2985 = vmatprep.mubr.f32.mxu0 %v351_v26  ;;  %v1029_v26 = vrot.slane %v932_v16, 1 }
  0xa0   : > { %2986 = vmatmul.mubr.f32.gmra.mxu0 %v352_v27 }
  0xa1   : > { %2988 = vmatprep.mubr.f32.mxu0 %v353_v28  ;;  %v3678_v28 = vrot.slane %v654_v18, %v826_v2 }
  0xa4   : > { %2989 = vmatmul.mubr.f32.gmra.mxu0 %v354_v29  ;;  %v865_v29 = vmul.f32 %v3673_v19, %v3644_v6 }
  0xa5   : > { %2991 = vmatprep.mubr.f32.mxu0 %v355_v30 }
  0xa8   : > { %2992 = vmatmul.mubr.f32.gmra.mxu0 %v356_v31  ;;  %v1274_v31 = vrot.slane %v1177_v20, 2 }
  0xa9   : > { %2994 = vmatprep.mubr.f32.mxu0 %v357_v32 }
  0xac   : > { %2995 = vmatmul.mubr.f32.gmra.mxu0 %v358_v33  ;;  %v3684_v33 = vrot.slane %v654_v18, %v1175_v4 }
  0xad   : > { %2997 = vmatprep.mubr.f32.mxu0 %v359_v34 }
  0xb0   : > { %2998 = vmatmul.mubr.f32.gmra.mxu0 %v360_v35  ;;  %v864_v35 = vmul.f32 %v3673_v19, %v3656_v10 }
  0xb1   : > { %3000 = vmatprep.mubr.f32.mxu0 %v361_v36  ;;  %v655_v36 = vld [vmem:[#allocation7 + $0x8] sm:$0x7] }
  0xb2   : > { %v3703_v48 = vrot.slane %v655_v36, %v1175_v4  ;;  %v3705_v49 = vrot.slane %v655_v36, %v862_v11 }
  0xb4   : > { %3001 = vmatmul.mubr.f32.gmra.mxu0 %v362_v37  ;;  %v1033_v37 = vsel %vm1028_vm1, %v1030_v21, %v1032_v23 }
  0xb5   : > { %3003 = vmatprep.mubr.f32.mxu0 %v363_v38  ;;  %v1278_v38 = vsel %vm1273_vm2, %v1275_v24, %v1277_v25 }
  0xb8   : > { %3004 = vmatmul.mubr.f32.gmra.mxu0 %v364_v39  ;;  %v1031_v39 = vsel %vm1028_vm1, %v1029_v26, %v1030_v21 }
  0xb9   : > { %3006 = vmatprep.mubr.f32.mxu0 %v365_v40  ;;  %v3692_v40 = vrot.slane %v654_v18, %v862_v11 }
  0xbc   : > { %3007 = vmatmul.mubr.f32.gmra.mxu0 %v366_v41 }
  0xbd   : > { %3009 = vmatprep.mubr.f32.mxu0 %v367_v42 }
  0xc0   : > { %3010 = vmatmul.mubr.f32.gmra.mxu0 %v368_v43 }
  0xc1   : > { %3012 = vmatprep.mubr.f32.mxu0 %v369_v44 }
  0xc4   : > { %3013 = vmatmul.mubr.f32.gmra.mxu0 %v370_v45 }
  0xc5   : > { %3015 = vmatprep.mubr.f32.mxu0 %v371_v46  ;;  %v1276_v46 = vsel %vm1273_vm2, %v1274_v31, %v1275_v24 }
  0xc8   : > { %3016 = vmatmul.mubr.f32.gmra.mxu0 %v372_v47  ;;  %v3701_v47 = vrot.slane %v655_v36, %v826_v2 }
 0x14c   : > { %v2972_v22 = vpop.f32.mrf.mxu0 }
 0x14d   : > { %v468_v27 = vadd.f32 %v2972_v22, %v3671_v17 }
 0x14e   : > { %v462_v30 = vpop.f32.mrf.mxu0 }
 0x14f   : > { %v3682_v32 = vmax.f32 %v468_v27, 0.0  ;;  %v463_v34 = vadd.f32 %v3671_v17, %v462_v30 }
 0x150   : > { %v2975_v41 = vpop.f32.mrf.mxu0 }
 0x151   : > { %v693_v42 = vrot.slane %v3682_v32, 7  ;;  %v829_v43 = vmul.f32 %v3678_v28, %v3682_v32  ;;  %v3697_v44 = vmax.f32 %v463_v34, 0.0  ;;  %v478_v45 = vadd.f32 %v2975_v41, %v3671_v17 }
 0x152   : > { %v472_v58 = vpop.f32.mrf.mxu0 }
 0x153   : > { %v808_v50 = vsel %vm689_vm0, %v693_v42, 0.0  ;;  %v897_v51 = vadd.f32 %v865_v29, %v829_v43  ;;  %v692_v52 = vrot.slane %v3697_v44, 7  ;;  %v828_v53 = vmul.f32 %v3678_v28, %v3697_v44 }
 0x154   : > { %v937_v54 = vmul.f32 %v3646_v7, %v808_v50  ;;  %v1182_v55 = vmul.f32 %v3648_v8, %v808_v50  ;;  %v3714_v56 = vmul.f32 %v3684_v33, %v808_v50  ;;  %v3716_v57 = vmax.f32 %v478_v45, 0.0  ;;  %v2978_v16 = vpop.f32.mrf.mxu0 }
 0x155   : > { %v1142_v59 = vadd.f32 %v1033_v37, %v897_v51  ;;  %v694_v60 = vsel %vm689_vm0, %v692_v52, %v693_v42  ;;  %v791_v61 = vsel %vm689_vm0, 0.0, %v692_v52  ;;  %v896_v62 = vadd.f32 %v864_v35, %v828_v53 }
 0x156   : > { %5453 = vst [vmem:[#allocation18_spill] sm:$0xff] %v3716_v57  ;;  %v1037_v63 = vrot.slane %v937_v54, 1  ;;  %v1282_v0 = vrot.slane %v1182_v55, 2  ;;  %v935_v2 = vmul.f32 %v3646_v7, %v791_v61  ;;  %v1180_v5 = vmul.f32 %v3648_v8, %v791_v61 }
 0x157   : > { %v3722_v3 = vadd.f32 %v1278_v38, %v1142_v59  ;;  %v1141_v4 = vadd.f32 %v1031_v39, %v896_v62  ;;  %v1181_v11 = vmul.f32 %v3648_v8, %v694_v60  ;;  %v3727_v13 = vmul.f32 %v3692_v40, %v791_v61  ;;  %v482_v38 = vpop.f32.mrf.mxu0 }
 0x158   : > { %v1034_v12 = vrot.slane %v935_v2, 1  ;;  %v3730_v14 = vmul.f32 %v3692_v40, %v694_v60  ;;  %v3733_v15 = vmul.f32 %v3684_v33, %v791_v61  ;;  %v1279_v18 = vrot.slane %v1180_v5, 2 }
 0x159   : > { %v1280_v20 = vrot.slane %v1181_v11, 2  ;;  %v3735_v21 = vadd.f32 %v1276_v46, %v1141_v4  ;;  %v3738_v22 = vmul.f32 %v3684_v33, %v694_v60  ;;  %v696_v24 = vrot.slane %v3716_v57, 7  ;;  %v2981_v62 = vpop.f32.mrf.mxu0 }
 0x15a   : > { %v831_v25 = vmul.f32 %v3678_v28, %v3716_v57  ;;  %v867_v26 = vmul.f32 %v3673_v19, %v694_v60  ;;  %v936_v27 = vmul.f32 %v3646_v7, %v694_v60  ;;  %v473_v30 = vadd.f32 %v3671_v17, %v472_v58 }
 0x15b   : > { %v1283_v29 = vsel %vm1273_vm2, %v1280_v20, %v1282_v0  ;;  %v866_v31 = vmul.f32 %v3673_v19, %v791_v61  ;;  %v809_v34 = vsel %vm689_vm0, %v696_v24, 0.0  ;;  %v1281_v36 = vsel %vm1273_vm2, %v1279_v18, %v1280_v20 }
 0x15c   : > { %v899_v35 = vadd.f32 %v867_v26, %v831_v25  ;;  %v488_v37 = vadd.f32 %v2978_v16, %v3671_v17  ;;  %v940_v39 = vmul.f32 %v3646_v7, %v809_v34  ;;  %v1035_v41 = vrot.slane %v936_v27, 1 }
 0x15d   : > { %v1185_v42 = vmul.f32 %v3648_v8, %v809_v34  ;;  %v3755_v43 = vmul.f32 %v3684_v33, %v809_v34  ;;  %v3758_v45 = vmul.f32 %v3701_v47, %v809_v34  ;;  %v3761_v46 = vmul.f32 %v3703_v48, %v809_v34 }
 0x15e   : > { %v3763_v50 = vmax.f32 %v473_v30, 0.0  ;;  %v3765_v51 = vmax.f32 %v488_v37, 0.0  ;;  %v1038_v52 = vsel %vm1028_vm1, %v1035_v41, %v1037_v63  ;;  %v1042_v53 = vrot.slane %v940_v39, 1 }
 0x15f   : > { %v1287_v54 = vrot.slane %v1185_v42, 2  ;;  %v1144_v58 = vadd.f32 %v1038_v52, %v899_v35  ;;  %v1036_v0 = vsel %vm1028_vm1, %v1034_v12, %v1035_v41  ;;  %v483_v4 = vadd.f32 %v3671_v17, %v482_v38 }
 0x160   : > { %5454 = vst [vmem:[#allocation19_spill] sm:$0xff] %v3765_v51  ;;  %v695_v60 = vrot.slane %v3763_v50, 7  ;;  %v830_v61 = vmul.f32 %v3678_v28, %v3763_v50  ;;  %v699_v2 = vrot.slane %v3765_v51, 7  ;;  %v833_v63 = vmul.f32 %v3678_v28, %v3765_v51 }
 0x161   : > { %v3778_v5 = vadd.f32 %v1283_v29, %v1144_v58 }
 0x162   : > { %v3781_v11 = vsel %vm689_vm0, %v695_v60, %v696_v24  ;;  %v3784_v16 = vsel %vm689_vm0, 0.0, %v695_v60  ;;  %v898_v18 = vadd.f32 %v866_v31, %v830_v61  ;;  %v810_v12 = vsel %vm689_vm0, %v699_v2, 0.0  ;;  %v492_v31 = vpop.f32.mrf.mxu0 }
 0x163   : > { %v1424_v20 = vmul.f32 %v3692_v40, %v3784_v16  ;;  %v869_v25 = vmul.f32 %v3673_v19, %v3781_v11  ;;  %v939_v26 = vmul.f32 %v3646_v7, %v3781_v11  ;;  %v943_v29 = vmul.f32 %v3646_v7, %v810_v12 }
 0x164   : > { %v1143_v27 = vadd.f32 %v1036_v0, %v898_v18  ;;  %v1184_v24 = vmul.f32 %v3648_v8, %v3781_v11  ;;  %v1188_v30 = vmul.f32 %v3648_v8, %v810_v12  ;;  %v3798_v37 = vmul.f32 %v3684_v33, %v810_v12 }
 0x165   : > { %v901_v34 = vadd.f32 %v869_v25, %v833_v63  ;;  %v1040_v35 = vrot.slane %v939_v26, 1  ;;  %v3801_v38 = vmul.f32 %v3701_v47, %v810_v12  ;;  %v1047_v41 = vrot.slane %v943_v29, 1 }
 0x166   : > { %5455 = vst [vmem:[#allocation20_spill] sm:$0xff] %v3798_v37  ;;  %v1388_v39 = vadd.f32 %v1281_v36, %v1143_v27  ;;  %v1285_v42 = vrot.slane %v1184_v24, 2  ;;  %v1292_v52 = vrot.slane %v1188_v30, 2  ;;  %v3807_v0 = vmul.f32 %v3703_v48, %v810_v12  ;;  %v2984_v36 = vpop.f32.mrf.mxu0 }
 0x167   : > { %v1043_v58 = vsel %vm1028_vm1, %v1040_v35, %v1042_v53  ;;  %v3812_v26 = vmax.f32 %v483_v4, 0.0  ;;  %v868_v27 = vmul.f32 %v3673_v19, %v3784_v16  ;;  %v938_v53 = vmul.f32 %v3646_v7, %v3784_v16 }
 0x168   : > { %v3809_v63 = vadd.f32 %v1424_v20, %v1388_v39  ;;  %v1146_v18 = vadd.f32 %v1043_v58, %v901_v34  ;;  %v1288_v25 = vsel %vm1273_vm2, %v1285_v42, %v1287_v54  ;;  %v1183_v29 = vmul.f32 %v3648_v8, %v3784_v16 }
 0x169   : > { %5456 = vst [vmem:[#allocation21_spill] sm:$0xff] %v3812_v26  ;;  %v498_v12 = vadd.f32 %v2981_v62, %v3671_v17  ;;  %v698_v20 = vrot.slane %v3812_v26, 7  ;;  %v832_v54 = vmul.f32 %v3678_v28, %v3812_v26  ;;  %v493_v4 = vadd.f32 %v3671_v17, %v492_v31 }
 0x16a   : > { %v3821_v24 = vadd.f32 %v1288_v25, %v1146_v18  ;;  %v1039_v30 = vrot.slane %v938_v53, 1  ;;  %v1284_v34 = vrot.slane %v1183_v29, 2  ;;  %v508_v58 = vadd.f32 %v2984_v36, %v3671_v17 }
 0x16b   : > { %v3827_v39 = vmax.f32 %v498_v12, 0.0  ;;  %v3831_v60 = vsel %vm689_vm0, %v698_v20, %v699_v2  ;;  %v3834_v62 = vsel %vm689_vm0, 0.0, %v698_v20  ;;  %v900_v18 = vadd.f32 %v868_v27, %v832_v54 }
 0x16c   : > { %5457 = vst [vmem:[#allocation22_spill] sm:$0xff] %v3821_v24  ;;  %v3836_v25 = vmax.f32 %v493_v4, 0.0  ;;  %v1041_v61 = vsel %vm1028_vm1, %v1039_v30, %v1040_v35  ;;  %v1286_v55 = vsel %vm1273_vm2, %v1284_v34, %v1285_v42  ;;  %v1426_v31 = vmul.f32 %v3692_v40, %v3834_v62 }
 0x16d   : > { %5458 = vst [vmem:[#allocation23_spill] sm:$0xff] %v3827_v39  ;;  %v702_v53 = vrot.slane %v3827_v39, 7  ;;  %v1145_v29 = vadd.f32 %v1041_v61, %v900_v18  ;;  %v835_v2 = vmul.f32 %v3678_v28, %v3827_v39  ;;  %v871_v36 = vmul.f32 %v3673_v19, %v3831_v60 }
 0x16e   : > { %5459 = vst [vmem:[#allocation24_spill] sm:$0xff] %v3836_v25  ;;  %v942_v27 = vmul.f32 %v3646_v7, %v3831_v60  ;;  %v1187_v35 = vmul.f32 %v3648_v8, %v3831_v60  ;;  %v701_v42 = vrot.slane %v3836_v25, 7  ;;  %v834_v20 = vmul.f32 %v3678_v28, %v3836_v25 }
 0x16f   : > { %v811_v12 = vsel %vm689_vm0, %v702_v53, 0.0  ;;  %v1390_v61 = vadd.f32 %v1286_v55, %v1145_v29  ;;  %v903_v54 = vadd.f32 %v871_v36, %v835_v2 }
 0x170   : > { %v946_v4 = vmul.f32 %v3646_v7, %v811_v12  ;;  %v1045_v30 = vrot.slane %v942_v27, 1  ;;  %v1191_v34 = vmul.f32 %v3648_v8, %v811_v12  ;;  %v1290_v18 = vrot.slane %v1187_v35, 2 }
 0x171   : > { %v3858_v59 = vmul.f32 %v3684_v33, %v811_v12  ;;  %v3861_v1 = vmul.f32 %v3701_v47, %v811_v12  ;;  %v3863_v23 = vadd.f32 %v1426_v31, %v1390_v61  ;;  %v3867_v55 = vmul.f32 %v3703_v48, %v811_v12  ;;  %v502_v61 = vpop.f32.mrf.mxu0 }
 0x172   : > { %v1048_v9 = vsel %vm1028_vm1, %v1045_v30, %v1047_v41  ;;  %v1052_v6 = vrot.slane %v946_v4, 1  ;;  %v1293_v2 = vsel %vm1273_vm2, %v1290_v18, %v1292_v52  ;;  %v1297_v36 = vrot.slane %v1191_v34, 2 }
 0x173   : > { %5460 = vst [vmem:[#allocation25_spill] sm:$0xff] %v3858_v59  ;;  %5461 = vst [vmem:[#allocation26_spill] sm:$0xff] %v3861_v1  ;;  %v1148_v29 = vadd.f32 %v1048_v9, %v903_v54  ;;  %v3873_v10 = vsel %vm689_vm0, %v701_v42, %v702_v53  ;;  %v3876_v31 = vsel %vm689_vm0, 0.0, %v701_v42  ;;  %v870_v41 = vmul.f32 %v3673_v19, %v3834_v62 }
 0x174   : > { %5462 = vst [vmem:[#allocation27_spill] sm:$0xff] %v3867_v55  ;;  %v941_v9 = vmul.f32 %v3646_v7, %v3834_v62  ;;  %v1186_v52 = vmul.f32 %v3648_v8, %v3834_v62  ;;  %v1428_v54 = vmul.f32 %v3692_v40, %v3876_v31  ;;  %v3888_v4 = vmax.f32 %v508_v58, 0.0 }
 0x175   : > { %v3880_v12 = vadd.f32 %v1293_v2, %v1148_v29  ;;  %v902_v53 = vadd.f32 %v870_v41, %v834_v20  ;;  %v873_v42 = vmul.f32 %v3673_v19, %v3873_v10  ;;  %v945_v34 = vmul.f32 %v3646_v7, %v3873_v10 }
 0x176   : > { %5464 = vst [vmem:[#allocation29_spill] sm:$0xff] %v3888_v4  ;;  %v1044_v29 = vrot.slane %v941_v9, 1  ;;  %v1289_v2 = vrot.slane %v1186_v52, 2  ;;  %v1190_v27 = vmul.f32 %v3648_v8, %v3873_v10  ;;  %v503_v35 = vadd.f32 %v3671_v17, %v502_v61 }
 0x177   : > { %5463 = vst [vmem:[#allocation28_spill] sm:$0xff] %v3880_v12  ;;  %v705_v39 = vrot.slane %v3888_v4, 7  ;;  %v837_v20 = vmul.f32 %v3678_v28, %v3888_v4  ;;  %v1050_v58 = vrot.slane %v945_v34, 1  ;;  %v872_v41 = vmul.f32 %v3673_v19, %v3876_v31 }
 0x178   : > { %v1046_v25 = vsel %vm1028_vm1, %v1044_v29, %v1045_v30  ;;  %v1291_v59 = vsel %vm1273_vm2, %v1289_v2, %v1290_v18  ;;  %v1295_v9 = vrot.slane %v1190_v27, 2  ;;  %v3904_v52 = vmax.f32 %v503_v35, 0.0  ;;  %v2987_v30 = vpop.f32.mrf.mxu0 }
 0x179   : > { %v1147_v12 = vadd.f32 %v1046_v25, %v902_v53  ;;  %v812_v51 = vsel %vm689_vm0, %v705_v39, 0.0  ;;  %v905_v61 = vadd.f32 %v873_v42, %v837_v20  ;;  %v1053_v55 = vsel %vm1028_vm1, %v1050_v58, %v1052_v6 }
 0x17a   : > { %5465 = vst [vmem:[#allocation30_spill] sm:$0xff] %v3904_v52  ;;  %v949_v26 = vmul.f32 %v3646_v7, %v812_v51  ;;  %v1194_v34 = vmul.f32 %v3648_v8, %v812_v51  ;;  %v1298_v4 = vsel %vm1273_vm2, %v1295_v9, %v1297_v36  ;;  %v3912_v1 = vmul.f32 %v3684_v33, %v812_v51 }
 0x17b   : > { %v1392_v18 = vadd.f32 %v1291_v59, %v1147_v12  ;;  %v1150_v27 = vadd.f32 %v1053_v55, %v905_v61  ;;  %v3915_v35 = vmul.f32 %v3701_v47, %v812_v51  ;;  %v3918_v25 = vmul.f32 %v3703_v48, %v812_v51 }
 0x17c   : > { %5466 = vst [vmem:[#allocation31_spill] sm:$0xff] %v3912_v1  ;;  %v1057_v53 = vrot.slane %v949_v26, 1  ;;  %v1302_v6 = vrot.slane %v1194_v34, 2  ;;  %v704_v29 = vrot.slane %v3904_v52, 7  ;;  %v836_v59 = vmul.f32 %v3678_v28, %v3904_v52 }
 0x17d   : > { %5467 = vst [vmem:[#allocation32_spill] sm:$0xff] %v3915_v35  ;;  %5468 = vst [vmem:[#allocation33_spill] sm:$0xff] %v3918_v25  ;;  %v3922_v2 = vadd.f32 %v1428_v54, %v1392_v18  ;;  %v3924_v36 = vadd.f32 %v1298_v4, %v1150_v27  ;;  %v944_v26 = vmul.f32 %v3646_v7, %v3876_v31  ;;  %v512_v54 = vpop.f32.mrf.mxu0 }
 0x17e   : > { %v3930_v55 = vsel %vm689_vm0, %v704_v29, %v705_v39  ;;  %v3933_v51 = vsel %vm689_vm0, 0.0, %v704_v29  ;;  %v1189_v12 = vmul.f32 %v3648_v8, %v3876_v31  ;;  %v904_v4 = vadd.f32 %v872_v41, %v836_v59 }
 0x17f   : > { %5469 = vst [vmem:[#allocation34_spill] sm:$0xff] %v3922_v2  ;;  %5470 = vst [vmem:[#allocation35_spill] sm:$0xff] %v3924_v36  ;;  %v1430_v61 = vmul.f32 %v3692_v40, %v3933_v51  ;;  %v518_v34 = vadd.f32 %v2987_v30, %v3671_v17  ;;  %v875_v39 = vmul.f32 %v3673_v19, %v3930_v55  ;;  %v1049_v18 = vrot.slane %v944_v26, 1 }
 0x180   : > { %5471 = vst [vmem:[#allocation36_spill] sm:$0xff] %v3930_v55  ;;  %5472 = vst [vmem:[#allocation37_spill] sm:$0xff] %v3933_v51  ;;  %v1294_v27 = vrot.slane %v1189_v12, 2  ;;  %v948_v29 = vmul.f32 %v3646_v7, %v3930_v55  ;;  %v1193_v42 = vmul.f32 %v3648_v8, %v3930_v55  ;;  %v513_v41 = vadd.f32 %v3671_v17, %v512_v54 }
 0x181   : > { %v3948_v20 = vmax.f32 %v518_v34, 0.0  ;;  %v874_v59 = vmul.f32 %v3673_v19, %v3933_v51  ;;  %v947_v30 = vmul.f32 %v3646_v7, %v3933_v51  ;;  %v1051_v52 = vsel %vm1028_vm1, %v1049_v18, %v1050_v58  ;;  %v2990_v18 = vpop.f32.mrf.mxu0 }
 0x182   : > { %v1296_v26 = vsel %vm1273_vm2, %v1294_v27, %v1295_v9  ;;  %v1055_v12 = vrot.slane %v948_v29, 1  ;;  %v1300_v36 = vrot.slane %v1193_v42, 2  ;;  %v1149_v1 = vadd.f32 %v1051_v52, %v904_v4 }
 0x183   : > { %5473 = vst [vmem:[#allocation38_spill] sm:$0xff] %v3948_v20  ;;  %v708_v25 = vrot.slane %v3948_v20, 7  ;;  %v839_v34 = vmul.f32 %v3678_v28, %v3948_v20  ;;  %v3960_v35 = vmax.f32 %v513_v41, 0.0  ;;  %v1054_v55 = vrot.slane %v947_v30, 1  ;;  %v522_v24 = vpop.f32.mrf.mxu0 }
 0x184   : > { %v1058_v54 = vsel %vm1028_vm1, %v1055_v12, %v1057_v53  ;;  %v1303_v2 = vsel %vm1273_vm2, %v1300_v36, %v1302_v6  ;;  %v1192_v58 = vmul.f32 %v3648_v8, %v3933_v51  ;;  %v1394_v9 = vadd.f32 %v1296_v26, %v1149_v1 }
 0x185   : > { %5474 = vst [vmem:[#allocation39_spill] sm:$0xff] %v3960_v35  ;;  %v813_v42 = vsel %vm689_vm0, %v708_v25, 0.0  ;;  %v907_v52 = vadd.f32 %v875_v39, %v839_v34  ;;  %v707_v4 = vrot.slane %v3960_v35, 7 }
 0x186   : > { %v952_v27 = vmul.f32 %v3646_v7, %v813_v42  ;;  %v1197_v29 = vmul.f32 %v3648_v8, %v813_v42  ;;  %v3971_v41 = vmul.f32 %v3684_v33, %v813_v42  ;;  %v3974_v53 = vmul.f32 %v3701_v47, %v813_v42 }
 0x187   : > { %v3976_v6 = vadd.f32 %v1430_v61, %v1394_v9  ;;  %v1152_v30 = vadd.f32 %v1058_v54, %v907_v52  ;;  %v3979_v1 = vmul.f32 %v3703_v48, %v813_v42  ;;  %v3982_v39 = vsel %vm689_vm0, %v707_v4, %v708_v25 }
 0x188   : > { %5475 = vst [vmem:[#allocation40_spill] sm:$0xff] %v3971_v41  ;;  %v1062_v26 = vrot.slane %v952_v27, 1  ;;  %v1307_v34 = vrot.slane %v1197_v29, 2  ;;  %v3989_v57 = vsel %vm689_vm0, 0.0, %v707_v4  ;;  %v838_v61 = vmul.f32 %v3678_v28, %v3960_v35 }
 0x189   : > { %5476 = vst [vmem:[#allocation41_spill] sm:$0xff] %v3979_v1  ;;  %v3986_v37 = vadd.f32 %v1303_v2, %v1152_v30  ;;  %v1056_v54 = vsel %vm1028_vm1, %v1054_v55, %v1055_v12  ;;  %v1299_v9 = vrot.slane %v1192_v58, 2  ;;  %v1432_v25 = vmul.f32 %v3692_v40, %v3989_v57 }
 0x18a   : > { %v528_v42 = vadd.f32 %v2990_v18, %v3671_v17  ;;  %v877_v52 = vmul.f32 %v3673_v19, %v3982_v39  ;;  %v906_v27 = vadd.f32 %v874_v59, %v838_v61  ;;  %v951_v2 = vmul.f32 %v3646_v7, %v3982_v39 }
 0x18b   : > { %5477 = vst [vmem:[#allocation42_spill] sm:$0xff] %v3986_v37  ;;  %v1196_v4 = vmul.f32 %v3648_v8, %v3982_v39  ;;  %v523_v29 = vadd.f32 %v3671_v17, %v522_v24  ;;  %v1301_v55 = vsel %vm1273_vm2, %v1299_v9, %v1300_v36  ;;  %v876_v58 = vmul.f32 %v3673_v19, %v3989_v57 }
 0x18c   : > { %v4005_v12 = vmax.f32 %v528_v42, 0.0  ;;  %v950_v18 = vmul.f32 %v3646_v7, %v3989_v57  ;;  %v1151_v30 = vadd.f32 %v1056_v54, %v906_v27  ;;  %v1060_v59 = vrot.slane %v951_v2, 1  ;;  %v2993_v27 = vpop.f32.mrf.mxu0 }
 0x18d   : > { %v1305_v61 = vrot.slane %v1196_v4, 2  ;;  %v4011_v20 = vmax.f32 %v523_v29, 0.0  ;;  %v1195_v36 = vmul.f32 %v3648_v8, %v3989_v57 }
 0x18e   : > { %5478 = vst [vmem:[#allocation43_spill] sm:$0xff] %v4005_v12  ;;  %v711_v51 = vrot.slane %v4005_v12, 7  ;;  %v841_v24 = vmul.f32 %v3678_v28, %v4005_v12  ;;  %v1059_v35 = vrot.slane %v950_v18, 1  ;;  %v1396_v9 = vadd.f32 %v1301_v55, %v1151_v30 }
 0x18f   : > { %5479 = vst [vmem:[#allocation44_spill] sm:$0xff] %v4011_v20  ;;  %v1063_v42 = vsel %vm1028_vm1, %v1060_v59, %v1062_v26  ;;  %v1308_v37 = vsel %vm1273_vm2, %v1305_v61, %v1307_v34  ;;  %v710_v54 = vrot.slane %v4011_v20, 7  ;;  %v840_v29 = vmul.f32 %v3678_v28, %v4011_v20  ;;  %v532_v20 = vpop.f32.mrf.mxu0 }
 0x190   : > { %v814_v2 = vsel %vm689_vm0, %v711_v51, 0.0  ;;  %v909_v4 = vadd.f32 %v877_v52, %v841_v24  ;;  %v1061_v12 = vsel %vm1028_vm1, %v1059_v35, %v1060_v59  ;;  %v4025_v18 = vadd.f32 %v1432_v25, %v1396_v9 }
 0x191   : > { %v955_v41 = vmul.f32 %v3646_v7, %v814_v2  ;;  %v1200_v55 = vmul.f32 %v3648_v8, %v814_v2  ;;  %v4030_v26 = vmul.f32 %v3684_v33, %v814_v2  ;;  %v4033_v30 = vmul.f32 %v3701_v47, %v814_v2 }
 0x192   : > { %5480 = vst [vmem:[#allocation45_spill] sm:$0xff] %v4025_v18  ;;  %v1154_v34 = vadd.f32 %v1063_v42, %v909_v4  ;;  %v4036_v52 = vmul.f32 %v3703_v48, %v814_v2  ;;  %v4039_v24 = vsel %vm689_vm0, %v710_v54, %v711_v51  ;;  %v4043_v9 = vsel %vm689_vm0, 0.0, %v710_v54 }
 0x193   : > { %5481 = vst [vmem:[#allocation46_spill] sm:$0xff] %v4030_v26  ;;  %5482 = vst [vmem:[#allocation47_spill] sm:$0xff] %v4033_v30  ;;  %v1067_v35 = vrot.slane %v955_v41, 1  ;;  %v1312_v25 = vrot.slane %v1200_v55, 2  ;;  %v908_v4 = vadd.f32 %v876_v58, %v840_v29  ;;  %v1304_v1 = vrot.slane %v1195_v36, 2 }
 0x194   : > { %5483 = vst [vmem:[#allocation48_spill] sm:$0xff] %v4036_v52  ;;  %5484 = vst [vmem:[#allocation49_spill] sm:$0xff] %v4039_v24  ;;  %v4045_v18 = vadd.f32 %v1308_v37, %v1154_v34  ;;  %v1434_v2 = vmul.f32 %v3692_v40, %v4043_v9  ;;  %v538_v51 = vadd.f32 %v2993_v27, %v3671_v17 }
 0x195   : > { %v879_v41 = vmul.f32 %v3673_v19, %v4039_v24  ;;  %v954_v55 = vmul.f32 %v3646_v7, %v4039_v24  ;;  %v1153_v54 = vadd.f32 %v1061_v12, %v908_v4  ;;  %v1306_v59 = vsel %vm1273_vm2, %v1304_v1, %v1305_v61 }
 0x196   : > { %5485 = vst [vmem:[#allocation50_spill] sm:$0xff] %v4045_v18  ;;  %v1199_v37 = vmul.f32 %v3648_v8, %v4039_v24  ;;  %v533_v58 = vadd.f32 %v3671_v17, %v532_v20  ;;  %v4059_v36 = vmax.f32 %v538_v51, 0.0  ;;  %v878_v27 = vmul.f32 %v3673_v19, %v4043_v9 }
 0x197   : > { %v1065_v29 = vrot.slane %v954_v55, 1  ;;  %v953_v34 = vmul.f32 %v3646_v7, %v4043_v9  ;;  %v1398_v42 = vadd.f32 %v1306_v59, %v1153_v54  ;;  %v1198_v1 = vmul.f32 %v3648_v8, %v4043_v9 }
 0x198   : > { %5486 = vst [vmem:[#allocation51_spill] sm:$0xff] %v4059_v36  ;;  %v1310_v18 = vrot.slane %v1199_v37, 2  ;;  %v4065_v26 = vmax.f32 %v533_v58, 0.0  ;;  %v714_v12 = vrot.slane %v4059_v36, 7  ;;  %v843_v20 = vmul.f32 %v3678_v28, %v4059_v36 }
 0x199   : > { %v1068_v61 = vsel %vm1028_vm1, %v1065_v29, %v1067_v35  ;;  %v1064_v4 = vrot.slane %v953_v34, 1  ;;  %v4073_v51 = vadd.f32 %v1434_v2, %v1398_v42  ;;  %v1309_v30 = vrot.slane %v1198_v1, 2 }
 0x19a   : > { %5487 = vst [vmem:[#allocation52_spill] sm:$0xff] %v4065_v26  ;;  %v1313_v55 = vsel %vm1273_vm2, %v1310_v18, %v1312_v25  ;;  %v713_v59 = vrot.slane %v4065_v26, 7  ;;  %v842_v54 = vmul.f32 %v3678_v28, %v4065_v26  ;;  %v815_v37 = vsel %vm689_vm0, %v714_v12, 0.0 }
 0x19b   : > { %5488 = vst [vmem:[#allocation53_spill] sm:$0xff] %v4073_v51  ;;  %v911_v58 = vadd.f32 %v879_v41, %v843_v20  ;;  %v1066_v52 = vsel %vm1028_vm1, %v1064_v4, %v1065_v29  ;;  %v958_v36 = vmul.f32 %v3646_v7, %v815_v37  ;;  %v1203_v35 = vmul.f32 %v3648_v8, %v815_v37 }
 0x19c   : > { %v4084_v42 = vmul.f32 %v3684_v33, %v815_v37  ;;  %v4087_v25 = vmul.f32 %v3701_v47, %v815_v37  ;;  %v4090_v34 = vmul.f32 %v3703_v48, %v815_v37  ;;  %v4093_v26 = vsel %vm689_vm0, %v713_v59, %v714_v12 }
 0x19d   : > { %v1156_v2 = vadd.f32 %v1068_v61, %v911_v58  ;;  %v4096_v41 = vsel %vm689_vm0, 0.0, %v713_v59  ;;  %v1072_v29 = vrot.slane %v958_v36, 1  ;;  %v1317_v1 = vrot.slane %v1203_v35, 2  ;;  %v2996_v58 = vpop.f32.mrf.mxu0 }
 0x19e   : > { %5489 = vst [vmem:[#allocation54_spill] sm:$0xff] %v4084_v42  ;;  %5490 = vst [vmem:[#allocation55_spill] sm:$0xff] %v4090_v34  ;;  %v910_v24 = vadd.f32 %v878_v27, %v842_v54  ;;  %v1311_v61 = vsel %vm1273_vm2, %v1309_v30, %v1310_v18  ;;  %v1436_v37 = vmul.f32 %v3692_v40, %v4096_v41  ;;  %v1587_v59 = vrot.slane %v3738_v22, 2 }
 0x19f   : > { %v4100_v51 = vadd.f32 %v1313_v55, %v1156_v2  ;;  %v1454_v12 = vadd.f32 %v3727_v13, %v3735_v21  ;;  %v1734_v36 = vmul.f32 %v3705_v49, %v3784_v16  ;;  %v1802_v35 = vmul.f32 %v3701_v47, %v3784_v16 }
 0x1a0   : > { %v1155_v55 = vadd.f32 %v1066_v52, %v910_v24  ;;  %v1803_v27 = vmul.f32 %v3701_v47, %v3781_v11  ;;  %v2046_v18 = vmul.f32 %v3703_v48, %v3784_v16  ;;  %v2047_v30 = vmul.f32 %v3703_v48, %v3781_v11 }
 0x1a1   : > { %5491 = vst [vmem:[#allocation56_spill] sm:$0xff] %v4100_v51  ;;  %v5492_v13 = vrot.slane %v3733_v15, 2  ;;  %v1898_v22 = vrot.slane %v1802_v35, 1  ;;  %v548_v54 = vadd.f32 %v2996_v58, %v3671_v17  ;;  %v881_v2 = vmul.f32 %v3673_v19, %v4093_v26 }
 0x1a2   : > { %v1400_v52 = vadd.f32 %v1311_v61, %v1155_v55  ;;  %v1899_v20 = vrot.slane %v1803_v27, 1  ;;  %v2142_v4 = vrot.slane %v2046_v18, 2  ;;  %v2143_v42 = vrot.slane %v2047_v30, 2 }
 0x1a3   : > { %v1588_v21 = vsel %vm1273_vm2, %v5492_v13, %v1587_v59  ;;  %v4124_v51 = vmax.f32 %v548_v54, 0.0  ;;  %v957_v34 = vmul.f32 %v3646_v7, %v4093_v26  ;;  %v1202_v15 = vmul.f32 %v3648_v8, %v4093_v26 }
 0x1a4   : > { %v1698_v24 = vadd.f32 %v1588_v21, %v1454_v12  ;;  %v4130_v13 = vadd.f32 %v1436_v37, %v1400_v52  ;;  %v1900_v58 = vsel %vm1028_vm1, %v1898_v22, %v1899_v20  ;;  %v1455_v61 = vadd.f32 %v3730_v14, %v3722_v3 }
 0x1a5   : > { %5493 = vst [vmem:[#allocation57_spill] sm:$0xff] %v4124_v51  ;;  %v2144_v12 = vsel %vm1273_vm2, %v2142_v4, %v2143_v42  ;;  %v717_v55 = vrot.slane %v4124_v51, 7  ;;  %v845_v27 = vmul.f32 %v3678_v28, %v4124_v51  ;;  %v1070_v18 = vrot.slane %v957_v34, 1 }
 0x1a6   : > { %v1766_v35 = vadd.f32 %v1734_v36, %v1698_v24  ;;  %v1315_v21 = vrot.slane %v1202_v15, 2  ;;  %v5494_v54 = vrot.slane %v3714_v56, 2  ;;  %v1735_v36 = vmul.f32 %v3705_v49, %v3781_v11 }
 0x1a7   : > { %v816_v22 = vsel %vm689_vm0, %v717_v55, 0.0  ;;  %v913_v3 = vadd.f32 %v881_v2, %v845_v27  ;;  %v1073_v14 = vsel %vm1028_vm1, %v1070_v18, %v1072_v29 }
 0x1a8   : > { %v2010_v30 = vadd.f32 %v1900_v58, %v1766_v35  ;;  %v1590_v37 = vsel %vm1273_vm2, %v1587_v59, %v5494_v54  ;;  %v4147_v24 = vmul.f32 %v3646_v7, %v816_v22  ;;  %v4150_v34 = vmul.f32 %v3648_v8, %v816_v22  ;;  %v4156_v59 = vld [vmem:[%s5365_s4] ss:$0 sm:$0xff]  ;;  %v542_v58 = vpop.f32.mrf.mxu0 }
 0x1a9   : > { %v1699_v4 = vadd.f32 %v1590_v37, %v1455_v61  ;;  %v1318_v56 = vsel %vm1273_vm2, %v1315_v21, %v1317_v1  ;;  %v1158_v15 = vadd.f32 %v1073_v14, %v913_v3  ;;  %v4159_v2 = vmul.f32 %v3684_v33, %v816_v22 }
 0x1aa   : > { %v2254_v52 = vadd.f32 %v2144_v12, %v2010_v30  ;;  %v4162_v29 = vmul.f32 %v3701_v47, %v816_v22  ;;  %v4165_v35 = vmul.f32 %v3703_v48, %v816_v22  ;;  %v1077_v1 = vrot.slane %v4147_v24, 1 }
 0x1ab   : > { %v1767_v27 = vadd.f32 %v1735_v36, %v1699_v4  ;;  %v4170_v30 = vadd.f32 %v1318_v56, %v1158_v15  ;;  %v5496_v3 = vrot.slane %v3758_v45, 1  ;;  %v880_v12 = vmul.f32 %v3673_v19, %v4096_v41 }
 0x1ac   : > { %5495 = vst [vmem:[#allocation58_spill] sm:$0xff] %v4165_v35  ;;  %v2293_v61 = vadd.f32 %v4156_v59, %v2254_v52  ;;  %v2145_v35 = vrot.slane %v3761_v46, 2  ;;  %v543_v52 = vadd.f32 %v3671_v17, %v542_v58  ;;  %v956_v36 = vmul.f32 %v3646_v7, %v4096_v41 }
 0x1ad   : > { %v1902_v14 = vsel %vm1028_vm1, %v1899_v20, %v5496_v3  ;;  %v1201_v4 = vmul.f32 %v3648_v8, %v4096_v41  ;;  %v1493_v45 = vmul.f32 %v3684_v33, %v3784_v16  ;;  %v1494_v46 = vmul.f32 %v3684_v33, %v3781_v11 }
 0x1ae   : > { %v2325_v22 = vmax.f32 %v2293_v61, 0.0  ;;  %v2011_v51 = vadd.f32 %v1902_v14, %v1767_v27  ;;  %v2146_v56 = vsel %vm1273_vm2, %v2143_v42, %v2145_v35  ;;  %v4189_v15 = vmax.f32 %v543_v52, 0.0 }
 0x1af   : > { %v1069_v61 = vrot.slane %v956_v36, 1  ;;  %v1314_v27 = vrot.slane %v1201_v4, 2  ;;  %v1591_v3 = vrot.slane %v1493_v45, 2  ;;  %v1592_v16 = vrot.slane %v1494_v46, 2 }
 0x1b0   : > { %v2357_v20 = vadd.f32 %v2325_v22, %v3697_v44  ;;  %5497 = vst [vmem:[#allocation59_spill] sm:$0xff] %v4189_v15  ;;  %v2255_v58 = vadd.f32 %v2146_v56, %v2011_v51  ;;  %v716_v14 = vrot.slane %v4189_v15, 7  ;;  %v844_v54 = vmul.f32 %v3678_v28, %v4189_v15 }
 0x1b1   : > { %v1736_v44 = vmul.f32 %v3705_v49, %v3834_v62  ;;  %v1071_v35 = vsel %vm1028_vm1, %v1069_v61, %v1070_v18  ;;  %v1316_v22 = vsel %vm1273_vm2, %v1314_v27, %v1315_v21  ;;  %v1805_v51 = vmul.f32 %v3701_v47, %v3834_v62 }
 0x1b2   : > { %3050 = vmatprep.mubr.f32.mxu1 %v2357_v20  ;;  %v2294_v42 = vadd.f32 %v4156_v59, %v2255_v58  ;;  %v4204_v52 = vsel %vm689_vm0, %v716_v14, %v717_v55  ;;  %v4207_v36 = vsel %vm689_vm0, 0.0, %v716_v14  ;;  %v912_v4 = vadd.f32 %v880_v12, %v844_v54  ;;  %v2999_v20 = vpop.f32.mrf.mxu0 }
 0x1b3   : > { %v1593_v45 = vsel %vm1273_vm2, %v1591_v3, %v1592_v16  ;;  %v1438_v46 = vmul.f32 %v3692_v40, %v4207_v36  ;;  %v1806_v21 = vmul.f32 %v3701_v47, %v3831_v60  ;;  %v1903_v61 = vrot.slane %v1805_v51, 1 }
 0x1b4   : > { %v2326_v56 = vmax.f32 %v2294_v42, 0.0  ;;  %v1700_v18 = vadd.f32 %v1593_v45, %v3809_v63  ;;  %v1157_v58 = vadd.f32 %v1071_v35, %v912_v4  ;;  %v2049_v55 = vmul.f32 %v3703_v48, %v3834_v62 }
 0x1b5   : > { %v2050_v12 = vmul.f32 %v3703_v48, %v3831_v60  ;;  %v1904_v3 = vrot.slane %v1806_v21, 1  ;;  %v558_v14 = vadd.f32 %v2999_v20, %v3671_v17  ;;  %v883_v45 = vmul.f32 %v3673_v19, %v4204_v52 }
 0x1b6   : > { %v2358_v54 = vadd.f32 %v2326_v56, %v3682_v32  ;;  %v1768_v27 = vadd.f32 %v1736_v44, %v1700_v18  ;;  %v1402_v42 = vadd.f32 %v1316_v22, %v1157_v58  ;;  %v2147_v37 = vrot.slane %v2049_v55, 2 }
 0x1b7   : > { %v2148_v63 = vrot.slane %v2050_v12, 2  ;;  %v1905_v35 = vsel %vm1028_vm1, %v1903_v61, %v1904_v3  ;;  %v4224_v51 = vmax.f32 %v558_v14, 0.0  ;;  %v960_v4 = vmul.f32 %v3646_v7, %v4204_v52 }
 0x1b8   : > { %3051 = vmatmul.mubr.f32.vlgmr.msra.gmra.mxu1 %v2358_v54  ;;  %v1205_v32 = vmul.f32 %v3648_v8, %v4204_v52  ;;  %v4230_v44 = vadd.f32 %v1438_v46, %v1402_v42  ;;  %v2012_v20 = vadd.f32 %v1905_v35, %v1768_v27  ;;  %v1425_v56 = vmul.f32 %v3692_v40, %v3781_v11 }
 0x1b9   : > { %5498 = vst [vmem:[#allocation60_spill] sm:$0xff] %v4224_v51  ;;  %v2149_v22 = vsel %vm1273_vm2, %v2147_v37, %v2148_v63  ;;  %v720_v18 = vrot.slane %v4224_v51, 7  ;;  %v847_v21 = vmul.f32 %v3678_v28, %v4224_v51  ;;  %v1075_v58 = vrot.slane %v960_v4, 1 }
 0x1ba   : > { %v1320_v61 = vrot.slane %v1205_v32, 2  ;;  %v2256_v55 = vadd.f32 %v2149_v22, %v2012_v20  ;;  %v1457_v12 = vadd.f32 %v1425_v56, %v3778_v5  ;;  %v5499_v54 = vrot.slane %v3755_v43, 2  ;;  %v552_v32 = vpop.f32.mrf.mxu0 }
 0x1bb   : > { %v1737_v37 = vmul.f32 %v3705_v49, %v3831_v60  ;;  %v817_v27 = vsel %vm689_vm0, %v720_v18, 0.0  ;;  %v915_v11 = vadd.f32 %v883_v45, %v847_v21  ;;  %v1078_v14 = vsel %vm1028_vm1, %v1075_v58, %v1077_v1  ;;  %v5505_v21 = vld [vmem:[#allocation18_spill] sm:$0xff] }
 0x1bc   : > { %v1595_v46 = vsel %vm1273_vm2, %v1592_v16, %v5499_v54  ;;  %v5500_v42 = vrot.slane %v4150_v34, 2  ;;  %v2295_v5 = vadd.f32 %v4156_v59, %v2256_v55  ;;  %v4253_v43 = vmul.f32 %v3646_v7, %v817_v27 }
 0x1bd   : > { %v4256_v16 = vmul.f32 %v3648_v8, %v817_v27  ;;  %v4259_v4 = vmul.f32 %v3684_v33, %v817_v27  ;;  %v1160_v45 = vadd.f32 %v1078_v14, %v915_v11  ;;  %v4262_v24 = vmul.f32 %v3701_v47, %v817_v27 }
 0x1be   : > { %v1323_v35 = vsel %vm1273_vm2, %v1320_v61, %v5500_v42  ;;  %v4265_v1 = vmul.f32 %v3703_v48, %v817_v27  ;;  %v1701_v34 = vadd.f32 %v1595_v46, %v1457_v12  ;;  %v2327_v20 = vmax.f32 %v2295_v5, 0.0 }
 0x1bf   : > { %5501 = vst [vmem:[#allocation61_spill] sm:$0xff] %v4259_v4  ;;  %v4270_v55 = vadd.f32 %v1323_v35, %v1160_v45  ;;  %v5503_v14 = vrot.slane %v3801_v38, 1  ;;  %v2150_v12 = vrot.slane %v3807_v0, 2  ;;  %v553_v46 = vadd.f32 %v3671_v17, %v552_v32 }
 0x1c0   : > { %v1769_v11 = vadd.f32 %v1737_v37, %v1701_v34  ;;  %v2359_v27 = vadd.f32 %v2327_v20, %v3763_v50  ;;  %v882_v5 = vmul.f32 %v3673_v19, %v4207_v36  ;;  %v959_v35 = vmul.f32 %v3646_v7, %v4207_v36 }
 0x1c1   : > { %5502 = vst [vmem:[#allocation62_spill] sm:$0xff] %v4270_v55  ;;  %v1907_v42 = vsel %vm1028_vm1, %v1904_v3, %v5503_v14  ;;  %v1204_v37 = vmul.f32 %v3648_v8, %v4207_v36  ;;  %v1496_v38 = vmul.f32 %v3684_v33, %v3834_v62  ;;  %v2151_v50 = vsel %vm1273_vm2, %v2148_v63, %v2150_v12 }
 0x1c2   : > { %v2013_v56 = vadd.f32 %v1907_v42, %v1769_v11  ;;  %3053 = vmatprep.mubr.f32.mxu1 %v2359_v27  ;;  %v4288_v3 = vmax.f32 %v553_v46, 0.0  ;;  %v1497_v17 = vmul.f32 %v3684_v33, %v3831_v60  ;;  %v1738_v0 = vmul.f32 %v3705_v49, %v3876_v31 }
 0x1c3   : > { %v1074_v34 = vrot.slane %v959_v35, 1  ;;  %v1319_v32 = vrot.slane %v1204_v37, 2  ;;  %v1596_v20 = vrot.slane %v1496_v38, 2  ;;  %v1808_v63 = vmul.f32 %v3701_v47, %v3876_v31 }
 0x1c4   : > { %5504 = vst [vmem:[#allocation63_spill] sm:$0xff] %v4288_v3  ;;  %v2257_v45 = vadd.f32 %v2151_v50, %v2013_v56  ;;  %v719_v11 = vrot.slane %v4288_v3, 7  ;;  %v846_v62 = vmul.f32 %v3678_v28, %v4288_v3  ;;  %v1597_v14 = vrot.slane %v1497_v17, 2  ;;  %v3002_v50 = vpop.f32.mrf.mxu0 }
 0x1c5   : > { %v1076_v27 = vsel %vm1028_vm1, %v1074_v34, %v1075_v58  ;;  %v1321_v12 = vsel %vm1273_vm2, %v1319_v32, %v1320_v61  ;;  %v1809_v56 = vmul.f32 %v3701_v47, %v3873_v10  ;;  %v1908_v61 = vrot.slane %v1808_v63, 1 }
 0x1c6   : > { %v2296_v42 = vadd.f32 %v4156_v59, %v2257_v45  ;;  %v4305_v46 = vsel %vm689_vm0, %v719_v11, %v720_v18  ;;  %v4308_v35 = vsel %vm689_vm0, 0.0, %v719_v11  ;;  %v914_v37 = vadd.f32 %v882_v5, %v846_v62 }
 0x1c7   : > { %v1598_v38 = vsel %vm1273_vm2, %v1596_v20, %v1597_v14  ;;  %v1440_v45 = vmul.f32 %v3692_v40, %v4308_v35  ;;  %v1909_v32 = vrot.slane %v1809_v56, 1  ;;  %v2052_v18 = vmul.f32 %v3703_v48, %v3876_v31  ;;  %v4322_v20 = vld [vmem:[%s5363_s2] ss:$0 sm:$0xff] }
 0x1c8   : > { %v2328_v17 = vmax.f32 %v2296_v42, 0.0  ;;  %v1702_v58 = vadd.f32 %v1598_v38, %v3863_v23  ;;  %v1159_v34 = vadd.f32 %v1076_v27, %v914_v37  ;;  %v2053_v11 = vmul.f32 %v3703_v48, %v3873_v10 }
 0x1c9   : > { %v568_v42 = vadd.f32 %v4322_v20, %v3002_v50  ;;  %v885_v23 = vmul.f32 %v3673_v19, %v4305_v46  ;;  %v1910_v27 = vsel %vm1028_vm1, %v1908_v61, %v1909_v32  ;;  %v2152_v56 = vrot.slane %v2052_v18, 2 }
 0x1ca   : > { %v2360_v5 = vadd.f32 %v2328_v17, %v5505_v21  ;;  %v1770_v62 = vadd.f32 %v1738_v0, %v1702_v58  ;;  %v1404_v63 = vadd.f32 %v1321_v12, %v1159_v34  ;;  %v2153_v37 = vrot.slane %v2053_v11, 2  ;;  %v5508_v58 = vld [vmem:[#allocation20_spill] sm:$0xff] }
 0x1cb   : > { %v4328_v54 = vmax.f32 %v568_v42, 0.0  ;;  %v963_v21 = vmul.f32 %v3646_v7, %v4305_v46  ;;  %v1208_v0 = vmul.f32 %v3648_v8, %v4305_v46  ;;  %v1427_v12 = vmul.f32 %v3692_v40, %v3831_v60 }
 0x1cc   : > { %3054 = vmatmul.mubr.f32.gmra.mxu1 %v2360_v5  ;;  %v2014_v38 = vadd.f32 %v1910_v27, %v1770_v62  ;;  %v4334_v17 = vadd.f32 %v1440_v45, %v1404_v63  ;;  %v2154_v50 = vsel %vm1273_vm2, %v2152_v56, %v2153_v37  ;;  %v5509_v61 = vrot.slane %v5508_v58, 2  ;;  %v5510_v27 = vld [vmem:[#allocation22_spill] sm:$0xff] }
 0x1cd   : > { %5506 = vst [vmem:[#allocation18_spill] sm:$0xff] %v4328_v54  ;;  %v723_v11 = vrot.slane %v4328_v54, 7  ;;  %v849_v5 = vmul.f32 %v3678_v28, %v4328_v54  ;;  %v1080_v62 = vrot.slane %v963_v21, 1  ;;  %v1325_v42 = vrot.slane %v1208_v0, 2  ;;  %v5511_v56 = vld [vmem:[#allocation26_spill] sm:$0xff] }
 0x1ce   : > { %5507 = vst [vmem:[#allocation64_spill] sm:$0xff] %v4334_v17  ;;  %v1600_v34 = vsel %vm1273_vm2, %v1597_v14, %v5509_v61  ;;  %v2258_v18 = vadd.f32 %v2154_v50, %v2014_v38  ;;  %v1459_v45 = vadd.f32 %v1427_v12, %v5510_v27  ;;  %v1739_v63 = vmul.f32 %v3705_v49, %v3873_v10  ;;  %v5539_v17 = vld [vmem:[#allocation33_spill] sm:$0xff] }
 0x1cf   : > { %v5512_v22 = vrot.slane %v5511_v56, 1  ;;  %v818_v14 = vsel %vm689_vm0, %v723_v11, 0.0  ;;  %v917_v38 = vadd.f32 %v885_v23, %v849_v5  ;;  %v5513_v50 = vrot.slane %v4253_v43, 1  ;;  %v562_v5 = vpop.f32.mrf.mxu0 }
 0x1d0   : > { %v2297_v58 = vadd.f32 %v4156_v59, %v2258_v18  ;;  %v4357_v21 = vmul.f32 %v3646_v7, %v818_v14  ;;  %v4360_v0 = vmul.f32 %v3648_v8, %v818_v14  ;;  %v5514_v12 = vrot.slane %v4256_v16, 2 }
 0x1d1   : > { %v1912_v60 = vsel %vm1028_vm1, %v1909_v32, %v5512_v22  ;;  %v1083_v61 = vsel %vm1028_vm1, %v1080_v62, %v5513_v50  ;;  %v4366_v22 = vmul.f32 %v3684_v33, %v818_v14  ;;  %v4369_v23 = vmul.f32 %v3701_v47, %v818_v14 }
 0x1d2   : > { %v1328_v27 = vsel %vm1273_vm2, %v1325_v42, %v5514_v12  ;;  %v2329_v32 = vmax.f32 %v2297_v58, 0.0  ;;  %v1162_v18 = vadd.f32 %v1083_v61, %v917_v38  ;;  %v4372_v43 = vmul.f32 %v3703_v48, %v818_v14  ;;  %v5518_v12 = vld [vmem:[#allocation21_spill] sm:$0xff]  ;;  %v5520_v38 = vld [vmem:[#allocation27_spill] sm:$0xff] }
 0x1d3   : > { %5515 = vst [vmem:[#allocation20_spill] sm:$0xff] %v4366_v22  ;;  %5516 = vst [vmem:[#allocation22_spill] sm:$0xff] %v4369_v23  ;;  %v1703_v54 = vadd.f32 %v1600_v34, %v1459_v45  ;;  %v2155_v61 = vrot.slane %v5520_v38, 2  ;;  %v563_v14 = vadd.f32 %v4322_v20, %v562_v5  ;;  %v962_v50 = vmul.f32 %v3646_v7, %v4308_v35  ;;  %v5522_v5 = vld [vmem:[#allocation37_spill] sm:$0xff]  ;;  %v5526_v23 = vld [vmem:[#allocation19_spill] sm:$0xff] }
 0x1d4   : > { %5517 = vst [vmem:[#allocation26_spill] sm:$0xff] %v4372_v43  ;;  %v2361_v51 = vadd.f32 %v2329_v32, %v5518_v12  ;;  %v4378_v3 = vadd.f32 %v1328_v27, %v1162_v18  ;;  %v884_v43 = vmul.f32 %v3673_v19, %v4308_v35  ;;  %v1207_v45 = vmul.f32 %v3648_v8, %v4308_v35 }
 0x1d5   : > { %v1771_v15 = vadd.f32 %v1739_v63, %v1703_v54  ;;  %v2156_v34 = vsel %vm1273_vm2, %v2153_v37, %v2155_v61  ;;  %v1499_v27 = vmul.f32 %v3684_v33, %v3876_v31  ;;  %v1500_v54 = vmul.f32 %v3684_v33, %v3873_v10 }
 0x1d6   : > { %5519 = vst [vmem:[#allocation21_spill] sm:$0xff] %v4378_v3  ;;  %3056 = vmatprep.mubr.f32.mxu1 %v2361_v51  ;;  %v4394_v32 = vmax.f32 %v563_v14, 0.0  ;;  %v1079_v18 = vrot.slane %v962_v50, 1  ;;  %v1740_v12 = vmul.f32 %v3705_v49, %v5522_v5  ;;  %v1324_v38 = vrot.slane %v1207_v45, 2  ;;  %v5523_v14 = vld [vmem:[#allocation36_spill] sm:$0xff] }
 0x1d7   : > { %v2015_v63 = vadd.f32 %v1912_v60, %v1771_v15  ;;  %v1601_v51 = vrot.slane %v1499_v27, 2  ;;  %v1602_v16 = vrot.slane %v1500_v54, 2  ;;  %v1811_v37 = vmul.f32 %v3701_v47, %v5522_v5  ;;  %v3005_v54 = vpop.f32.mrf.mxu0 }
 0x1d8   : > { %5521 = vst [vmem:[#allocation27_spill] sm:$0xff] %v4394_v32  ;;  %v722_v58 = vrot.slane %v4394_v32, 7  ;;  %v848_v31 = vmul.f32 %v3678_v28, %v4394_v32  ;;  %v1081_v15 = vsel %vm1028_vm1, %v1079_v18, %v1080_v62  ;;  %v1326_v60 = vsel %vm1273_vm2, %v1324_v38, %v1325_v42  ;;  %v5525_v42 = vld [vmem:[#allocation34_spill] sm:$0xff] }
 0x1d9   : > { %v2259_v61 = vadd.f32 %v2156_v34, %v2015_v63  ;;  %v1603_v50 = vsel %vm1273_vm2, %v1601_v51, %v1602_v16  ;;  %v1812_v45 = vmul.f32 %v3701_v47, %v5523_v14  ;;  %v1913_v27 = vrot.slane %v1811_v37, 1 }
 0x1da   : > { %v4410_v34 = vsel %vm689_vm0, %v722_v58, %v723_v11  ;;  %v4413_v63 = vsel %vm689_vm0, 0.0, %v722_v58  ;;  %v916_v32 = vadd.f32 %v884_v43, %v848_v31  ;;  %v1704_v18 = vadd.f32 %v1603_v50, %v5525_v42 }
 0x1db   : > { %v2298_v56 = vadd.f32 %v4156_v59, %v2259_v61  ;;  %5524 = vst [vmem:[#allocation37_spill] sm:$0xff] %v4410_v34  ;;  %v1442_v62 = vmul.f32 %v3692_v40, %v4413_v63  ;;  %v1914_v38 = vrot.slane %v1812_v45, 1  ;;  %v2055_v51 = vmul.f32 %v3703_v48, %v5522_v5 }
 0x1dc   : > { %v1161_v3 = vadd.f32 %v1081_v15, %v916_v32  ;;  %v2056_v61 = vmul.f32 %v3703_v48, %v5523_v14  ;;  %v578_v11 = vadd.f32 %v4322_v20, %v3005_v54  ;;  %v1772_v22 = vadd.f32 %v1740_v12, %v1704_v18 }
 0x1dd   : > { %v2330_v37 = vmax.f32 %v2298_v56, 0.0  ;;  %v1915_v58 = vsel %vm1028_vm1, %v1913_v27, %v1914_v38  ;;  %v2157_v43 = vrot.slane %v2055_v51, 2  ;;  %v887_v31 = vmul.f32 %v3673_v19, %v4410_v34  ;;  %v5529_v51 = vld [vmem:[#allocation28_spill] sm:$0xff] }
 0x1de   : > { %v1406_v45 = vadd.f32 %v1326_v60, %v1161_v3  ;;  %v2158_v42 = vrot.slane %v2056_v61, 2  ;;  %v4427_v4 = vmax.f32 %v578_v11, 0.0  ;;  %v2016_v56 = vadd.f32 %v1915_v58, %v1772_v22  ;;  %v5530_v58 = vld [vmem:[#allocation25_spill] sm:$0xff] }
 0x1df   : > { %v2362_v50 = vadd.f32 %v2330_v37, %v5526_v23  ;;  %v966_v32 = vmul.f32 %v3646_v7, %v4410_v34  ;;  %v1211_v15 = vmul.f32 %v3648_v8, %v4410_v34  ;;  %v1429_v12 = vmul.f32 %v3692_v40, %v3873_v10 }
 0x1e0   : > { %5527 = vst [vmem:[#allocation36_spill] sm:$0xff] %v4427_v4  ;;  %v4435_v27 = vadd.f32 %v1442_v62, %v1406_v45  ;;  %v2159_v54 = vsel %vm1273_vm2, %v2157_v43, %v2158_v42  ;;  %v726_v3 = vrot.slane %v4427_v4, 7  ;;  %v851_v23 = vmul.f32 %v3678_v28, %v4427_v4 }
 0x1e1   : > { %3057 = vmatmul.mubr.f32.gmra.mxu1 %v2362_v50  ;;  %v2260_v22 = vadd.f32 %v2159_v54, %v2016_v56  ;;  %v1085_v60 = vrot.slane %v966_v32, 1  ;;  %v1330_v18 = vrot.slane %v1211_v15, 2  ;;  %v1461_v37 = vadd.f32 %v1429_v12, %v5529_v51 }
 0x1e2   : > { %5528 = vst [vmem:[#allocation34_spill] sm:$0xff] %v4435_v27  ;;  %v819_v61 = vsel %vm689_vm0, %v726_v3, 0.0  ;;  %v919_v11 = vadd.f32 %v887_v31, %v851_v23  ;;  %v5531_v10 = vrot.slane %v5530_v58, 2  ;;  %v1741_v43 = vmul.f32 %v3705_v49, %v5523_v14  ;;  %v5537_v27 = vld [vmem:[#allocation32_spill] sm:$0xff] }
 0x1e3   : > { %v2299_v50 = vadd.f32 %v4156_v59, %v2260_v22  ;;  %v4450_v45 = vmul.f32 %v3646_v7, %v819_v61  ;;  %v5532_v56 = vrot.slane %v4357_v21, 1  ;;  %v4456_v15 = vmul.f32 %v3648_v8, %v819_v61  ;;  %v572_v22 = vpop.f32.mrf.mxu0 }
 0x1e4   : > { %v1605_v62 = vsel %vm1273_vm2, %v1602_v16, %v5531_v10  ;;  %v5533_v12 = vrot.slane %v4360_v0, 2  ;;  %v4462_v54 = vmul.f32 %v3684_v33, %v819_v61  ;;  %v4465_v23 = vmul.f32 %v3701_v47, %v819_v61 }
 0x1e5   : > { %v1088_v32 = vsel %vm1028_vm1, %v1085_v60, %v5532_v56  ;;  %v2331_v51 = vmax.f32 %v2299_v50, 0.0  ;;  %v4470_v10 = vmul.f32 %v3703_v48, %v819_v61  ;;  %v5538_v55 = vrot.slane %v5537_v27, 1  ;;  %v3008_v0 = vpop.f32.mrf.mxu0 }
 0x1e6   : > { %v1164_v31 = vadd.f32 %v1088_v32, %v919_v11  ;;  %v1333_v16 = vsel %vm1273_vm2, %v1330_v18, %v5533_v12  ;;  %5534 = vst [vmem:[#allocation19_spill] sm:$0xff] %v4462_v54  ;;  %v1705_v32 = vadd.f32 %v1605_v62, %v1461_v37  ;;  %v5536_v12 = vld [vmem:[#allocation24_spill] sm:$0xff]  ;;  %v2160_v21 = vrot.slane %v5539_v17, 2  ;;  %v5554_v54 = vld [vmem:[#allocation30_spill] sm:$0xff] }
 0x1e7   : > { %v2363_v4 = vadd.f32 %v2331_v51, %v5536_v12  ;;  %v1917_v50 = vsel %vm1028_vm1, %v1914_v38, %v5538_v55  ;;  %v573_v58 = vadd.f32 %v4322_v20, %v572_v22  ;;  %v886_v61 = vmul.f32 %v3673_v19, %v4413_v63 }
 0x1e8   : > { %v4472_v11 = vadd.f32 %v1333_v16, %v1164_v31  ;;  %v1773_v34 = vadd.f32 %v1741_v43, %v1705_v32  ;;  %v965_v31 = vmul.f32 %v3646_v7, %v4413_v63  ;;  %v1210_v37 = vmul.f32 %v3648_v8, %v4413_v63 }
 0x1e9   : > { %3059 = vmatprep.mubr.f32.mxu1 %v2363_v4  ;;  %v2161_v62 = vsel %vm1273_vm2, %v2158_v42, %v2160_v21  ;;  %v4489_v27 = vmax.f32 %v573_v58, 0.0  ;;  %v1502_v55 = vmul.f32 %v3684_v33, %v5522_v5  ;;  %v1503_v17 = vmul.f32 %v3684_v33, %v5523_v14 }
 0x1ea   : > { %5535 = vst [vmem:[#allocation28_spill] sm:$0xff] %v4472_v11  ;;  %v2017_v38 = vadd.f32 %v1917_v50, %v1773_v34  ;;  %v1084_v43 = vrot.slane %v965_v31, 1  ;;  %v1329_v16 = vrot.slane %v1210_v37, 2  ;;  %v1742_v22 = vmul.f32 %v3705_v49, %v3989_v57  ;;  %v5555_v11 = vld [vmem:[#allocation41_spill] sm:$0xff] }
 0x1eb   : > { %5540 = vst [vmem:[#allocation25_spill] sm:$0xff] %v4489_v27  ;;  %v725_v51 = vrot.slane %v4489_v27, 7  ;;  %v850_v4 = vmul.f32 %v3678_v28, %v4489_v27  ;;  %v1606_v42 = vrot.slane %v1502_v55, 2  ;;  %v1607_v21 = vrot.slane %v1503_v17, 2 }
 0x1ec   : > { %v2261_v58 = vadd.f32 %v2161_v62, %v2017_v38  ;;  %v1086_v32 = vsel %vm1028_vm1, %v1084_v43, %v1085_v60  ;;  %v1331_v5 = vsel %vm1273_vm2, %v1329_v16, %v1330_v18  ;;  %v1814_v34 = vmul.f32 %v3701_v47, %v3989_v57 }
 0x1ed   : > { %v4505_v12 = vsel %vm689_vm0, %v725_v51, %v726_v3  ;;  %v4508_v50 = vsel %vm689_vm0, 0.0, %v725_v51  ;;  %v918_v31 = vadd.f32 %v886_v61, %v850_v4  ;;  %v1608_v37 = vsel %vm1273_vm2, %v1606_v42, %v1607_v21 }
 0x1ee   : > { %v2300_v55 = vadd.f32 %v4156_v59, %v2261_v58  ;;  %v1444_v60 = vmul.f32 %v3692_v40, %v4508_v50  ;;  %v1706_v18 = vadd.f32 %v1608_v37, %v3976_v6  ;;  %v1815_v62 = vmul.f32 %v3701_v47, %v3982_v39  ;;  %v5541_v37 = vld [vmem:[#allocation23_spill] sm:$0xff] }
 0x1ef   : > { %v1163_v17 = vadd.f32 %v1086_v32, %v918_v31  ;;  %v1918_v3 = vrot.slane %v1814_v34, 1  ;;  %v2058_v38 = vmul.f32 %v3703_v48, %v3989_v57  ;;  %v2059_v61 = vmul.f32 %v3703_v48, %v3982_v39 }
 0x1f0   : > { %v2332_v43 = vmax.f32 %v2300_v55, 0.0  ;;  %v1774_v16 = vadd.f32 %v1742_v22, %v1706_v18  ;;  %v1919_v51 = vrot.slane %v1815_v62, 1  ;;  %v588_v4 = vadd.f32 %v4322_v20, %v3008_v0 }
 0x1f1   : > { %v1408_v42 = vadd.f32 %v1331_v5, %v1163_v17  ;;  %v2162_v58 = vrot.slane %v2058_v38, 2  ;;  %v2163_v56 = vrot.slane %v2059_v61, 2  ;;  %v889_v6 = vmul.f32 %v3673_v19, %v4505_v12 }
 0x1f2   : > { %v2364_v32 = vadd.f32 %v2332_v43, %v5541_v37  ;;  %v1920_v34 = vsel %vm1028_vm1, %v1918_v3, %v1919_v51  ;;  %v4526_v31 = vmax.f32 %v588_v4, 0.0  ;;  %v969_v27 = vmul.f32 %v3646_v7, %v4505_v12 }
 0x1f3   : > { %v4530_v55 = vadd.f32 %v1444_v60, %v1408_v42  ;;  %v2018_v22 = vadd.f32 %v1920_v34, %v1774_v16  ;;  %v2164_v0 = vsel %vm1273_vm2, %v2162_v58, %v2163_v56  ;;  %v1214_v5 = vmul.f32 %v3648_v8, %v4505_v12  ;;  %v5544_v60 = vld [vmem:[#allocation31_spill] sm:$0xff] }
 0x1f4   : > { %5542 = vst [vmem:[#allocation24_spill] sm:$0xff] %v4526_v31  ;;  %3060 = vmatmul.mubr.f32.gmra.mxu1 %v2364_v32  ;;  %v729_v18 = vrot.slane %v4526_v31, 7  ;;  %v853_v62 = vmul.f32 %v3678_v28, %v4526_v31  ;;  %v1090_v17 = vrot.slane %v969_v27, 1  ;;  %v1431_v3 = vmul.f32 %v3692_v40, %v5523_v14  ;;  %v5547_v27 = vld [vmem:[#allocation35_spill] sm:$0xff] }
 0x1f5   : > { %5543 = vst [vmem:[#allocation32_spill] sm:$0xff] %v4530_v55  ;;  %v2262_v38 = vadd.f32 %v2164_v0, %v2018_v22  ;;  %v1335_v61 = vrot.slane %v1214_v5, 2  ;;  %v5545_v43 = vrot.slane %v5544_v60, 2  ;;  %v1743_v4 = vmul.f32 %v3705_v49, %v3982_v39 }
 0x1f6   : > { %v820_v42 = vsel %vm689_vm0, %v729_v18, 0.0  ;;  %v921_v58 = vadd.f32 %v889_v6, %v853_v62  ;;  %v5546_v37 = vrot.slane %v4450_v45, 1  ;;  %v1463_v34 = vadd.f32 %v1431_v3, %v5547_v27  ;;  %v582_v3 = vpop.f32.mrf.mxu0 }
 0x1f7   : > { %v1610_v16 = vsel %vm1273_vm2, %v1607_v21, %v5545_v43  ;;  %v2301_v14 = vadd.f32 %v4156_v59, %v2262_v38  ;;  %v4552_v22 = vmul.f32 %v3646_v7, %v820_v42  ;;  %v4555_v0 = vmul.f32 %v3648_v8, %v820_v42 }
 0x1f8   : > { %v1093_v32 = vsel %vm1028_vm1, %v1090_v17, %v5546_v37  ;;  %v5548_v21 = vrot.slane %v4456_v15, 2  ;;  %v4561_v6 = vmul.f32 %v3684_v33, %v820_v42  ;;  %v4564_v45 = vmul.f32 %v3701_v47, %v820_v42  ;;  %v5558_v37 = vld [vmem:[#allocation45_spill] sm:$0xff] }
 0x1f9   : > { %v1166_v60 = vadd.f32 %v1093_v32, %v921_v58  ;;  %v4567_v62 = vmul.f32 %v3703_v48, %v820_v42  ;;  %v2333_v38 = vmax.f32 %v2301_v14, 0.0  ;;  %v1707_v27 = vadd.f32 %v1610_v16, %v1463_v34 }
 0x1fa   : > { %v1338_v5 = vsel %vm1273_vm2, %v1335_v61, %v5548_v21  ;;  %5549 = vst [vmem:[#allocation33_spill] sm:$0xff] %v4561_v6  ;;  %5550 = vst [vmem:[#allocation23_spill] sm:$0xff] %v4564_v45  ;;  %v5553_v21 = vrot.slane %v3974_v53, 1  ;;  %v2165_v14 = vrot.slane %v5555_v11, 2  ;;  %v583_v43 = vadd.f32 %v4322_v20, %v582_v3 }
 0x1fb   : > { %5551 = vst [vmem:[#allocation31_spill] sm:$0xff] %v4567_v62  ;;  %v4571_v15 = vadd.f32 %v1338_v5, %v1166_v60  ;;  %v2365_v42 = vadd.f32 %v2333_v38, %v5554_v54  ;;  %v1775_v62 = vadd.f32 %v1743_v4, %v1707_v27  ;;  %v888_v16 = vmul.f32 %v3673_v19, %v4508_v50 }
 0x1fc   : > { %v1922_v31 = vsel %vm1028_vm1, %v1919_v51, %v5553_v21  ;;  %v968_v34 = vmul.f32 %v3646_v7, %v4508_v50  ;;  %v1213_v5 = vmul.f32 %v3648_v8, %v4508_v50  ;;  %v1505_v53 = vmul.f32 %v3684_v33, %v3989_v57 }
 0x1fd   : > { %5552 = vst [vmem:[#allocation35_spill] sm:$0xff] %v4571_v15  ;;  %3062 = vmatprep.mubr.f32.mxu1 %v2365_v42  ;;  %v2019_v51 = vadd.f32 %v1922_v31, %v1775_v62  ;;  %v2166_v54 = vsel %vm1273_vm2, %v2163_v56, %v2165_v14  ;;  %v4590_v4 = vmax.f32 %v583_v43, 0.0  ;;  %v1506_v11 = vmul.f32 %v3684_v33, %v3982_v39  ;;  %v5557_v42 = vld [vmem:[#allocation49_spill] sm:$0xff] }
 0x1fe   : > { %v1089_v60 = vrot.slane %v968_v34, 1  ;;  %v1334_v3 = vrot.slane %v1213_v5, 2  ;;  %v1611_v38 = vrot.slane %v1505_v53, 2  ;;  %v1744_v27 = vmul.f32 %v3705_v49, %v4043_v9 }
 0x1ff   : > { %5556 = vst [vmem:[#allocation30_spill] sm:$0xff] %v4590_v4  ;;  %v2263_v21 = vadd.f32 %v2166_v54, %v2019_v51  ;;  %v728_v58 = vrot.slane %v4590_v4, 7  ;;  %v852_v57 = vmul.f32 %v3678_v28, %v4590_v4  ;;  %v1612_v31 = vrot.slane %v1506_v11, 2  ;;  %v3011_v54 = vpop.f32.mrf.mxu0 }
 0x200   : > { %v1091_v56 = vsel %vm1028_vm1, %v1089_v60, %v1090_v17  ;;  %v1336_v62 = vsel %vm1273_vm2, %v1334_v3, %v1335_v61  ;;  %v1817_v43 = vmul.f32 %v3701_v47, %v4043_v9  ;;  %v1818_v14 = vmul.f32 %v3701_v47, %v5557_v42 }
 0x201   : > { %v2302_v34 = vadd.f32 %v4156_v59, %v2263_v21  ;;  %v4607_v5 = vsel %vm689_vm0, %v728_v58, %v729_v18  ;;  %v4610_v53 = vsel %vm689_vm0, 0.0, %v728_v58  ;;  %v920_v51 = vadd.f32 %v888_v16, %v852_v57 }
 0x202   : > { %v1446_v17 = vmul.f32 %v3692_v40, %v4610_v53  ;;  %v1613_v61 = vsel %vm1273_vm2, %v1611_v38, %v1612_v31  ;;  %v1923_v11 = vrot.slane %v1817_v43, 1  ;;  %v1924_v60 = vrot.slane %v1818_v14, 1  ;;  %v5559_v38 = vld [vmem:[#allocation29_spill] sm:$0xff] }
 0x203   : > { %v2334_v3 = vmax.f32 %v2302_v34, 0.0  ;;  %v1165_v32 = vadd.f32 %v1091_v56, %v920_v51  ;;  %v1708_v4 = vadd.f32 %v1613_v61, %v5558_v37  ;;  %v2061_v18 = vmul.f32 %v3703_v48, %v4043_v9 }
 0x204   : > { %v1925_v21 = vsel %vm1028_vm1, %v1923_v11, %v1924_v60  ;;  %v2062_v58 = vmul.f32 %v3703_v48, %v5557_v42  ;;  %v598_v16 = vadd.f32 %v4322_v20, %v3011_v54  ;;  %v891_v57 = vmul.f32 %v3673_v19, %v4607_v5 }
 0x205   : > { %v2366_v43 = vadd.f32 %v2334_v3, %v5559_v38  ;;  %v1410_v14 = vadd.f32 %v1336_v62, %v1165_v32  ;;  %v1776_v34 = vadd.f32 %v1744_v27, %v1708_v4  ;;  %v2167_v56 = vrot.slane %v2061_v18, 2  ;;  %v5562_v3 = vld [vmem:[#allocation40_spill] sm:$0xff] }
 0x206   : > { %v2168_v51 = vrot.slane %v2062_v58, 2  ;;  %v4625_v37 = vmax.f32 %v598_v16, 0.0  ;;  %v972_v61 = vmul.f32 %v3646_v7, %v4607_v5  ;;  %v1217_v11 = vmul.f32 %v3648_v8, %v4607_v5 }
 0x207   : > { %3063 = vmatmul.mubr.f32.gmra.mxu1 %v2366_v43  ;;  %v4631_v15 = vadd.f32 %v1446_v17, %v1410_v14  ;;  %v2020_v54 = vadd.f32 %v1925_v21, %v1776_v34  ;;  %v1433_v6 = vmul.f32 %v3692_v40, %v3982_v39  ;;  %v5563_v32 = vrot.slane %v5562_v3, 2  ;;  %v5564_v17 = vld [vmem:[#allocation42_spill] sm:$0xff] }
 0x208   : > { %5560 = vst [vmem:[#allocation41_spill] sm:$0xff] %v4625_v37  ;;  %v2169_v27 = vsel %vm1273_vm2, %v2167_v56, %v2168_v51  ;;  %v732_v62 = vrot.slane %v4625_v37, 7  ;;  %v855_v18 = vmul.f32 %v3678_v28, %v4625_v37  ;;  %v1095_v58 = vrot.slane %v972_v61, 1  ;;  %v5566_v56 = vld [vmem:[#allocation47_spill] sm:$0xff] }
 0x209   : > { %5561 = vst [vmem:[#allocation49_spill] sm:$0xff] %v4631_v15  ;;  %v1615_v4 = vsel %vm1273_vm2, %v1612_v31, %v5563_v32  ;;  %v2264_v16 = vadd.f32 %v2169_v27, %v2020_v54  ;;  %v1340_v38 = vrot.slane %v1217_v11, 2  ;;  %v1465_v43 = vadd.f32 %v1433_v6, %v5564_v17  ;;  %v5573_v15 = vld [vmem:[#allocation39_spill] sm:$0xff] }
 0x20a   : > { %v1745_v21 = vmul.f32 %v3705_v49, %v5557_v42  ;;  %v821_v39 = vsel %vm689_vm0, %v732_v62, 0.0  ;;  %v923_v14 = vadd.f32 %v891_v57, %v855_v18  ;;  %v5565_v31 = vrot.slane %v4552_v22, 1 }
 0x20b   : > { %v5567_v3 = vrot.slane %v5566_v56, 1  ;;  %v2303_v61 = vadd.f32 %v4156_v59, %v2264_v16  ;;  %v4654_v11 = vmul.f32 %v3646_v7, %v821_v39  ;;  %v4657_v6 = vmul.f32 %v3648_v8, %v821_v39  ;;  %v592_v16 = vpop.f32.mrf.mxu0 }
 0x20c   : > { %v1098_v34 = vsel %vm1028_vm1, %v1095_v58, %v5565_v31  ;;  %v5568_v54 = vrot.slane %v4555_v0, 2  ;;  %v4663_v22 = vmul.f32 %v3684_v33, %v821_v39  ;;  %v4666_v18 = vmul.f32 %v3701_v47, %v821_v39 }
 0x20d   : > { %v1927_v32 = vsel %vm1028_vm1, %v1924_v60, %v5567_v3  ;;  %v1168_v27 = vadd.f32 %v1098_v34, %v923_v14  ;;  %v4669_v60 = vmul.f32 %v3703_v48, %v821_v39  ;;  %v2335_v17 = vmax.f32 %v2303_v61, 0.0  ;;  %v3014_v34 = vpop.f32.mrf.mxu0 }
 0x20e   : > { %v1343_v57 = vsel %vm1273_vm2, %v1340_v38, %v5568_v54  ;;  %5569 = vst [vmem:[#allocation45_spill] sm:$0xff] %v4663_v22  ;;  %v1709_v3 = vadd.f32 %v1615_v4, %v1465_v43  ;;  %v5572_v54 = vld [vmem:[#allocation48_spill] sm:$0xff]  ;;  %v593_v39 = vadd.f32 %v4322_v20, %v592_v16  ;;  %v890_v61 = vmul.f32 %v3673_v19, %v4610_v53 }
 0x20f   : > { %5570 = vst [vmem:[#allocation29_spill] sm:$0xff] %v4669_v60  ;;  %v4673_v0 = vadd.f32 %v1343_v57, %v1168_v27  ;;  %v2170_v37 = vrot.slane %v5572_v54, 2  ;;  %v2367_v45 = vadd.f32 %v2335_v17, %v5573_v15  ;;  %v971_v4 = vmul.f32 %v3646_v7, %v4610_v53 }
 0x210   : > { %v1777_v55 = vadd.f32 %v1745_v21, %v1709_v3  ;;  %v1216_v43 = vmul.f32 %v3648_v8, %v4610_v53  ;;  %v1508_v57 = vmul.f32 %v3684_v33, %v4043_v9  ;;  %v4689_v15 = vmax.f32 %v593_v39, 0.0 }
 0x211   : > { %5571 = vst [vmem:[#allocation40_spill] sm:$0xff] %v4673_v0  ;;  %v2171_v31 = vsel %vm1273_vm2, %v2168_v51, %v2170_v37  ;;  %3065 = vmatprep.mubr.f32.mxu1 %v2367_v45  ;;  %v1509_v21 = vmul.f32 %v3684_v33, %v5557_v42  ;;  %v1746_v16 = vmul.f32 %v3705_v49, %v4096_v41  ;;  %v1094_v51 = vrot.slane %v971_v4, 1 }
 0x212   : > { %v2021_v27 = vadd.f32 %v1927_v32, %v1777_v55  ;;  %5574 = vst [vmem:[#allocation42_spill] sm:$0xff] %v4689_v15  ;;  %v1339_v37 = vrot.slane %v1216_v43, 2  ;;  %v1616_v17 = vrot.slane %v1508_v57, 2  ;;  %v1820_v3 = vmul.f32 %v3701_v47, %v4096_v41 }
 0x213   : > { %v731_v14 = vrot.slane %v4689_v15, 7  ;;  %v854_v9 = vmul.f32 %v3678_v28, %v4689_v15  ;;  %v1617_v55 = vrot.slane %v1509_v21, 2  ;;  %v1096_v45 = vsel %vm1028_vm1, %v1094_v51, %v1095_v58 }
 0x214   : > { %v2265_v54 = vadd.f32 %v2171_v31, %v2021_v27  ;;  %v1341_v32 = vsel %vm1273_vm2, %v1339_v37, %v1340_v38  ;;  %v1821_v39 = vmul.f32 %v3701_v47, %v4093_v26  ;;  %v1928_v4 = vrot.slane %v1820_v3, 1 }
 0x215   : > { %v4706_v57 = vsel %vm689_vm0, %v731_v14, %v732_v62  ;;  %v4709_v31 = vsel %vm689_vm0, 0.0, %v731_v14  ;;  %v922_v27 = vadd.f32 %v890_v61, %v854_v9  ;;  %v1618_v58 = vsel %vm1273_vm2, %v1616_v17, %v1617_v55  ;;  %v5576_v17 = vld [vmem:[#allocation38_spill] sm:$0xff] }
 0x216   : > { %v2304_v43 = vadd.f32 %v4156_v59, %v2265_v54  ;;  %v1448_v21 = vmul.f32 %v3692_v40, %v4709_v31  ;;  %v1929_v38 = vrot.slane %v1821_v39, 1  ;;  %v2064_v51 = vmul.f32 %v3703_v48, %v4096_v41  ;;  %v5575_v54 = vld [vmem:[#allocation53_spill] sm:$0xff] }
 0x217   : > { %v1167_v3 = vadd.f32 %v1096_v45, %v922_v27  ;;  %v1710_v56 = vadd.f32 %v1618_v58, %v5575_v54  ;;  %v2065_v62 = vmul.f32 %v3703_v48, %v4093_v26  ;;  %v608_v9 = vadd.f32 %v4322_v20, %v3014_v34 }
 0x218   : > { %v2336_v37 = vmax.f32 %v2304_v43, 0.0  ;;  %v1930_v14 = vsel %vm1028_vm1, %v1928_v4, %v1929_v38  ;;  %v2172_v61 = vrot.slane %v2064_v51, 2  ;;  %v893_v15 = vmul.f32 %v3673_v19, %v4706_v57 }
 0x219   : > { %v1412_v0 = vadd.f32 %v1341_v32, %v1167_v3  ;;  %v1778_v22 = vadd.f32 %v1746_v16, %v1710_v56  ;;  %v2173_v60 = vrot.slane %v2065_v62, 2  ;;  %v4724_v43 = vmax.f32 %v608_v9, 0.0  ;;  %v5578_v32 = vld [vmem:[#allocation46_spill] sm:$0xff] }
 0x21a   : > { %v2368_v39 = vadd.f32 %v2336_v37, %v5576_v17  ;;  %v975_v45 = vmul.f32 %v3646_v7, %v4706_v57  ;;  %v1220_v27 = vmul.f32 %v3648_v8, %v4706_v57  ;;  %v1435_v4 = vmul.f32 %v3692_v40, %v5557_v42  ;;  %v5580_v17 = vld [vmem:[#allocation50_spill] sm:$0xff] }
 0x21b   : > { %5577 = vst [vmem:[#allocation47_spill] sm:$0xff] %v4724_v43  ;;  %v4732_v34 = vadd.f32 %v1448_v21, %v1412_v0  ;;  %v2022_v58 = vadd.f32 %v1930_v14, %v1778_v22  ;;  %v2174_v51 = vsel %vm1273_vm2, %v2172_v61, %v2173_v60  ;;  %v5579_v56 = vrot.slane %v5578_v32, 2  ;;  %v602_v32 = vpop.f32.mrf.mxu0 }
 0x21c   : > { %3066 = vmatmul.mubr.f32.gmra.mxu1 %v2368_v39  ;;  %v735_v37 = vrot.slane %v4724_v43, 7  ;;  %v857_v3 = vmul.f32 %v3678_v28, %v4724_v43  ;;  %v1100_v54 = vrot.slane %v975_v45, 1  ;;  %v1345_v62 = vrot.slane %v1220_v27, 2 }
 0x21d   : > { %v1620_v16 = vsel %vm1273_vm2, %v1617_v55, %v5579_v56  ;;  %v2266_v9 = vadd.f32 %v2174_v51, %v2022_v58  ;;  %v1467_v42 = vadd.f32 %v1435_v4, %v5580_v17  ;;  %v1747_v0 = vmul.f32 %v3705_v49, %v4093_v26 }
 0x21e   : > { %v5581_v22 = vrot.slane %v4087_v25, 1  ;;  %v822_v14 = vsel %vm689_vm0, %v735_v37, 0.0  ;;  %v925_v55 = vadd.f32 %v893_v15, %v857_v3  ;;  %v5582_v61 = vrot.slane %v4654_v11, 1 }
 0x21f   : > { %v5583_v45 = vrot.slane %v4657_v6, 2  ;;  %v2305_v4 = vadd.f32 %v4156_v59, %v2266_v9  ;;  %v4756_v58 = vmul.f32 %v3646_v7, %v822_v14  ;;  %v4759_v25 = vmul.f32 %v3648_v8, %v822_v14 }
 0x220   : > { %v1932_v21 = vsel %vm1028_vm1, %v1929_v38, %v5581_v22  ;;  %v1103_v39 = vsel %vm1028_vm1, %v1100_v54, %v5582_v61  ;;  %v4762_v38 = vmul.f32 %v3684_v33, %v822_v14  ;;  %v4765_v11 = vmul.f32 %v3701_v47, %v822_v14  ;;  %v5586_v61 = vld [vmem:[#allocation55_spill] sm:$0xff] }
 0x221   : > { %v1348_v27 = vsel %vm1273_vm2, %v1345_v62, %v5583_v45  ;;  %v1170_v15 = vadd.f32 %v1103_v39, %v925_v55  ;;  %v4768_v51 = vmul.f32 %v3703_v48, %v822_v14  ;;  %v1711_v6 = vadd.f32 %v1620_v16, %v1467_v42  ;;  %v5587_v45 = vld [vmem:[#allocation44_spill] sm:$0xff] }
 0x222   : > { %5584 = vst [vmem:[#allocation48_spill] sm:$0xff] %v4762_v38  ;;  %v2337_v56 = vmax.f32 %v2305_v4, 0.0  ;;  %v2175_v39 = vrot.slane %v5586_v61, 2  ;;  %v603_v14 = vadd.f32 %v4322_v20, %v602_v32  ;;  %v892_v16 = vmul.f32 %v3673_v19, %v4709_v31 }
 0x223   : > { %v4773_v17 = vadd.f32 %v1348_v27, %v1170_v15  ;;  %v1779_v55 = vadd.f32 %v1747_v0, %v1711_v6  ;;  %v974_v42 = vmul.f32 %v3646_v7, %v4709_v31  ;;  %v1219_v27 = vmul.f32 %v3648_v8, %v4709_v31 }
 0x224   : > { %v2369_v43 = vadd.f32 %v2337_v56, %v5587_v45  ;;  %v2176_v9 = vsel %vm1273_vm2, %v2173_v60, %v2175_v39  ;;  %v1511_v0 = vmul.f32 %v3684_v33, %v4096_v41  ;;  %v4788_v15 = vmax.f32 %v603_v14, 0.0  ;;  %v4803_v14 = vld [vmem:[%s5365_s4] ss:$0 sm:$0xff] }
 0x225   : > { %5585 = vst [vmem:[#allocation39_spill] sm:$0xff] %v4773_v17  ;;  %v2023_v4 = vadd.f32 %v1932_v21, %v1779_v55  ;;  %v1099_v6 = vrot.slane %v974_v42, 1  ;;  %v1512_v32 = vmul.f32 %v3684_v33, %v4093_v26  ;;  %v1748_v56 = vmul.f32 %v3705_v49, %v4207_v36 }
 0x226   : > { %3068 = vmatprep.mubr.f32.mxu1 %v2369_v43  ;;  %5588 = vst [vmem:[#allocation53_spill] sm:$0xff] %v4788_v15  ;;  %v1344_v21 = vrot.slane %v1219_v27, 2  ;;  %v1621_v55 = vrot.slane %v1511_v0, 2  ;;  %v1823_v60 = vmul.f32 %v3701_v47, %v4207_v36  ;;  %v734_v39 = vrot.slane %v4788_v15, 7  ;;  %v3017_v0 = vpop.f32.mrf.mxu0 }
 0x227   : > { %v2267_v61 = vadd.f32 %v2176_v9, %v2023_v4  ;;  %v856_v41 = vmul.f32 %v3678_v28, %v4788_v15  ;;  %v1101_v43 = vsel %vm1028_vm1, %v1099_v6, %v1100_v54  ;;  %v1622_v45 = vrot.slane %v1512_v32, 2  ;;  %v5589_v15 = vld [vmem:[#allocation43_spill] sm:$0xff] }
 0x228   : > { %v1346_v42 = vsel %vm1273_vm2, %v1344_v21, %v1345_v62  ;;  %v1824_v4 = vmul.f32 %v3701_v47, %v4204_v52  ;;  %v1933_v27 = vrot.slane %v1823_v60, 1  ;;  %v4810_v22 = vsel %vm689_vm0, %v734_v39, %v735_v37 }
 0x229   : > { %v2306_v9 = vadd.f32 %v4803_v14, %v2267_v61  ;;  %v4813_v54 = vsel %vm689_vm0, 0.0, %v734_v39  ;;  %v924_v6 = vadd.f32 %v892_v16, %v856_v41  ;;  %v1623_v32 = vsel %vm1273_vm2, %v1621_v55, %v1622_v45 }
 0x22a   : > { %v1450_v61 = vmul.f32 %v3692_v40, %v4813_v54  ;;  %v1712_v62 = vadd.f32 %v1623_v32, %v4130_v13  ;;  %v1934_v21 = vrot.slane %v1824_v4, 1  ;;  %v2067_v60 = vmul.f32 %v3703_v48, %v4207_v36 }
 0x22b   : > { %v2338_v3 = vmax.f32 %v2306_v9, 0.0  ;;  %v1169_v59 = vadd.f32 %v1101_v43, %v924_v6  ;;  %v2068_v37 = vmul.f32 %v3703_v48, %v4204_v52  ;;  %v618_v39 = vadd.f32 %v4322_v20, %v3017_v0 }
 0x22c   : > { %v1780_v41 = vadd.f32 %v1748_v56, %v1712_v62  ;;  %v1935_v55 = vsel %vm1028_vm1, %v1933_v27, %v1934_v21  ;;  %v895_v9 = vmul.f32 %v3673_v19, %v4810_v22  ;;  %v2177_v13 = vrot.slane %v2067_v60, 2 }
 0x22d   : > { %v2370_v16 = vadd.f32 %v2338_v3, %v5589_v15  ;;  %v1414_v17 = vadd.f32 %v1346_v42, %v1169_v59  ;;  %v2178_v4 = vrot.slane %v2068_v37, 2  ;;  %v4828_v43 = vmax.f32 %v618_v39, 0.0  ;;  %v5592_v37 = vld [vmem:[#allocation56_spill] sm:$0xff] }
 0x22e   : > { %v2024_v6 = vadd.f32 %v1935_v55, %v1780_v41  ;;  %v978_v32 = vmul.f32 %v3646_v7, %v4810_v22  ;;  %v1223_v0 = vmul.f32 %v3648_v8, %v4810_v22  ;;  %v1437_v3 = vmul.f32 %v3692_v40, %v4093_v26  ;;  %v5593_v55 = vld [vmem:[#allocation54_spill] sm:$0xff] }
 0x22f   : > { %5590 = vst [vmem:[#allocation38_spill] sm:$0xff] %v4828_v43  ;;  %3069 = vmatmul.mubr.f32.gmra.mxu1 %v2370_v16  ;;  %v4836_v15 = vadd.f32 %v1450_v61, %v1414_v17  ;;  %v2179_v56 = vsel %vm1273_vm2, %v2177_v13, %v2178_v4  ;;  %v738_v59 = vrot.slane %v4828_v43, 7  ;;  %v859_v42 = vmul.f32 %v3678_v28, %v4828_v43 }
 0x230   : > { %v2268_v27 = vadd.f32 %v2179_v56, %v2024_v6  ;;  %v1105_v62 = vrot.slane %v978_v32, 1  ;;  %v1350_v60 = vrot.slane %v1223_v0, 2  ;;  %v1469_v39 = vadd.f32 %v1437_v3, %v5592_v37 }
 0x231   : > { %5591 = vst [vmem:[#allocation46_spill] sm:$0xff] %v4836_v15  ;;  %v823_v16 = vsel %vm689_vm0, %v738_v59, 0.0  ;;  %v927_v41 = vadd.f32 %v895_v9, %v859_v42  ;;  %v5594_v38 = vrot.slane %v5593_v55, 2  ;;  %v1749_v17 = vmul.f32 %v3705_v49, %v4204_v52  ;;  %v612_v42 = vpop.f32.mrf.mxu0  ;;  %v5598_v55 = vld [vmem:[#allocation58_spill] sm:$0xff] }
 0x232   : > { %v2307_v61 = vadd.f32 %v4803_v14, %v2268_v27  ;;  %v5595_v13 = vrot.slane %v4756_v58, 1  ;;  %v5596_v32 = vrot.slane %v4759_v25, 2  ;;  %v4857_v3 = vmul.f32 %v3684_v33, %v823_v16 }
 0x233   : > { %v1625_v26 = vsel %vm1273_vm2, %v1622_v45, %v5594_v38  ;;  %v4860_v56 = vmul.f32 %v3701_v47, %v823_v16  ;;  %v4863_v38 = vmul.f32 %v3703_v48, %v823_v16  ;;  %v5597_v37 = vrot.slane %v4162_v29, 1  ;;  %v5599_v16 = vld [vmem:[#allocation52_spill] sm:$0xff] }
 0x234   : > { %v1108_v6 = vsel %vm1028_vm1, %v1105_v62, %v5595_v13  ;;  %v1353_v0 = vsel %vm1273_vm2, %v1350_v60, %v5596_v32  ;;  %v1713_v45 = vadd.f32 %v1625_v26, %v1469_v39  ;;  %v2339_v27 = vmax.f32 %v2307_v61, 0.0 }
 0x235   : > { %v1172_v9 = vadd.f32 %v1108_v6, %v927_v41  ;;  %v1937_v25 = vsel %vm1028_vm1, %v1934_v21, %v5597_v37  ;;  %v2180_v13 = vrot.slane %v5598_v55, 2  ;;  %v613_v26 = vadd.f32 %v4322_v20, %v612_v42 }
 0x236   : > { %v1781_v43 = vadd.f32 %v1749_v17, %v1713_v45  ;;  %v2371_v15 = vadd.f32 %v2339_v27, %v5599_v16  ;;  %v894_v29 = vmul.f32 %v3673_v19, %v4813_v54  ;;  %v977_v21 = vmul.f32 %v3646_v7, %v4813_v54 }
 0x237   : > { %v4870_v32 = vadd.f32 %v1353_v0, %v1172_v9  ;;  %v2181_v39 = vsel %vm1273_vm2, %v2178_v4, %v2180_v13  ;;  %v1222_v0 = vmul.f32 %v3648_v8, %v4813_v54  ;;  %v1514_v9 = vmul.f32 %v3684_v33, %v4207_v36 }
 0x238   : > { %v2025_v61 = vadd.f32 %v1937_v25, %v1781_v43  ;;  %3071 = vmatprep.mubr.f32.mxu1 %v2371_v15  ;;  %v4885_v17 = vmax.f32 %v613_v26, 0.0  ;;  %v1515_v4 = vmul.f32 %v3684_v33, %v4204_v52  ;;  %v1750_v20 = vmul.f32 %v3705_v49, %v4308_v35 }
 0x239   : > { %v1826_v19 = vmul.f32 %v3701_v47, %v4308_v35  ;;  %v1104_v7 = vrot.slane %v977_v21, 1  ;;  %v1349_v45 = vrot.slane %v1222_v0, 2  ;;  %v1626_v42 = vrot.slane %v1514_v9, 2 }
 0x23a   : > { %v2269_v43 = vadd.f32 %v2181_v39, %v2025_v61  ;;  %v737_v8 = vrot.slane %v4885_v17, 7  ;;  %v858_v36 = vmul.f32 %v3678_v28, %v4885_v17  ;;  %v1627_v15 = vrot.slane %v1515_v4, 2  ;;  %v5600_v4 = vld [vmem:[#allocation51_spill] sm:$0xff] }
 0x23b   : > { %v1827_v27 = vmul.f32 %v3701_v47, %v4305_v46  ;;  %v1106_v25 = vsel %vm1028_vm1, %v1104_v7, %v1105_v62  ;;  %v1351_v55 = vsel %vm1273_vm2, %v1349_v45, %v1350_v60  ;;  %v1938_v13 = vrot.slane %v1826_v19, 1 }
 0x23c   : > { %v2308_v37 = vadd.f32 %v4803_v14, %v2269_v43  ;;  %v4902_v16 = vsel %vm689_vm0, %v737_v8, %v738_v59  ;;  %v806_v39 = vsel %vm689_vm0, 0.0, %v737_v8  ;;  %v926_v26 = vadd.f32 %v894_v29, %v858_v36 }
 0x23d   : > { %v1628_v61 = vsel %vm1273_vm2, %v1626_v42, %v1627_v15  ;;  %v1452_v21 = vmul.f32 %v3692_v40, %v806_v39  ;;  %v4909_v0 = vmul.f32 %v3692_v40, %v4902_v16  ;;  %v4912_v62 = vmul.f32 %v3684_v33, %v806_v39 }
 0x23e   : > { %v2340_v28 = vmax.f32 %v2308_v37, 0.0  ;;  %v1171_v60 = vadd.f32 %v1106_v25, %v926_v26  ;;  %v4916_v59 = vmul.f32 %v3684_v33, %v4902_v16  ;;  %v4919_v9 = vmul.f32 %v3705_v49, %v806_v39 }
 0x23f   : > { %v4922_v29 = vmul.f32 %v3701_v47, %v806_v39  ;;  %v4928_v7 = vmul.f32 %v3701_v47, %v4902_v16  ;;  %v4931_v45 = vmul.f32 %v3703_v48, %v806_v39  ;;  %v1714_v37 = vadd.f32 %v1628_v61, %v4230_v44 }
 0x240   : > { %v2372_v19 = vadd.f32 %v2340_v28, %v5600_v4  ;;  %v1416_v42 = vadd.f32 %v1351_v55, %v1171_v60  ;;  %v1939_v25 = vrot.slane %v1827_v27, 1  ;;  %v2070_v26 = vmul.f32 %v3703_v48, %v4308_v35 }
 0x241   : > { %v2071_v28 = vmul.f32 %v3703_v48, %v4305_v46  ;;  %v1439_v4 = vmul.f32 %v3692_v40, %v4204_v52  ;;  %v1782_v55 = vadd.f32 %v1750_v20, %v1714_v37  ;;  %v5601_v60 = vrot.slane %v4159_v2, 2 }
 0x242   : > { %3072 = vmatmul.mubr.f32.gmra.mxu1 %v2372_v19  ;;  %v4942_v39 = vadd.f32 %v1452_v21, %v1416_v42  ;;  %v1751_v44 = vmul.f32 %v3705_v49, %v4305_v46  ;;  %v1940_v27 = vsel %vm1028_vm1, %v1938_v13, %v1939_v25  ;;  %v2182_v61 = vrot.slane %v2070_v26, 2  ;;  %v5603_v26 = vld [vmem:[#allocation37_spill] sm:$0xff] }
 0x243   : > { %v1630_v58 = vsel %vm1273_vm2, %v1627_v15, %v5601_v60  ;;  %v2183_v19 = vrot.slane %v2071_v28, 2  ;;  %v1471_v43 = vadd.f32 %v1439_v4, %v4170_v30  ;;  %v2026_v8 = vadd.f32 %v1940_v27, %v1782_v55 }
 0x244   : > { %v5602_v6 = vrot.slane %v4262_v24, 1  ;;  %v2185_v20 = vrot.slane %v4265_v1, 2  ;;  %v1517_v2 = vmul.f32 %v3684_v33, %v4308_v35  ;;  %v1518_v13 = vmul.f32 %v3684_v33, %v4305_v46 }
 0x245   : > { %v2184_v15 = vsel %vm1273_vm2, %v2182_v61, %v2183_v19  ;;  %v1715_v21 = vadd.f32 %v1630_v58, %v1471_v43  ;;  %v1752_v42 = vmul.f32 %v3705_v49, %v4413_v63  ;;  %v1830_v35 = vmul.f32 %v3701_v47, %v5603_v26 }
 0x246   : > { %v1942_v52 = vsel %vm1028_vm1, %v1939_v25, %v5602_v6  ;;  %v2270_v30 = vadd.f32 %v2184_v15, %v2026_v8  ;;  %v2186_v37 = vsel %vm1273_vm2, %v2183_v19, %v2185_v20  ;;  %v1631_v24 = vrot.slane %v1517_v2, 2  ;;  %v5604_v19 = vld [vmem:[#allocation64_spill] sm:$0xff]  ;;  %v5605_v15 = vld [vmem:[#allocation62_spill] sm:$0xff] }
 0x247   : > { %v1829_v6 = vmul.f32 %v3701_v47, %v4413_v63  ;;  %v1783_v1 = vadd.f32 %v1751_v44, %v1715_v21  ;;  %v1632_v25 = vrot.slane %v1518_v13, 2  ;;  %v2073_v58 = vmul.f32 %v3703_v48, %v4413_v63 }
 0x248   : > { %v2309_v43 = vadd.f32 %v4803_v14, %v2270_v30  ;;  %v2074_v8 = vmul.f32 %v3703_v48, %v5603_v26  ;;  %v1441_v4 = vmul.f32 %v3692_v40, %v4305_v46  ;;  %v1944_v44 = vrot.slane %v1830_v35, 1 }
 0x249   : > { %v1943_v28 = vrot.slane %v1829_v6, 1  ;;  %v2027_v55 = vadd.f32 %v1942_v52, %v1783_v1  ;;  %v1633_v60 = vsel %vm1273_vm2, %v1631_v24, %v1632_v25  ;;  %v2187_v27 = vrot.slane %v2073_v58, 2  ;;  %v5606_v6 = vld [vmem:[#allocation61_spill] sm:$0xff]  ;;  %v5608_v52 = vld [vmem:[#allocation59_spill] sm:$0xff] }
 0x24a   : > { %v2341_v61 = vmax.f32 %v2309_v43, 0.0  ;;  %v1716_v20 = vadd.f32 %v1633_v60, %v5604_v19  ;;  %v2188_v2 = vrot.slane %v2074_v8, 2  ;;  %v1473_v21 = vadd.f32 %v1441_v4, %v5605_v15  ;;  %v5609_v8 = vld [vmem:[#allocation22_spill] sm:$0xff] }
 0x24b   : > { %v2271_v13 = vadd.f32 %v2186_v37, %v2027_v55  ;;  %v1945_v30 = vsel %vm1028_vm1, %v1943_v28, %v1944_v44  ;;  %v5607_v41 = vrot.slane %v5606_v6, 2  ;;  %v1753_v46 = vmul.f32 %v3705_v49, %v5603_v26  ;;  %v5611_v28 = vld [vmem:[#allocation26_spill] sm:$0xff] }
 0x24c   : > { %v2373_v24 = vadd.f32 %v2341_v61, %v5608_v52  ;;  %v1784_v1 = vadd.f32 %v1752_v42, %v1716_v20  ;;  %v2189_v35 = vsel %vm1273_vm2, %v2187_v27, %v2188_v2  ;;  %v5610_v4 = vrot.slane %v5609_v8, 1 }
 0x24d   : > { %v1635_v36 = vsel %vm1273_vm2, %v1632_v25, %v5607_v41  ;;  %v2310_v43 = vadd.f32 %v4803_v14, %v2271_v13  ;;  %v2190_v55 = vrot.slane %v5611_v28, 2  ;;  %v1520_v41 = vmul.f32 %v3684_v33, %v4413_v63  ;;  %v5612_v13 = vld [vmem:[#allocation57_spill] sm:$0xff] }
 0x24e   : > { %v1717_v58 = vadd.f32 %v1635_v36, %v1473_v21  ;;  %v1947_v37 = vsel %vm1028_vm1, %v1944_v44, %v5610_v4  ;;  %3074 = vmatprep.mubr.f32.mxu1 %v2373_v24  ;;  %v2028_v25 = vadd.f32 %v1945_v30, %v1784_v1  ;;  %v1521_v42 = vmul.f32 %v3684_v33, %v5603_v26 }
 0x24f   : > { %v1754_v36 = vmul.f32 %v3705_v49, %v4508_v50  ;;  %v2342_v27 = vmax.f32 %v2310_v43, 0.0  ;;  %v2191_v61 = vsel %vm1273_vm2, %v2188_v2, %v2190_v55  ;;  %v1636_v19 = vrot.slane %v1520_v41, 2 }
 0x250   : > { %v1785_v60 = vadd.f32 %v1753_v46, %v1717_v58  ;;  %v1832_v44 = vmul.f32 %v3701_v47, %v4508_v50  ;;  %v2272_v20 = vadd.f32 %v2189_v35, %v2028_v25  ;;  %v1637_v21 = vrot.slane %v1521_v42, 2  ;;  %v5613_v58 = vld [vmem:[#allocation34_spill] sm:$0xff]  ;;  %v5614_v25 = vld [vmem:[#allocation20_spill] sm:$0xff] }
 0x251   : > { %v1833_v63 = vmul.f32 %v3701_v47, %v4505_v12  ;;  %v2374_v30 = vadd.f32 %v2342_v27, %v5612_v13  ;;  %v2076_v46 = vmul.f32 %v3703_v48, %v4508_v50  ;;  %v2077_v52 = vmul.f32 %v3703_v48, %v4505_v12 }
 0x252   : > { %v2029_v15 = vadd.f32 %v1947_v37, %v1785_v60  ;;  %v1948_v6 = vrot.slane %v1832_v44, 1  ;;  %v2311_v2 = vadd.f32 %v4803_v14, %v2272_v20  ;;  %v1638_v1 = vsel %vm1273_vm2, %v1636_v19, %v1637_v21  ;;  %v5616_v19 = vld [vmem:[#allocation21_spill] sm:$0xff] }
 0x253   : > { %v1949_v35 = vrot.slane %v1833_v63, 1  ;;  %3075 = vmatmul.mubr.f32.gmra.mxu1 %v2374_v30  ;;  %v1718_v43 = vadd.f32 %v1638_v1, %v5613_v58  ;;  %v2192_v8 = vrot.slane %v2076_v46, 2  ;;  %v2193_v4 = vrot.slane %v2077_v52, 2 }
 0x254   : > { %v2273_v24 = vadd.f32 %v2191_v61, %v2029_v15  ;;  %v1443_v37 = vmul.f32 %v3692_v40, %v5603_v26  ;;  %v2343_v28 = vmax.f32 %v2311_v2, 0.0  ;;  %v5615_v60 = vrot.slane %v5614_v25, 2  ;;  %v5617_v15 = vld [vmem:[#allocation63_spill] sm:$0xff]  ;;  %v5619_v2 = vld [vmem:[#allocation60_spill] sm:$0xff] }
 0x255   : > { %v1950_v41 = vsel %vm1028_vm1, %v1948_v6, %v1949_v35  ;;  %v1786_v27 = vadd.f32 %v1754_v36, %v1718_v43  ;;  %v2194_v61 = vsel %vm1273_vm2, %v2192_v8, %v2193_v4  ;;  %v1755_v20 = vmul.f32 %v3705_v49, %v4505_v12 }
 0x256   : > { %v2312_v55 = vadd.f32 %v4803_v14, %v2273_v24  ;;  %v1640_v42 = vsel %vm1273_vm2, %v1637_v21, %v5615_v60  ;;  %v1475_v44 = vadd.f32 %v1443_v37, %v5616_v19  ;;  %v2375_v63 = vadd.f32 %v2343_v28, %v5617_v15 }
 0x257   : > { %v5618_v13 = vrot.slane %v4465_v23, 1  ;;  %v2195_v6 = vrot.slane %v4470_v10, 2  ;;  %v2030_v46 = vadd.f32 %v1950_v41, %v1786_v27  ;;  %v1523_v36 = vmul.f32 %v3684_v33, %v4508_v50 }
 0x258   : > { %v2344_v26 = vmax.f32 %v2312_v55, 0.0  ;;  %v1719_v52 = vadd.f32 %v1640_v42, %v1475_v44  ;;  %v1524_v21 = vmul.f32 %v3684_v33, %v4505_v12  ;;  %3077 = vmatprep.mubr.f32.mxu1 %v2375_v63  ;;  %v1756_v23 = vmul.f32 %v3705_v49, %v4610_v53  ;;  %v5620_v42 = vld [vmem:[#allocation32_spill] sm:$0xff] }
 0x259   : > { %v1952_v30 = vsel %vm1028_vm1, %v1949_v35, %v5618_v13  ;;  %v2196_v1 = vsel %vm1273_vm2, %v2193_v4, %v2195_v6  ;;  %v1835_v35 = vmul.f32 %v3701_v47, %v4610_v53  ;;  %v2274_v10 = vadd.f32 %v2194_v61, %v2030_v46  ;;  %v5621_v63 = vld [vmem:[#allocation28_spill] sm:$0xff]  ;;  %v5622_v13 = vld [vmem:[#allocation19_spill] sm:$0xff] }
 0x25a   : > { %v2376_v24 = vadd.f32 %v2344_v26, %v5619_v2  ;;  %v1787_v58 = vadd.f32 %v1755_v20, %v1719_v52  ;;  %v1641_v43 = vrot.slane %v1523_v36, 2  ;;  %v1642_v8 = vrot.slane %v1524_v21, 2  ;;  %v5624_v21 = vld [vmem:[#allocation27_spill] sm:$0xff] }
 0x25b   : > { %v1836_v50 = vmul.f32 %v3701_v47, %v4607_v5  ;;  %v1953_v37 = vrot.slane %v1835_v35, 1  ;;  %v2079_v28 = vmul.f32 %v3703_v48, %v4610_v53  ;;  %v2080_v4 = vmul.f32 %v3703_v48, %v4607_v5 }
 0x25c   : > { %3078 = vmatmul.mubr.f32.gmra.mxu1 %v2376_v24  ;;  %v2313_v55 = vadd.f32 %v4803_v14, %v2274_v10  ;;  %v2031_v41 = vadd.f32 %v1952_v30, %v1787_v58  ;;  %v1643_v25 = vsel %vm1273_vm2, %v1641_v43, %v1642_v8  ;;  %v1445_v60 = vmul.f32 %v3692_v40, %v4505_v12 }
 0x25d   : > { %v1720_v27 = vadd.f32 %v1643_v25, %v5620_v42  ;;  %v1954_v61 = vrot.slane %v1836_v50, 1  ;;  %v2197_v19 = vrot.slane %v2079_v28, 2  ;;  %v2198_v44 = vrot.slane %v2080_v4, 2  ;;  %v5627_v50 = vld [vmem:[#allocation31_spill] sm:$0xff] }
 0x25e   : > { %v2345_v20 = vmax.f32 %v2313_v55, 0.0  ;;  %v2275_v15 = vadd.f32 %v2196_v1, %v2031_v41  ;;  %v1477_v26 = vadd.f32 %v1445_v60, %v5621_v63  ;;  %v5623_v6 = vrot.slane %v5622_v13, 2  ;;  %v5625_v1 = vld [vmem:[#allocation23_spill] sm:$0xff] }
 0x25f   : > { %v1788_v52 = vadd.f32 %v1756_v23, %v1720_v27  ;;  %v1955_v30 = vsel %vm1028_vm1, %v1953_v37, %v1954_v61  ;;  %v2199_v36 = vsel %vm1273_vm2, %v2197_v19, %v2198_v44  ;;  %v1757_v12 = vmul.f32 %v3705_v49, %v4607_v5 }
 0x260   : > { %v1645_v46 = vsel %vm1273_vm2, %v1642_v8, %v5623_v6  ;;  %v2377_v2 = vadd.f32 %v2345_v20, %v5624_v21  ;;  %v2314_v24 = vadd.f32 %v4803_v14, %v2275_v15  ;;  %v5626_v10 = vrot.slane %v5625_v1, 1 }
 0x261   : > { %v1721_v35 = vadd.f32 %v1645_v46, %v1477_v26  ;;  %v2032_v43 = vadd.f32 %v1955_v30, %v1788_v52  ;;  %v2200_v8 = vrot.slane %v5627_v50, 2  ;;  %v1526_v23 = vmul.f32 %v3684_v33, %v4610_v53  ;;  %v5629_v46 = vld [vmem:[#allocation49_spill] sm:$0xff]  ;;  %v5632_v50 = vld [vmem:[#allocation35_spill] sm:$0xff] }
 0x262   : > { %v1957_v58 = vsel %vm1028_vm1, %v1954_v61, %v5626_v10  ;;  %v1527_v37 = vmul.f32 %v3684_v33, %v4607_v5  ;;  %3080 = vmatprep.mubr.f32.mxu1 %v2377_v2  ;;  %v2346_v28 = vmax.f32 %v2314_v24, 0.0  ;;  %v1758_v55 = vmul.f32 %v3705_v49, %v4709_v31  ;;  %v5628_v61 = vld [vmem:[#allocation18_spill] sm:$0xff]  ;;  %v5630_v24 = vld [vmem:[#allocation33_spill] sm:$0xff] }
 0x263   : > { %v1789_v4 = vadd.f32 %v1757_v12, %v1721_v35  ;;  %v1838_v41 = vmul.f32 %v3701_v47, %v4709_v31  ;;  %v2276_v25 = vadd.f32 %v2199_v36, %v2032_v43  ;;  %v2201_v60 = vsel %vm1273_vm2, %v2198_v44, %v2200_v8 }
 0x264   : > { %v1646_v42 = vrot.slane %v1526_v23, 2  ;;  %v1647_v27 = vrot.slane %v1527_v37, 2  ;;  %v2378_v19 = vadd.f32 %v2346_v28, %v5628_v61  ;;  %v1839_v20 = vmul.f32 %v3701_v47, %v4706_v57  ;;  %v5633_v23 = vld [vmem:[#allocation25_spill] sm:$0xff] }
 0x265   : > { %v2033_v53 = vadd.f32 %v1957_v58, %v1789_v4  ;;  %v1958_v15 = vrot.slane %v1838_v41, 1  ;;  %v2315_v63 = vadd.f32 %v4803_v14, %v2276_v25  ;;  %v2082_v13 = vmul.f32 %v3703_v48, %v4709_v31 }
 0x266   : > { %v1648_v26 = vsel %vm1273_vm2, %v1646_v42, %v1647_v27  ;;  %v2083_v6 = vmul.f32 %v3703_v48, %v4706_v57  ;;  %3081 = vmatmul.mubr.f32.gmra.mxu1 %v2378_v19  ;;  %v1959_v30 = vrot.slane %v1839_v20, 1  ;;  %v1447_v36 = vmul.f32 %v3692_v40, %v4607_v5  ;;  %v5636_v20 = vld [vmem:[#allocation36_spill] sm:$0xff] }
 0x267   : > { %v2277_v44 = vadd.f32 %v2201_v60, %v2033_v53  ;;  %v1722_v52 = vadd.f32 %v1648_v26, %v5629_v46  ;;  %v2347_v12 = vmax.f32 %v2315_v63, 0.0  ;;  %v2202_v21 = vrot.slane %v2082_v13, 2 }
 0x268   : > { %v2203_v2 = vrot.slane %v2083_v6, 2  ;;  %v5631_v35 = vrot.slane %v5630_v24, 2  ;;  %v1960_v43 = vsel %vm1028_vm1, %v1958_v15, %v1959_v30  ;;  %v1479_v8 = vadd.f32 %v1447_v36, %v5632_v50 }
 0x269   : > { %v2316_v10 = vadd.f32 %v4803_v14, %v2277_v44  ;;  %v1790_v58 = vadd.f32 %v1758_v55, %v1722_v52  ;;  %v2379_v37 = vadd.f32 %v2347_v12, %v5633_v23  ;;  %v1759_v5 = vmul.f32 %v3705_v49, %v4706_v57 }
 0x26a   : > { %v1650_v1 = vsel %vm1273_vm2, %v1647_v27, %v5631_v35  ;;  %v2204_v28 = vsel %vm1273_vm2, %v2202_v21, %v2203_v2  ;;  %v5634_v4 = vrot.slane %v4666_v18, 1  ;;  %v5635_v27 = vld [vmem:[#allocation29_spill] sm:$0xff]  ;;  %v1529_v61 = vmul.f32 %v3684_v33, %v4709_v31 }
 0x26b   : > { %v2348_v25 = vmax.f32 %v2316_v10, 0.0  ;;  %v2034_v60 = vadd.f32 %v1960_v43, %v1790_v58  ;;  %v1723_v42 = vadd.f32 %v1650_v1, %v1479_v8  ;;  %v2205_v55 = vrot.slane %v5635_v27, 2  ;;  %3083 = vmatprep.mubr.f32.mxu1 %v2379_v37  ;;  %v5637_v35 = vld [vmem:[#allocation45_spill] sm:$0xff] }
 0x26c   : > { %v1962_v41 = vsel %vm1028_vm1, %v1959_v30, %v5634_v4  ;;  %v1530_v19 = vmul.f32 %v3684_v33, %v4706_v57  ;;  %v1760_v53 = vmul.f32 %v3705_v49, %v4813_v54  ;;  %v1841_v18 = vmul.f32 %v3701_v47, %v4813_v54 }
 0x26d   : > { %v2380_v15 = vadd.f32 %v2348_v25, %v5636_v20  ;;  %v2278_v63 = vadd.f32 %v2204_v28, %v2034_v60  ;;  %v1791_v26 = vadd.f32 %v1759_v5, %v1723_v42  ;;  %v2206_v13 = vsel %vm1273_vm2, %v2203_v2, %v2205_v55  ;;  %v5639_v28 = vld [vmem:[#allocation40_spill] sm:$0xff] }
 0x26e   : > { %v1651_v6 = vrot.slane %v1529_v61, 2  ;;  %v1652_v44 = vrot.slane %v1530_v19, 2  ;;  %v1842_v31 = vmul.f32 %v3701_v47, %v4810_v22  ;;  %v1963_v46 = vrot.slane %v1841_v18, 1 }
 0x26f   : > { %3084 = vmatmul.mubr.f32.gmra.mxu1 %v2380_v15  ;;  %v2317_v52 = vadd.f32 %v4803_v14, %v2278_v63  ;;  %v2035_v30 = vadd.f32 %v1962_v41, %v1791_v26  ;;  %v2085_v36 = vmul.f32 %v3703_v48, %v4813_v54  ;;  %v2086_v12 = vmul.f32 %v3703_v48, %v4810_v22  ;;  %v5640_v41 = vld [vmem:[#allocation30_spill] sm:$0xff] }
 0x270   : > { %v1653_v21 = vsel %vm1273_vm2, %v1651_v6, %v1652_v44  ;;  %v1964_v24 = vrot.slane %v1842_v31, 1  ;;  %v1449_v2 = vmul.f32 %v3692_v40, %v4706_v57  ;;  %v5638_v1 = vrot.slane %v5637_v35, 2  ;;  %v5642_v6 = vld [vmem:[#allocation24_spill] sm:$0xff] }
 0x271   : > { %v2349_v58 = vmax.f32 %v2317_v52, 0.0  ;;  %v2279_v43 = vadd.f32 %v2206_v13, %v2035_v30  ;;  %v1724_v50 = vadd.f32 %v1653_v21, %v4732_v34  ;;  %v2207_v8 = vrot.slane %v2085_v36, 2  ;;  %v5644_v21 = vld [vmem:[#allocation48_spill] sm:$0xff] }
 0x272   : > { %v1655_v10 = vsel %vm1273_vm2, %v1652_v44, %v5638_v1  ;;  %v1965_v23 = vsel %vm1028_vm1, %v1963_v46, %v1964_v24  ;;  %v2208_v37 = vrot.slane %v2086_v12, 2  ;;  %v1481_v5 = vadd.f32 %v1449_v2, %v5639_v28  ;;  %v5646_v1 = vld [vmem:[#allocation46_spill] sm:$0xff] }
 0x273   : > { %v1761_v4 = vmul.f32 %v3705_v49, %v4810_v22  ;;  %v2381_v25 = vadd.f32 %v2349_v58, %v5640_v41  ;;  %v2318_v57 = vadd.f32 %v4803_v14, %v2279_v43  ;;  %v1792_v60 = vadd.f32 %v1760_v53, %v1724_v50  ;;  %v5647_v58 = vld [vmem:[#allocation39_spill] sm:$0xff] }
 0x274   : > { %v5641_v42 = vrot.slane %v4765_v11, 1  ;;  %v2209_v34 = vsel %vm1273_vm2, %v2207_v8, %v2208_v37  ;;  %v1725_v55 = vadd.f32 %v1655_v10, %v1481_v5  ;;  %v2210_v61 = vrot.slane %v4768_v51, 2 }
 0x275   : > { %v1532_v19 = vmul.f32 %v3684_v33, %v4813_v54  ;;  %3086 = vmatprep.mubr.f32.mxu1 %v2381_v25  ;;  %v2350_v18 = vmax.f32 %v2318_v57, 0.0  ;;  %v2036_v20 = vadd.f32 %v1965_v23, %v1792_v60  ;;  %v1533_v15 = vmul.f32 %v3684_v33, %v4810_v22  ;;  %v5653_v60 = vld [vmem:[#allocation17_spill] sm:$0xff] }
 0x276   : > { %v1967_v27 = vsel %vm1028_vm1, %v1964_v24, %v5641_v42  ;;  %v1969_v53 = vrot.slane %v4928_v7, 1  ;;  %v1793_v63 = vadd.f32 %v1761_v4, %v1725_v55  ;;  %v2211_v11 = vsel %vm1273_vm2, %v2208_v37, %v2210_v61 }
 0x277   : > { %v1656_v26 = vrot.slane %v1532_v19, 2  ;;  %v2089_v13 = vmul.f32 %v3703_v48, %v4902_v16  ;;  %v2382_v51 = vadd.f32 %v2350_v18, %v5642_v6  ;;  %v2280_v44 = vadd.f32 %v2209_v34, %v2036_v20 }
 0x278   : > { %v1657_v31 = vrot.slane %v1533_v15, 2  ;;  %v5643_v54 = vrot.slane %v4922_v29, 1  ;;  %v2037_v52 = vadd.f32 %v1967_v27, %v1793_v63  ;;  %v2212_v33 = vrot.slane %v4931_v45, 2  ;;  %v5654_v27 = vld [vmem:[#allocation15_spill] sm:$0xff]  ;;  %v3052_v19 = vpop.f32.mrf.mxu1 }
 0x279   : > { %v2213_v30 = vrot.slane %v2089_v13, 2  ;;  %v1451_v7 = vmul.f32 %v3692_v40, %v4810_v22  ;;  %3087 = vmatmul.mubr.f32.gmra.mxu1 %v2382_v51  ;;  %v2319_v36 = vadd.f32 %v4803_v14, %v2280_v44  ;;  %v5645_v24 = vrot.slane %v5644_v21, 2 }
 0x27a   : > { %v1970_v46 = vsel %vm1028_vm1, %v5643_v54, %v1969_v53  ;;  %v1658_v12 = vsel %vm1273_vm2, %v1656_v26, %v1657_v31  ;;  %v1763_v29 = vmul.f32 %v3705_v49, %v4902_v16  ;;  %v2281_v35 = vadd.f32 %v2211_v11, %v2037_v52  ;;  %v5192_v52 = vld [vmem:[%s5367_s6] ss:$0 sm:$0xff] }
 0x27b   : > { %v1660_v2 = vsel %vm1273_vm2, %v1657_v31, %v5645_v24  ;;  %v1726_v10 = vadd.f32 %v1658_v12, %v5646_v1  ;;  %v2214_v45 = vsel %vm1273_vm2, %v2212_v33, %v2213_v30  ;;  %v1483_v43 = vadd.f32 %v1451_v7, %v5647_v58  ;;  %v5659_v58 = vld [vmem:[#allocation53_spill] sm:$0xff] }
 0x27c   : > { %v2351_v40 = vmax.f32 %v2319_v36, 0.0  ;;  %v5648_v22 = vrot.slane %v4860_v56, 1  ;;  %v5649_v8 = vrot.slane %v4863_v38, 2  ;;  %v5650_v37 = vrot.slane %v4916_v59, 2  ;;  %v5652_v56 = vld [vmem:[#allocation42_spill] sm:$0xff]  ;;  %v5658_v59 = vld [vmem:[#allocation16_spill] sm:$0xff] }
 0x27d   : > { %v5651_v16 = vrot.slane %v4912_v62, 2  ;;  %v2320_v5 = vadd.f32 %v4803_v14, %v2281_v35  ;;  %v1794_v4 = vadd.f32 %v4919_v9, %v1726_v10  ;;  %v1727_v41 = vadd.f32 %v1660_v2, %v1483_v43 }
 0x27e   : > { %v1972_v50 = vsel %vm1028_vm1, %v1969_v53, %v5648_v22  ;;  %v2216_v23 = vsel %vm1273_vm2, %v2213_v30, %v5649_v8  ;;  %v2383_v57 = vadd.f32 %v2351_v40, %v5652_v56  ;;  %v1764_v38 = vmul.f32 %v3705_v49, %v5653_v60  ;;  %v5655_v53 = vld [vmem:[#allocation41_spill] sm:$0xff]  ;;  %v3184_v22 = vld [vmem:[%s3598_s19 + $0x8] sm:$0xff] }
 0x27f   : > { %v1663_v28 = vsel %vm1273_vm2, %v5651_v16, %v5650_v37  ;;  %v1847_v42 = vmul.f32 %v3701_v47, %v5653_v60  ;;  %v1848_v62 = vmul.f32 %v3701_v47, %v5654_v27  ;;  %v2352_v34 = vmax.f32 %v2320_v5, 0.0  ;;  %v5660_v16 = vld [vmem:[#allocation47_spill] sm:$0xff] }
 0x280   : > { %v1728_v25 = vadd.f32 %v1663_v28, %v4942_v39  ;;  %v2038_v55 = vadd.f32 %v1970_v46, %v1794_v4  ;;  %v1795_v61 = vadd.f32 %v1763_v29, %v1727_v41  ;;  %v2091_v9 = vmul.f32 %v3703_v48, %v5653_v60  ;;  %3089 = vmatprep.mubr.f32.mxu1 %v2383_v57 }
 0x281   : > { %v1973_v18 = vrot.slane %v1847_v42, 1  ;;  %v1974_v20 = vrot.slane %v1848_v62, 1  ;;  %v2092_v15 = vmul.f32 %v3703_v48, %v5654_v27  ;;  %v2384_v63 = vadd.f32 %v2352_v34, %v5655_v53  ;;  %v3186_v34 = vld [vmem:[%s3598_s19 + $0x18] sm:$0xff]  ;;  %v3189_v53 = vld [vmem:[%s3598_s19 + $0x20] sm:$0xff] }
 0x282   : > { %v1796_v39 = vadd.f32 %v1764_v38, %v1728_v25  ;;  %v2282_v11 = vadd.f32 %v2214_v45, %v2038_v55  ;;  %v2039_v26 = vadd.f32 %v1972_v50, %v1795_v61  ;;  %v2217_v13 = vrot.slane %v2091_v9, 2  ;;  %v3187_v61 = vld [vmem:[%s3598_s19 + $0x10] sm:$0xff] }
 0x283   : > { %v1975_v6 = vsel %vm1028_vm1, %v1973_v18, %v1974_v20  ;;  %v2218_v51 = vrot.slane %v2092_v15, 2  ;;  %v1485_v44 = vadd.f32 %v4909_v0, %v4870_v32  ;;  %v5656_v31 = vrot.slane %v4857_v3, 2  ;;  %3090 = vmatmul.mubr.f32.gmra.mxu1 %v2384_v63  ;;  %v2478_v32 = vpop.f32.mrf.mxu1  ;;  %v3188_v18 = vld [vmem:[%s3598_s19 + $0x28] sm:$0xff] }
 0x284   : > { %v5657_v54 = vmov %v5650_v37  ;;  %v2321_v33 = vadd.f32 %v4803_v14, %v2282_v11  ;;  %v2283_v30 = vadd.f32 %v2216_v23, %v2039_v26  ;;  %v2040_v7 = vadd.f32 %v1975_v6, %v1796_v39  ;;  %v3185_v23 = vld [vmem:[%s3598_s19] sm:$0xff]  ;;  %v3190_v6 = vld [vmem:[%s3598_s19 + $0x38] sm:$0xff] }
 0x285   : > { %v1665_v46 = vsel %vm1273_vm2, %v5657_v54, %v5656_v31  ;;  %v1765_v36 = vmul.f32 %v3705_v49, %v5654_v27  ;;  %v2219_v3 = vsel %vm1273_vm2, %v2217_v13, %v2218_v51  ;;  %v1849_v12 = vmul.f32 %v3701_v47, %v5658_v59  ;;  %v5661_v27 = vld [vmem:[#allocation38_spill] sm:$0xff]  ;;  %v3191_v31 = vld [vmem:[%s3598_s19 + $0x30] sm:$0xff] }
 0x286   : > { %v1729_v0 = vadd.f32 %v1665_v46, %v1485_v44  ;;  %v2093_v21 = vmul.f32 %v3703_v48, %v5658_v59  ;;  %v2353_v24 = vmax.f32 %v2321_v33, 0.0  ;;  %v2322_v2 = vadd.f32 %v4803_v14, %v2283_v30 }
 0x287   : > { %v2284_v29 = vadd.f32 %v2219_v3, %v2040_v7  ;;  %v2484_v35 = vadd.f32 %v3052_v19, %v5192_v52  ;;  %v1976_v49 = vrot.slane %v1849_v12, 1  ;;  %v2479_v45 = vadd.f32 %v5192_v52, %v2478_v32  ;;  %v3192_v7 = vld [vmem:[%s3598_s19 + $0x48] sm:$0xff]  ;;  %v3193_v3 = vld [vmem:[%s3598_s19 + $0x40] sm:$0xff] }
 0x288   : > { %v1797_v1 = vadd.f32 %v1765_v36, %v1729_v0  ;;  %v2220_v10 = vrot.slane %v2093_v21, 2  ;;  %v2385_v43 = vadd.f32 %v2353_v24, %v5659_v58  ;;  %v2354_v40 = vmax.f32 %v2322_v2, 0.0  ;;  %v3194_v24 = vld [vmem:[%s3598_s19 + $0x58] sm:$0xff]  ;;  %v3196_v58 = vld [vmem:[%s3598_s19 + $0x68] sm:$0xff] }
 0x289   : > { %v2323_v47 = vadd.f32 %v4803_v14, %v2284_v29  ;;  %v2638_v48 = vadd.f32 %v3184_v22, %v2484_v35  ;;  %v1977_v50 = vsel %vm1028_vm1, %v1974_v20, %v1976_v49  ;;  %v2637_v37 = vadd.f32 %v3185_v23, %v2479_v45  ;;  %v3195_v35 = vld [vmem:[%s3598_s19 + $0x50] sm:$0xff]  ;;  %v3198_v23 = vld [vmem:[%s3598_s19 + $0x78] sm:$0xff] }
 0x28a   : > { %v2221_v8 = vsel %vm1273_vm2, %v2218_v51, %v2220_v10  ;;  %3092 = vmatprep.mubr.f32.mxu1 %v2385_v43  ;;  %v2386_v28 = vadd.f32 %v2354_v40, %v5660_v16  ;;  %v2041_v4 = vadd.f32 %v1977_v50, %v1797_v1 }
 0x28b   : > { %v2355_v5 = vmax.f32 %v2323_v47, 0.0  ;;  %2670 = vst [vmem:[%s5214_s10 + $0x8] sm:$0xff] %v2638_v48  ;;  %2669 = vst [vmem:[%s5214_s10] sm:$0xff] %v2637_v37  ;;  %v3197_v47 = vld [vmem:[%s3598_s19 + $0x60] sm:$0xff] }
 0x28c   : > { %3093 = vmatmul.mubr.f32.gmra.mxu1 %v2386_v28  ;;  %v2285_v25 = vadd.f32 %v2221_v8, %v2041_v4  ;;  %v3055_v57 = vpop.f32.mrf.mxu1  ;;  %v3199_v28 = vld [vmem:[%s3598_s19 + $0x70] sm:$0xff] }
 0x28d   : > { %v2387_v41 = vadd.f32 %v2355_v5, %v4885_v17  ;;  %v2494_v38 = vadd.f32 %v3055_v57, %v5192_v52 }
 0x28e   : > { %v2324_v56 = vadd.f32 %v4803_v14, %v2285_v25  ;;  %v2488_v42 = vpop.f32.mrf.mxu1 }
 0x28f   : > { %3095 = vmatprep.mubr.f32.mxu1 %v2387_v41  ;;  %v2640_v55 = vadd.f32 %v3186_v34, %v2494_v38  ;;  %v2489_v17 = vadd.f32 %v5192_v52, %v2488_v42  ;;  %v3201_v38 = vld [vmem:[%s3598_s19 + $0x80] sm:$0xff] }
 0x290   : > { %v2356_v60 = vmax.f32 %v2324_v56, 0.0  ;;  %v3200_v56 = vld [vmem:[%s3598_s19 + $0x88] sm:$0xff] }
 0x291   : > { %2672 = vst [vmem:[%s5214_s10 + $0x18] sm:$0xff] %v2640_v55  ;;  %v2639_v14 = vadd.f32 %v3187_v61, %v2489_v17  ;;  %v3202_v55 = vld [vmem:[%s3598_s19 + $0x98] sm:$0xff] }
 0x292   : > { %v2388_v62 = vadd.f32 %v2356_v60, %v5661_v27 }
 0x293   : > { %2671 = vst [vmem:[%s5214_s10 + $0x10] sm:$0xff] %v2639_v14  ;;  %v3203_v14 = vld [vmem:[%s3598_s19 + $0x90] sm:$0xff] }
 0x294   : > { %3096 = vmatmul.mubr.f32.gmra.mxu1 %v2388_v62 }
 0x2a1   : > { %v3058_v9 = vpop.f32.mrf.mxu1 }
 0x2a2   : > { %v2504_v19 = vadd.f32 %v3058_v9, %v5192_v52 }
 0x2a3   : > { %v2498_v39 = vpop.f32.mrf.mxu1 }
 0x2a4   : > { %v2642_v20 = vadd.f32 %v3188_v18, %v2504_v19  ;;  %v2499_v15 = vadd.f32 %v5192_v52, %v2498_v39 }
 0x2a6   : > { %2674 = vst [vmem:[%s5214_s10 + $0x28] sm:$0xff] %v2642_v20  ;;  %v2641_v63 = vadd.f32 %v3189_v53, %v2499_v15  ;;  %v3204_v20 = vld [vmem:[%s3598_s19 + $0xa8] sm:$0xff] }
 0x2a8   : > { %2673 = vst [vmem:[%s5214_s10 + $0x20] sm:$0xff] %v2641_v63  ;;  %v3205_v63 = vld [vmem:[%s3598_s19 + $0xa0] sm:$0xff] }
 0x2b4   : > { %v3061_v11 = vpop.f32.mrf.mxu1 }
 0x2b5   : > { %v2514_v26 = vadd.f32 %v3061_v11, %v5192_v52 }
 0x2b6   : > { %v2508_v13 = vpop.f32.mrf.mxu1 }
 0x2b7   : > { %v2644_v51 = vadd.f32 %v3190_v6, %v2514_v26  ;;  %v2509_v44 = vadd.f32 %v5192_v52, %v2508_v13 }
 0x2b9   : > { %2676 = vst [vmem:[%s5214_s10 + $0x38] sm:$0xff] %v2644_v51  ;;  %v2643_v54 = vadd.f32 %v3191_v31, %v2509_v44  ;;  %v3206_v51 = vld [vmem:[%s3598_s19 + $0xb8] sm:$0xff] }
 0x2bb   : > { %2675 = vst [vmem:[%s5214_s10 + $0x30] sm:$0xff] %v2643_v54  ;;  %v3207_v54 = vld [vmem:[%s3598_s19 + $0xb0] sm:$0xff] }
 0x2c7   : > { %v3064_v46 = vpop.f32.mrf.mxu1 }
 0x2c8   : > { %v2524_v33 = vadd.f32 %v3064_v46, %v5192_v52 }
 0x2c9   : > { %v2518_v30 = vpop.f32.mrf.mxu1 }
 0x2ca   : > { %v2646_v36 = vadd.f32 %v3192_v7, %v2524_v33  ;;  %v2519_v32 = vadd.f32 %v5192_v52, %v2518_v30 }
 0x2cc   : > { %2678 = vst [vmem:[%s5214_s10 + $0x48] sm:$0xff] %v2646_v36  ;;  %v2645_v0 = vadd.f32 %v3193_v3, %v2519_v32  ;;  %v3208_v36 = vld [vmem:[%s3598_s19 + $0xc8] sm:$0xff] }
 0x2ce   : > { %2677 = vst [vmem:[%s5214_s10 + $0x40] sm:$0xff] %v2645_v0  ;;  %v3209_v0 = vld [vmem:[%s3598_s19 + $0xc0] sm:$0xff] }
 0x2dc   : > { %v3067_v59 = vpop.f32.mrf.mxu1 }
 0x2dd   : > { %v2534_v12 = vadd.f32 %v3067_v59, %v5192_v52 }
 0x2de   : > { %v2528_v21 = vpop.f32.mrf.mxu1 }
 0x2df   : > { %v2648_v2 = vadd.f32 %v3194_v24, %v2534_v12  ;;  %v2529_v29 = vadd.f32 %v5192_v52, %v2528_v21 }
 0x2e1   : > { %2680 = vst [vmem:[%s5214_s10 + $0x58] sm:$0xff] %v2648_v2  ;;  %v2647_v1 = vadd.f32 %v3195_v35, %v2529_v29  ;;  %v3210_v2 = vld [vmem:[%s3598_s19 + $0xd8] sm:$0xff] }
 0x2e3   : > { %2679 = vst [vmem:[%s5214_s10 + $0x50] sm:$0xff] %v2647_v1  ;;  %v3211_v1 = vld [vmem:[%s3598_s19 + $0xd0] sm:$0xff] }
 0x2ef   : > { %v3070_v49 = vpop.f32.mrf.mxu1 }
 0x2f0   : > { %v2544_v10 = vadd.f32 %v3070_v49, %v5192_v52 }
 0x2f1   : > { %v2538_v45 = vpop.f32.mrf.mxu1 }
 0x2f2   : > { %v2650_v43 = vadd.f32 %v3196_v58, %v2544_v10  ;;  %v2539_v40 = vadd.f32 %v5192_v52, %v2538_v45 }
 0x2f4   : > { %2682 = vst [vmem:[%s5214_s10 + $0x68] sm:$0xff] %v2650_v43  ;;  %v2649_v22 = vadd.f32 %v3197_v47, %v2539_v40  ;;  %v3212_v43 = vld [vmem:[%s3598_s19 + $0xe8] sm:$0xff] }
 0x2f6   : > { %2681 = vst [vmem:[%s5214_s10 + $0x60] sm:$0xff] %v2649_v22  ;;  %v3213_v22 = vld [vmem:[%s3598_s19 + $0xe0] sm:$0xff] }
 0x302   : > { %v3073_v48 = vpop.f32.mrf.mxu1 }
 0x303   : > { %v2554_v50 = vadd.f32 %v3073_v48, %v5192_v52 }
 0x304   : > { %v2548_v8 = vpop.f32.mrf.mxu1 }
 0x305   : > { %v2652_v37 = vadd.f32 %v3198_v23, %v2554_v50  ;;  %v2549_v16 = vadd.f32 %v5192_v52, %v2548_v8 }
 0x307   : > { %2684 = vst [vmem:[%s5214_s10 + $0x78] sm:$0xff] %v2652_v37  ;;  %v2651_v5 = vadd.f32 %v3199_v28, %v2549_v16  ;;  %v3214_v37 = vld [vmem:[%s3598_s19 + $0xf8] sm:$0xff] }
 0x309   : > { %2683 = vst [vmem:[%s5214_s10 + $0x70] sm:$0xff] %v2651_v5  ;;  %v3215_v5 = vld [vmem:[%s3598_s19 + $0xf0] sm:$0xff] }
 0x313   : > { %v3076_v4 = vpop.f32.mrf.mxu1 }
 0x314   : > { %v2564_v41 = vadd.f32 %v3076_v4, %v5192_v52 }
 0x315   : > { %v2558_v25 = vpop.f32.mrf.mxu1 }
 0x316   : > { %v2654_v57 = vadd.f32 %v3200_v56, %v2564_v41  ;;  %v2559_v60 = vadd.f32 %v5192_v52, %v2558_v25 }
 0x318   : > { %2686 = vst [vmem:[%s5214_s10 + $0x88] sm:$0xff] %v2654_v57  ;;  %v2653_v42 = vadd.f32 %v3201_v38, %v2559_v60 }
 0x31a   : > { %2685 = vst [vmem:[%s5214_s10 + $0x80] sm:$0xff] %v2653_v42 }
 0x31c   : > { %v3079_v27 = vpop.f32.mrf.mxu1 }
 0x31d   : > { %v2574_v62 = vadd.f32 %v3079_v27, %v5192_v52 }
 0x31e   : > { %v2568_v34 = vpop.f32.mrf.mxu1 }
 0x31f   : > { %v2656_v17 = vadd.f32 %v3202_v55, %v2574_v62  ;;  %v2569_v61 = vadd.f32 %v5192_v52, %v2568_v34 }
 0x321   : > { %2688 = vst [vmem:[%s5214_s10 + $0x98] sm:$0xff] %v2656_v17  ;;  %v2655_v9 = vadd.f32 %v3203_v14, %v2569_v61 }
 0x323   : > { %2687 = vst [vmem:[%s5214_s10 + $0x90] sm:$0xff] %v2655_v9 }
 0x326   : > { %v3082_v19 = vpop.f32.mrf.mxu1 }
 0x327   : > { %v2584_v39 = vadd.f32 %v3082_v19, %v5192_v52 }
 0x328   : > { %v2578_v18 = vpop.f32.mrf.mxu1 }
 0x329   : > { %v2658_v15 = vadd.f32 %v3204_v20, %v2584_v39  ;;  %v2579_v53 = vadd.f32 %v5192_v52, %v2578_v18 }
 0x32b   : > { %2690 = vst [vmem:[%s5214_s10 + $0xa8] sm:$0xff] %v2658_v15  ;;  %v2657_v11 = vadd.f32 %v3205_v63, %v2579_v53 }
 0x32d   : > { %2689 = vst [vmem:[%s5214_s10 + $0xa0] sm:$0xff] %v2657_v11 }
 0x32f   : > { %v3085_v26 = vpop.f32.mrf.mxu1 }
 0x330   : > { %v2594_v13 = vadd.f32 %v3085_v26, %v5192_v52 }
 0x331   : > { %v2588_v6 = vpop.f32.mrf.mxu1 }
 0x332   : > { %v2660_v44 = vadd.f32 %v3206_v51, %v2594_v13  ;;  %v2589_v31 = vadd.f32 %v5192_v52, %v2588_v6 }
 0x334   : > { %2692 = vst [vmem:[%s5214_s10 + $0xb8] sm:$0xff] %v2660_v44  ;;  %v2659_v46 = vadd.f32 %v3207_v54, %v2589_v31 }
 0x336   : > { %2691 = vst [vmem:[%s5214_s10 + $0xb0] sm:$0xff] %v2659_v46 }
 0x339   : > { %v3088_v33 = vpop.f32.mrf.mxu1 }
 0x33a   : > { %v2604_v30 = vadd.f32 %v3088_v33, %v5192_v52 }
 0x33b   : > { %v2598_v7 = vpop.f32.mrf.mxu1 }
 0x33c   : > { %v2662_v32 = vadd.f32 %v3208_v36, %v2604_v30  ;;  %v2599_v3 = vadd.f32 %v5192_v52, %v2598_v7 }
 0x33e   : > { %2694 = vst [vmem:[%s5214_s10 + $0xc8] sm:$0xff] %v2662_v32  ;;  %v2661_v59 = vadd.f32 %v3209_v0, %v2599_v3 }
 0x340   : > { %2693 = vst [vmem:[%s5214_s10 + $0xc0] sm:$0xff] %v2661_v59 }
 0x343   : > { %v3091_v12 = vpop.f32.mrf.mxu1 }
 0x344   : > { %v2614_v21 = vadd.f32 %v3091_v12, %v5192_v52 }
 0x345   : > { %v2608_v24 = vpop.f32.mrf.mxu1 }
 0x346   : > { %v2664_v29 = vadd.f32 %v3210_v2, %v2614_v21  ;;  %v2609_v35 = vadd.f32 %v5192_v52, %v2608_v24 }
 0x348   : > { %2696 = vst [vmem:[%s5214_s10 + $0xd8] sm:$0xff] %v2664_v29  ;;  %v2663_v49 = vadd.f32 %v3211_v1, %v2609_v35 }
 0x34a   : > { %2695 = vst [vmem:[%s5214_s10 + $0xd0] sm:$0xff] %v2663_v49 }
 0x34c   : > { %v3094_v10 = vpop.f32.mrf.mxu1 }
 0x34d   : > { %v2624_v45 = vadd.f32 %v3094_v10, %v5192_v52 }
 0x34e   : > { %v2618_v58 = vpop.f32.mrf.mxu1 }
 0x34f   : > { %v2666_v40 = vadd.f32 %v3212_v43, %v2624_v45  ;;  %v2619_v47 = vadd.f32 %v5192_v52, %v2618_v58 }
 0x351   : > { %2698 = vst [vmem:[%s5214_s10 + $0xe8] sm:$0xff] %v2666_v40  ;;  %v2665_v48 = vadd.f32 %v3213_v22, %v2619_v47 }
 0x353   : > { %2697 = vst [vmem:[%s5214_s10 + $0xe0] sm:$0xff] %v2665_v48 }
 0x354   : > { %v3097_v50 = vpop.f32.mrf.mxu1 }
 0x355   : > { %v2634_v8 = vadd.f32 %v3097_v50, %v5192_v52 }
 0x356   : > { %v2628_v23 = vpop.f32.mrf.mxu1 }
 0x357   : > { %v2668_v16 = vadd.f32 %v3214_v37, %v2634_v8  ;;  %v2629_v28 = vadd.f32 %v5192_v52, %v2628_v23 }
 0x359   : > { %2700 = vst [vmem:[%s5214_s10 + $0xf8] sm:$0xff] %v2668_v16  ;;  %v2667_v4 = vadd.f32 %v3215_v5, %v2629_v28 }
 0x35b   : > { %2699 = vst [vmem:[%s5214_s10 + $0xf0] sm:$0xff] %v2667_v4 }
 0x35c   : > { %3335 = shalt.err (!%p3332_p9)
}
 0x35d   : > { %s3336_s19 = scalar_lea.hbm %s5313_s11, 4096  ;;  %s3340_s16 = scalar_lea.hbm %s5368_s7, 8192 }
 0x35e   : > { %p3337_p1 = scmp.ne.s32.totalorder %s5313_s11, %s3336_s19  ;;  %p3341_p8 = scmp.lt.s32.totalorder %s5313_s11, %s5368_s7 }
 0x35f   : > { %p3342_p3 = scmp.lt.s32.totalorder %s3340_s16, %s3336_s19 }
 0x360   : > { %p3338_p4 = pnand %p3337_p1, %p5662_p12 }
 0x361   : > { %p3343_p11 = por %p3342_p3, %p3341_p8 }
 0x362   : > { %p3339_p6 = pneg %p3338_p4 }
 0x364   : > { %p3344_p7 = pnand %p3343_p11, %p3339_p6 }
 0x366   : > { %3347 = shalt.err (!%p3344_p7)
}
 0x367   : > { %s3406_s30 = smov 128   ;;  %s3407_s9 = smov 8  }
 0x368   : > { %3112 = dma.vmem_to_hbm [thread:$0]  (%p5662_p12), %s5315_s29, 4096, %s5313_s11, %s2702_s28, %s3406_s30, %s3406_s30, %s3407_s9  }
 0x369 PF: > { %s2730_s18 = sand.u32 1, %s3382_s24   ;;  %p5663_p13 = scmp.ne.s32.totalorder %s5436_s8, 0 }
 0x36a   : > { %p5664_p0 = scmp.ge.s32.totalorder %s3394_s27, 2  ;;  %s2731_s12 = scalar_lea.sflag [#allocation4], %s2730_s18 }
 0x36c   : > { %p3129_p5 = pnand %p5664_p0, %p5663_p13 }
 0x36e   : > { %p3130_p10 = pneg %p3129_p5 }
 0x370   : > { %3377 = dma.done.wait (%p3130_p10), %s2731_s12, 4096  }
 0x371   : > { %3379 = vsyncadd (%p3130_p10), %s2731_s12, 4294963200  ;;  %p22_p2 = scmp.ge.s32.totalorder %s3523_s13, 4   ;;  %s5665_s24 = smov %s3386_s25 }
 0x372   : > { %s5666_s25 = smov %s3390_s26  ;;  %s5667_s26 = smov %s3544_s20 }
 0x373   : > { %s5668_s27 = smov %s3523_s13  ;;  %24 = sbr.rel (!%p22_p2) target bundleno = 9 (0x9), region = 105 }
 0x378   :  { %2736 = vsyncpa [#allocation3], 1 }
 0x379   :  { %2738 = vsyncpa [#allocation3 + $0x1], 1 }
 0x37a   :  { %2739 = vsyncpa [#allocation6], 1 }
 0x37b   :  { %2740 = vsyncpa [#allocation9], 1 }
 0x37c   :  { %2741 = vsyncpa [#allocation4], 1 }
 0x37d   :  { %2743 = vsyncpa [#allocation4 + $0x1], 1 }

</bundles_post_ra>
